<compile_context>
chip_gen: v5e
topology: v5e:2x2
jax: 0.10.0
libtpu: 0.0.40
codegen_flags: <defaults>
</compile_context>

<pallas_src>
import functools

import jax
import jax.numpy as jnp
from jax import lax
from jax.experimental import pallas as pl
from jax.experimental.pallas import tpu as pltpu


# ----------------------------------------------------------------------------
# Fused kernel: grouped conv(+bias) -> ReLU -> GAP -> fc1 -> ReLU -> fc2
#               -> rSoftMax -> weighted sum of radix splits      (one image / program)
# ----------------------------------------------------------------------------
def splat_fused_kernel(x_ref, w_ref, cb_ref, w1_ref, b1_ref, w2_ref, b2_ref,
                       out_ref, *, H, W, KH, KW, Cin, R, C, card):
    RC = R * C
    HW = H * W

    # ---- grouped conv as KH*KW lane-dense MXU dots (block-diagonal bf16 weights) ----
    x = x_ref[...]          # (1, H+KH-1, W+KW-1, Cin)  bf16
    w = w_ref[...]          # (KH*KW, Cin, RC)          bf16, block-diagonal over groups
    acc = jnp.zeros((HW, RC), jnp.float32)
    for ky in range(KH):
        for kx in range(KW):
            patch = x[0, ky:ky + H, kx:kx + W, :].reshape(HW, Cin)
            acc = acc + jnp.dot(patch, w[ky * KW + kx],
                                preferred_element_type=jnp.float32)
    y = jnp.maximum(acc + cb_ref[...], 0.0)              # conv bias + ReLU, (HW, RC) f32

    # ---- radix split + GAP (mean folded into constant multiply on the summed splits) ----
    splits = [y[:, r * C:(r + 1) * C] for r in range(R)]
    s = splits[0]
    for r in range(1, R):
        s = s + splits[r]
    gap = jnp.sum(s, axis=0, keepdims=True) * (1.0 / float(HW))   # (1, C)

    # ---- fc1 -> ReLU -> fc2 (grouped 1x1 convs as block-diagonal matmuls; M=1, VPU-cheap) ----
    h = jnp.maximum(
        jnp.dot(gap, w1_ref[...], preferred_element_type=jnp.float32) + b1_ref[...], 0.0)
    a = jnp.dot(h, w2_ref[...], preferred_element_type=jnp.float32) + b2_ref[...]  # (1, RC)

    # ---- rSoftMax ----
    cpc = C // card                 # channels per cardinality group
    rcpc = RC // card               # fc2 output channels per cardinality group
    if R > 1:
        per_card = []               # per_card[c][r] : (1, cpc)
        for c in range(card):
            blk = [a[:, c * rcpc + r * cpc: c * rcpc + (r + 1) * cpc] for r in range(R)]
            m = blk[0]
            for r in range(1, R):
                m = jnp.maximum(m, blk[r])
            es = [jnp.exp(v - m) for v in blk]
            denom = es[0]
            for r in range(1, R):
                denom = denom + es[r]
            inv = pl.reciprocal(denom, approx=True)       # EUP, effectively free
            per_card.append([e * inv for e in es])
        attens = []
        for r in range(R):
            parts = [per_card[c][r] for c in range(card)]
            attens.append(jnp.concatenate(parts, axis=-1) if card > 1 else parts[0])
    else:
        attens = [pl.reciprocal(1.0 + jnp.exp(-a), approx=True)]   # sigmoid

    # ---- out = sum_r atten_r * split_r ----
    out = attens[0] * splits[0]
    for r in range(1, R):
        out = out + attens[r] * splits[r]
    out_ref[...] = out.reshape(1, H, W, C)


# ----------------------------------------------------------------------------
# Parameter init (deterministic, matches PyTorch module's parameter shapes)
# ----------------------------------------------------------------------------
def init_params(key, in_channels, channels, radix, cardinality,
                reduction_factor=4, ksize=3):
    inter = max(in_channels * radix // reduction_factor, 32)
    G = cardinality * radix
    k = jax.random.split(key, 6)
    p = {
        "conv_w": 0.1 * jax.random.normal(k[0], (channels * radix, in_channels // G, ksize, ksize), jnp.float32),
        "conv_b": 0.1 * jax.random.normal(k[1], (channels * radix,), jnp.float32),
        "fc1_w": 0.1 * jax.random.normal(k[2], (inter, channels // cardinality, 1, 1), jnp.float32),
        "fc1_b": 0.1 * jax.random.normal(k[3], (inter,), jnp.float32),
        "fc2_w": 0.1 * jax.random.normal(k[4], (channels * radix, inter // cardinality, 1, 1), jnp.float32),
        "fc2_b": 0.1 * jax.random.normal(k[5], (channels * radix,), jnp.float32),
    }
    return p, inter


# ----------------------------------------------------------------------------
# Wrapper: NCHW in -> fused Pallas kernel (NHWC, grid over batch) -> NCHW out
# ----------------------------------------------------------------------------
def splat_conv2d_pallas(x_nchw, p, *, radix, cardinality, channels, padding=1):
    B, Cin, H, W = x_nchw.shape
    R, card, C = radix, cardinality, channels
    RC = R * C
    G = card * R
    cin_g = Cin // G
    cout_g = RC // G
    KH, KW = p["conv_w"].shape[2], p["conv_w"].shape[3]
    inter = p["fc1_w"].shape[0]
    cpc = C // card
    ipc = inter // card
    rcpc = RC // card
    assert 2 * padding == KH - 1, "wrapper assumes 'same' padding, stride=1, dilation=1"
    Hp, Wp = H + 2 * padding, W + 2 * padding

    # glue: layout change + spatial zero padding + bf16 cast of the MXU-path input
    x = jnp.transpose(x_nchw, (0, 2, 3, 1))
    x = jnp.pad(x, ((0, 0), (padding, padding), (padding, padding), (0, 0)))
    x = x.astype(jnp.bfloat16)

    # block-diagonal grouped-conv weight: (KH*KW, Cin, RC), bf16
    w = jnp.transpose(p["conv_w"], (2, 3, 1, 0))           # (KH, KW, cin_g, RC)
    w_bd = jnp.zeros((KH, KW, Cin, RC), jnp.float32)
    for g in range(G):
        w_bd = w_bd.at[:, :, g * cin_g:(g + 1) * cin_g, g * cout_g:(g + 1) * cout_g].set(
            w[:, :, :, g * cout_g:(g + 1) * cout_g])
    w_bd = w_bd.reshape(KH * KW, Cin, RC).astype(jnp.bfloat16)
    cb = p["conv_b"].reshape(1, RC)

    # block-diagonal grouped fc weights (f32; epilogue path)
    w1 = p["fc1_w"][:, :, 0, 0]                            # (inter, cpc)
    w1_bd = jnp.zeros((C, inter), jnp.float32)
    for c in range(card):
        w1_bd = w1_bd.at[c * cpc:(c + 1) * cpc, c * ipc:(c + 1) * ipc].set(
            jnp.transpose(w1[c * ipc:(c + 1) * ipc]))
    b1 = p["fc1_b"].reshape(1, inter)
    w2 = p["fc2_w"][:, :, 0, 0]                            # (RC, ipc)
    w2_bd = jnp.zeros((inter, RC), jnp.float32)
    for c in range(card):
        w2_bd = w2_bd.at[c * ipc:(c + 1) * ipc, c * rcpc:(c + 1) * rcpc].set(
            jnp.transpose(w2[c * rcpc:(c + 1) * rcpc]))
    b2 = p["fc2_b"].reshape(1, RC)

    kernel = functools.partial(splat_fused_kernel, H=H, W=W, KH=KH, KW=KW,
                               Cin=Cin, R=R, C=C, card=card)

    flops = 2 * B * H * W * KH * KW * Cin * RC + 2 * B * (C * inter + inter * RC)
    bytes_accessed = (B * Hp * Wp * Cin * 2 + KH * KW * Cin * RC * 2
                      + B * H * W * C * 4
                      + (C * inter + inter * RC + inter + 2 * RC) * 4)

    out_nhwc = pl.pallas_call(
        kernel,
        out_shape=jax.ShapeDtypeStruct((B, H, W, C), jnp.float32),
        grid=(B,),
        in_specs=[
            pl.BlockSpec((1, Hp, Wp, Cin), lambda b: (b, 0, 0, 0)),      # x (per-image tile)
            pl.BlockSpec((KH * KW, Cin, RC), lambda b: (0, 0, 0)),       # conv weight (resident)
            pl.BlockSpec((1, RC), lambda b: (0, 0)),                     # conv bias
            pl.BlockSpec((C, inter), lambda b: (0, 0)),                  # fc1 weight
            pl.BlockSpec((1, inter), lambda b: (0, 0)),                  # fc1 bias
            pl.BlockSpec((inter, RC), lambda b: (0, 0)),                 # fc2 weight
            pl.BlockSpec((1, RC), lambda b: (0, 0)),                     # fc2 bias
        ],
        out_specs=pl.BlockSpec((1, H, W, C), lambda b: (b, 0, 0, 0)),
        compiler_params=pltpu.CompilerParams(
            dimension_semantics=("parallel",),          # shard batch across TCs on v7x
            vmem_limit_bytes=32 * 1024 * 1024),
        cost_estimate=pl.CostEstimate(flops=flops,
                                      transcendentals=B * RC,
                                      bytes_accessed=bytes_accessed),
    )(x, w_bd, cb, w1_bd, b1, w2_bd, b2)

    return jnp.transpose(out_nhwc, (0, 3, 1, 2))           # back to NCHW


# ----------------------------------------------------------------------------
# Pure-JAX reference (mirrors the PyTorch forward, NCHW) for verification
# ----------------------------------------------------------------------------
def splat_conv2d_reference(x, p, *, radix, cardinality, channels, padding=1):
    R, card, C = radix, cardinality, channels
    G = card * R
    B = x.shape[0]
    dn = ("NCHW", "OIHW", "NCHW")
    y = lax.conv_general_dilated(x, p["conv_w"], (1, 1),
                                 ((padding, padding), (padding, padding)),
                                 feature_group_count=G, dimension_numbers=dn)
    y = jnp.maximum(y + p["conv_b"][None, :, None, None], 0.0)
    splited = [y[:, r * C:(r + 1) * C] for r in range(R)]
    gap = splited[0]
    for r in range(1, R):
        gap = gap + splited[r]
    gap = jnp.mean(gap, axis=(2, 3), keepdims=True)
    gap = lax.conv_general_dilated(gap, p["fc1_w"], (1, 1), "VALID",
                                   feature_group_count=card, dimension_numbers=dn)
    gap = jnp.maximum(gap + p["fc1_b"][None, :, None, None], 0.0)
    atten = lax.conv_general_dilated(gap, p["fc2_w"], (1, 1), "VALID",
                                     feature_group_count=card, dimension_numbers=dn)
    atten = atten + p["fc2_b"][None, :, None, None]
    a = atten.reshape(B, -1)
    if R > 1:
        a4 = jnp.transpose(a.reshape(B, card, R, -1), (0, 2, 1, 3))
        a = jax.nn.softmax(a4, axis=1).reshape(B, -1)
    else:
        a = jax.nn.sigmoid(a)
    atten = a.reshape(B, -1, 1, 1)
    attens = [atten[:, r * C:(r + 1) * C] for r in range(R)]
    out = attens[0] * splited[0]
    for r in range(1, R):
        out = out + attens[r] * splited[r]
    return out


def _check_config(key, B, Cin, H, W, channels, radix, cardinality):
    kx, kp = jax.random.split(key)
    x = jax.random.normal(kx, (B, Cin, H, W), jnp.float32)
    params, _ = init_params(kp, Cin, channels, radix, cardinality)

    out = splat_conv2d_pallas(x, params, radix=radix, cardinality=cardinality,
                              channels=channels, padding=1)
    out = jax.block_until_ready(out)

    # reference uses the same bf16-quantized conv inputs as the kernel's MXU path,
    # so the comparison isolates structural correctness from bf16 rounding.
    x_q = x.astype(jnp.bfloat16).astype(jnp.float32)
    params_q = dict(params)
    params_q["conv_w"] = params["conv_w"].astype(jnp.bfloat16).astype(jnp.float32)
    ref = splat_conv2d_reference(x_q, params_q, radix=radix, cardinality=cardinality,
                                 channels=channels, padding=1)

    assert out.shape == (B, channels, H, W), out.shape
    max_err = float(jnp.max(jnp.abs(out - ref)))
    if not bool(jnp.allclose(out, ref, atol=2e-2, rtol=2e-2)):
        raise SystemExit(
            f"Pallas/reference mismatch (radix={radix}, card={cardinality}), "
            f"max abs err = {max_err}")


if __name__ == "__main__":
    key = jax.random.PRNGKey(0)
    k1, k2, k3 = jax.random.split(key, 3)

    # small shapes consistent with the module; cover radix>1/radix=1 and cardinality>1
    _check_config(k1, B=2, Cin=16, H=16, W=16, channels=16, radix=2, cardinality=1)
    _check_config(k2, B=2, Cin=16, H=16, W=16, channels=16, radix=2, cardinality=2)
    _check_config(k3, B=2, Cin=16, H=16, W=16, channels=16, radix=1, cardinality=2)

    print("KERNEL_OK")
</pallas_src>

<mosaic_0001>
module attributes {stable_mosaic.version = 11 : i64} {
  func.func @splat_fused_kernel(%arg0: i32, %arg1: memref<1x18x18x16xbf16, #tpu.memory_space<vmem>>, %arg2: memref<9x16x32xbf16, #tpu.memory_space<vmem>>, %arg3: memref<1x32xf32, #tpu.memory_space<vmem>>, %arg4: memref<16x32xf32, #tpu.memory_space<vmem>>, %arg5: memref<1x32xf32, #tpu.memory_space<vmem>>, %arg6: memref<32x32xf32, #tpu.memory_space<vmem>>, %arg7: memref<1x32xf32, #tpu.memory_space<vmem>>, %arg8: memref<1x16x16x16xf32, #tpu.memory_space<vmem>>) attributes {dimension_semantics = [#tpu.dimension_semantics<parallel>], iteration_bounds = array<i64: 2>, scalar_prefetch = 0 : i64, scratch_operands = 0 : i64, tpu.core_type = #tpu.core_type<tc>, window_params = [{transform_indices = @transform_0, window_bounds = array<i64: 1, 18, 18, 16>}, {pipeline_mode = #tpu.pipeline_mode<synchronous>, transform_indices = @transform_1, window_bounds = array<i64: 9, 16, 32>}, {pipeline_mode = #tpu.pipeline_mode<synchronous>, transform_indices = @transform_2, window_bounds = array<i64: 1, 32>}, {pipeline_mode = #tpu.pipeline_mode<synchronous>, transform_indices = @transform_3, window_bounds = array<i64: 16, 32>}, {pipeline_mode = #tpu.pipeline_mode<synchronous>, transform_indices = @transform_4, window_bounds = array<i64: 1, 32>}, {pipeline_mode = #tpu.pipeline_mode<synchronous>, transform_indices = @transform_5, window_bounds = array<i64: 32, 32>}, {pipeline_mode = #tpu.pipeline_mode<synchronous>, transform_indices = @transform_6, window_bounds = array<i64: 1, 32>}, {transform_indices = @transform_7, window_bounds = array<i64: 1, 16, 16, 16>}]} {
    %c0 = arith.constant 0 : index
    %c0_0 = arith.constant 0 : index
    %c0_1 = arith.constant 0 : index
    %c0_2 = arith.constant 0 : index
    %0 = vector.load %arg1[%c0, %c0_0, %c0_1, %c0_2] : memref<1x18x18x16xbf16, #tpu.memory_space<vmem>>, vector<1x18x18x16xbf16>
    %c0_3 = arith.constant 0 : index
    %c0_4 = arith.constant 0 : index
    %c0_5 = arith.constant 0 : index
    %1 = vector.load %arg2[%c0_3, %c0_4, %c0_5] : memref<9x16x32xbf16, #tpu.memory_space<vmem>>, vector<9x16x32xbf16>
    %cst = arith.constant 0.000000e+00 : f32
    %2 = vector.broadcast %cst : f32 to vector<256x32xf32>
    %3 = vector.extract_strided_slice %0 {offsets = [0, 0, 0, 0], sizes = [1, 16, 16, 16], strides = [1, 1, 1, 1]} : vector<1x18x18x16xbf16> to vector<1x16x16x16xbf16>
    %4 = vector.shape_cast %3 : vector<1x16x16x16xbf16> to vector<16x16x16xbf16>
    %5 = vector.shape_cast %4 : vector<16x16x16xbf16> to vector<256x16xbf16>
    %6 = vector.extract_strided_slice %1 {offsets = [0, 0, 0], sizes = [1, 16, 32], strides = [1, 1, 1]} : vector<9x16x32xbf16> to vector<1x16x32xbf16>
    %7 = vector.shape_cast %6 : vector<1x16x32xbf16> to vector<16x32xbf16>
    %cst_6 = arith.constant dense<0.000000e+00> : vector<256x32xf32>
    %8 = tpu.matmul %5, %7, %cst_6 {dimension_numbers = #tpu.dot_dimension_numbers<[1], [0], [0], [1], [0, 0, 1, 1], [], []>} : vector<256x16xbf16>, vector<16x32xbf16>, vector<256x32xf32> -> vector<256x32xf32>
    %9 = arith.addf %2, %8 : vector<256x32xf32>
    %10 = vector.extract_strided_slice %0 {offsets = [0, 0, 1, 0], sizes = [1, 16, 16, 16], strides = [1, 1, 1, 1]} : vector<1x18x18x16xbf16> to vector<1x16x16x16xbf16>
    %11 = vector.shape_cast %10 : vector<1x16x16x16xbf16> to vector<16x16x16xbf16>
    %12 = vector.shape_cast %11 : vector<16x16x16xbf16> to vector<256x16xbf16>
    %13 = vector.extract_strided_slice %1 {offsets = [1, 0, 0], sizes = [1, 16, 32], strides = [1, 1, 1]} : vector<9x16x32xbf16> to vector<1x16x32xbf16>
    %14 = vector.shape_cast %13 : vector<1x16x32xbf16> to vector<16x32xbf16>
    %cst_7 = arith.constant dense<0.000000e+00> : vector<256x32xf32>
    %15 = tpu.matmul %12, %14, %cst_7 {dimension_numbers = #tpu.dot_dimension_numbers<[1], [0], [0], [1], [0, 0, 1, 1], [], []>} : vector<256x16xbf16>, vector<16x32xbf16>, vector<256x32xf32> -> vector<256x32xf32>
    %16 = arith.addf %9, %15 : vector<256x32xf32>
    %17 = vector.extract_strided_slice %0 {offsets = [0, 0, 2, 0], sizes = [1, 16, 16, 16], strides = [1, 1, 1, 1]} : vector<1x18x18x16xbf16> to vector<1x16x16x16xbf16>
    %18 = vector.shape_cast %17 : vector<1x16x16x16xbf16> to vector<16x16x16xbf16>
    %19 = vector.shape_cast %18 : vector<16x16x16xbf16> to vector<256x16xbf16>
    %20 = vector.extract_strided_slice %1 {offsets = [2, 0, 0], sizes = [1, 16, 32], strides = [1, 1, 1]} : vector<9x16x32xbf16> to vector<1x16x32xbf16>
    %21 = vector.shape_cast %20 : vector<1x16x32xbf16> to vector<16x32xbf16>
    %cst_8 = arith.constant dense<0.000000e+00> : vector<256x32xf32>
    %22 = tpu.matmul %19, %21, %cst_8 {dimension_numbers = #tpu.dot_dimension_numbers<[1], [0], [0], [1], [0, 0, 1, 1], [], []>} : vector<256x16xbf16>, vector<16x32xbf16>, vector<256x32xf32> -> vector<256x32xf32>
    %23 = arith.addf %16, %22 : vector<256x32xf32>
    %24 = vector.extract_strided_slice %0 {offsets = [0, 1, 0, 0], sizes = [1, 16, 16, 16], strides = [1, 1, 1, 1]} : vector<1x18x18x16xbf16> to vector<1x16x16x16xbf16>
    %25 = vector.shape_cast %24 : vector<1x16x16x16xbf16> to vector<16x16x16xbf16>
    %26 = vector.shape_cast %25 : vector<16x16x16xbf16> to vector<256x16xbf16>
    %27 = vector.extract_strided_slice %1 {offsets = [3, 0, 0], sizes = [1, 16, 32], strides = [1, 1, 1]} : vector<9x16x32xbf16> to vector<1x16x32xbf16>
    %28 = vector.shape_cast %27 : vector<1x16x32xbf16> to vector<16x32xbf16>
    %cst_9 = arith.constant dense<0.000000e+00> : vector<256x32xf32>
    %29 = tpu.matmul %26, %28, %cst_9 {dimension_numbers = #tpu.dot_dimension_numbers<[1], [0], [0], [1], [0, 0, 1, 1], [], []>} : vector<256x16xbf16>, vector<16x32xbf16>, vector<256x32xf32> -> vector<256x32xf32>
    %30 = arith.addf %23, %29 : vector<256x32xf32>
    %31 = vector.extract_strided_slice %0 {offsets = [0, 1, 1, 0], sizes = [1, 16, 16, 16], strides = [1, 1, 1, 1]} : vector<1x18x18x16xbf16> to vector<1x16x16x16xbf16>
    %32 = vector.shape_cast %31 : vector<1x16x16x16xbf16> to vector<16x16x16xbf16>
    %33 = vector.shape_cast %32 : vector<16x16x16xbf16> to vector<256x16xbf16>
    %34 = vector.extract_strided_slice %1 {offsets = [4, 0, 0], sizes = [1, 16, 32], strides = [1, 1, 1]} : vector<9x16x32xbf16> to vector<1x16x32xbf16>
    %35 = vector.shape_cast %34 : vector<1x16x32xbf16> to vector<16x32xbf16>
    %cst_10 = arith.constant dense<0.000000e+00> : vector<256x32xf32>
    %36 = tpu.matmul %33, %35, %cst_10 {dimension_numbers = #tpu.dot_dimension_numbers<[1], [0], [0], [1], [0, 0, 1, 1], [], []>} : vector<256x16xbf16>, vector<16x32xbf16>, vector<256x32xf32> -> vector<256x32xf32>
    %37 = arith.addf %30, %36 : vector<256x32xf32>
    %38 = vector.extract_strided_slice %0 {offsets = [0, 1, 2, 0], sizes = [1, 16, 16, 16], strides = [1, 1, 1, 1]} : vector<1x18x18x16xbf16> to vector<1x16x16x16xbf16>
    %39 = vector.shape_cast %38 : vector<1x16x16x16xbf16> to vector<16x16x16xbf16>
    %40 = vector.shape_cast %39 : vector<16x16x16xbf16> to vector<256x16xbf16>
    %41 = vector.extract_strided_slice %1 {offsets = [5, 0, 0], sizes = [1, 16, 32], strides = [1, 1, 1]} : vector<9x16x32xbf16> to vector<1x16x32xbf16>
    %42 = vector.shape_cast %41 : vector<1x16x32xbf16> to vector<16x32xbf16>
    %cst_11 = arith.constant dense<0.000000e+00> : vector<256x32xf32>
    %43 = tpu.matmul %40, %42, %cst_11 {dimension_numbers = #tpu.dot_dimension_numbers<[1], [0], [0], [1], [0, 0, 1, 1], [], []>} : vector<256x16xbf16>, vector<16x32xbf16>, vector<256x32xf32> -> vector<256x32xf32>
    %44 = arith.addf %37, %43 : vector<256x32xf32>
    %45 = vector.extract_strided_slice %0 {offsets = [0, 2, 0, 0], sizes = [1, 16, 16, 16], strides = [1, 1, 1, 1]} : vector<1x18x18x16xbf16> to vector<1x16x16x16xbf16>
    %46 = vector.shape_cast %45 : vector<1x16x16x16xbf16> to vector<16x16x16xbf16>
    %47 = vector.shape_cast %46 : vector<16x16x16xbf16> to vector<256x16xbf16>
    %48 = vector.extract_strided_slice %1 {offsets = [6, 0, 0], sizes = [1, 16, 32], strides = [1, 1, 1]} : vector<9x16x32xbf16> to vector<1x16x32xbf16>
    %49 = vector.shape_cast %48 : vector<1x16x32xbf16> to vector<16x32xbf16>
    %cst_12 = arith.constant dense<0.000000e+00> : vector<256x32xf32>
    %50 = tpu.matmul %47, %49, %cst_12 {dimension_numbers = #tpu.dot_dimension_numbers<[1], [0], [0], [1], [0, 0, 1, 1], [], []>} : vector<256x16xbf16>, vector<16x32xbf16>, vector<256x32xf32> -> vector<256x32xf32>
    %51 = arith.addf %44, %50 : vector<256x32xf32>
    %52 = vector.extract_strided_slice %0 {offsets = [0, 2, 1, 0], sizes = [1, 16, 16, 16], strides = [1, 1, 1, 1]} : vector<1x18x18x16xbf16> to vector<1x16x16x16xbf16>
    %53 = vector.shape_cast %52 : vector<1x16x16x16xbf16> to vector<16x16x16xbf16>
    %54 = vector.shape_cast %53 : vector<16x16x16xbf16> to vector<256x16xbf16>
    %55 = vector.extract_strided_slice %1 {offsets = [7, 0, 0], sizes = [1, 16, 32], strides = [1, 1, 1]} : vector<9x16x32xbf16> to vector<1x16x32xbf16>
    %56 = vector.shape_cast %55 : vector<1x16x32xbf16> to vector<16x32xbf16>
    %cst_13 = arith.constant dense<0.000000e+00> : vector<256x32xf32>
    %57 = tpu.matmul %54, %56, %cst_13 {dimension_numbers = #tpu.dot_dimension_numbers<[1], [0], [0], [1], [0, 0, 1, 1], [], []>} : vector<256x16xbf16>, vector<16x32xbf16>, vector<256x32xf32> -> vector<256x32xf32>
    %58 = arith.addf %51, %57 : vector<256x32xf32>
    %59 = vector.extract_strided_slice %0 {offsets = [0, 2, 2, 0], sizes = [1, 16, 16, 16], strides = [1, 1, 1, 1]} : vector<1x18x18x16xbf16> to vector<1x16x16x16xbf16>
    %60 = vector.shape_cast %59 : vector<1x16x16x16xbf16> to vector<16x16x16xbf16>
    %61 = vector.shape_cast %60 : vector<16x16x16xbf16> to vector<256x16xbf16>
    %62 = vector.extract_strided_slice %1 {offsets = [8, 0, 0], sizes = [1, 16, 32], strides = [1, 1, 1]} : vector<9x16x32xbf16> to vector<1x16x32xbf16>
    %63 = vector.shape_cast %62 : vector<1x16x32xbf16> to vector<16x32xbf16>
    %cst_14 = arith.constant dense<0.000000e+00> : vector<256x32xf32>
    %64 = tpu.matmul %61, %63, %cst_14 {dimension_numbers = #tpu.dot_dimension_numbers<[1], [0], [0], [1], [0, 0, 1, 1], [], []>} : vector<256x16xbf16>, vector<16x32xbf16>, vector<256x32xf32> -> vector<256x32xf32>
    %65 = arith.addf %58, %64 : vector<256x32xf32>
    %c0_15 = arith.constant 0 : index
    %c0_16 = arith.constant 0 : index
    %66 = vector.load %arg3[%c0_15, %c0_16] : memref<1x32xf32, #tpu.memory_space<vmem>>, vector<1x32xf32>
    %67 = vector.broadcast %66 : vector<1x32xf32> to vector<256x32xf32>
    %68 = arith.addf %65, %67 : vector<256x32xf32>
    %cst_17 = arith.constant 0.000000e+00 : f32
    %69 = vector.broadcast %cst_17 : f32 to vector<256x32xf32>
    %70 = arith.maximumf %68, %69 : vector<256x32xf32>
    %71 = vector.extract_strided_slice %70 {offsets = [0, 0], sizes = [256, 16], strides = [1, 1]} : vector<256x32xf32> to vector<256x16xf32>
    %72 = vector.extract_strided_slice %70 {offsets = [0, 16], sizes = [256, 16], strides = [1, 1]} : vector<256x32xf32> to vector<256x16xf32>
    %73 = arith.addf %71, %72 : vector<256x16xf32>
    %cst_18 = arith.constant dense<0.000000e+00> : vector<16xf32>
    %74 = vector.multi_reduction <add>, %73, %cst_18 [0] : vector<256x16xf32> to vector<16xf32>
    %75 = vector.shape_cast %74 : vector<16xf32> to vector<1x16xf32>
    %cst_19 = arith.constant 3.906250e-03 : f32
    %76 = vector.broadcast %cst_19 : f32 to vector<1x16xf32>
    %77 = arith.mulf %75, %76 : vector<1x16xf32>
    %c0_20 = arith.constant 0 : index
    %c0_21 = arith.constant 0 : index
    %78 = vector.load %arg4[%c0_20, %c0_21] : memref<16x32xf32, #tpu.memory_space<vmem>>, vector<16x32xf32>
    %cst_22 = arith.constant dense<0.000000e+00> : vector<1x32xf32>
    %79 = tpu.matmul %77, %78, %cst_22 {dimension_numbers = #tpu.dot_dimension_numbers<[1], [0], [0], [1], [0, 0, 1, 1], [], []>} : vector<1x16xf32>, vector<16x32xf32>, vector<1x32xf32> -> vector<1x32xf32>
    %c0_23 = arith.constant 0 : index
    %c0_24 = arith.constant 0 : index
    %80 = vector.load %arg5[%c0_23, %c0_24] : memref<1x32xf32, #tpu.memory_space<vmem>>, vector<1x32xf32>
    %81 = arith.addf %79, %80 : vector<1x32xf32>
    %cst_25 = arith.constant 0.000000e+00 : f32
    %82 = vector.broadcast %cst_25 : f32 to vector<1x32xf32>
    %83 = arith.maximumf %81, %82 : vector<1x32xf32>
    %c0_26 = arith.constant 0 : index
    %c0_27 = arith.constant 0 : index
    %84 = vector.load %arg6[%c0_26, %c0_27] : memref<32x32xf32, #tpu.memory_space<vmem>>, vector<32x32xf32>
    %cst_28 = arith.constant dense<0.000000e+00> : vector<1x32xf32>
    %85 = tpu.matmul %83, %84, %cst_28 {dimension_numbers = #tpu.dot_dimension_numbers<[1], [0], [0], [1], [0, 0, 1, 1], [], []>} : vector<1x32xf32>, vector<32x32xf32>, vector<1x32xf32> -> vector<1x32xf32>
    %c0_29 = arith.constant 0 : index
    %c0_30 = arith.constant 0 : index
    %86 = vector.load %arg7[%c0_29, %c0_30] : memref<1x32xf32, #tpu.memory_space<vmem>>, vector<1x32xf32>
    %87 = arith.addf %85, %86 : vector<1x32xf32>
    %88 = vector.extract_strided_slice %87 {offsets = [0, 0], sizes = [1, 16], strides = [1, 1]} : vector<1x32xf32> to vector<1x16xf32>
    %89 = vector.extract_strided_slice %87 {offsets = [0, 16], sizes = [1, 16], strides = [1, 1]} : vector<1x32xf32> to vector<1x16xf32>
    %90 = arith.maximumf %88, %89 : vector<1x16xf32>
    %91 = arith.subf %88, %90 : vector<1x16xf32>
    %92 = math.exp %91 : vector<1x16xf32>
    %93 = arith.subf %89, %90 : vector<1x16xf32>
    %94 = math.exp %93 : vector<1x16xf32>
    %95 = arith.addf %92, %94 : vector<1x16xf32>
    %96 = tpu.reciprocal %95 {approx = true} : vector<1x16xf32> -> vector<1x16xf32>
    %97 = arith.mulf %92, %96 : vector<1x16xf32>
    %98 = arith.mulf %94, %96 : vector<1x16xf32>
    %99 = vector.broadcast %97 : vector<1x16xf32> to vector<256x16xf32>
    %100 = arith.mulf %99, %71 : vector<256x16xf32>
    %101 = vector.broadcast %98 : vector<1x16xf32> to vector<256x16xf32>
    %102 = arith.mulf %101, %72 : vector<256x16xf32>
    %103 = arith.addf %100, %102 : vector<256x16xf32>
    %104 = vector.shape_cast %103 : vector<256x16xf32> to vector<1x16x16x16xf32>
    %c0_31 = arith.constant 0 : index
    %c0_32 = arith.constant 0 : index
    %c0_33 = arith.constant 0 : index
    %c0_34 = arith.constant 0 : index
    %105 = vector.load %arg8[%c0_31, %c0_32, %c0_33, %c0_34] : memref<1x16x16x16xf32, #tpu.memory_space<vmem>>, vector<1x16x16x16xf32>
    tpu.vector_store %arg8[%c0_31, %c0_32, %c0_33, %c0_34], %104 {strides = array<i32>} : memref<1x16x16x16xf32, #tpu.memory_space<vmem>>, vector<1x16x16x16xf32>,
    return
  }
  func.func @transform_0(%arg0: i32) -> (i32, i32, i32, i32) {
    %c0_i32 = arith.constant 0 : i32
    %c0_i32_0 = arith.constant 0 : i32
    %c0_i32_1 = arith.constant 0 : i32
    %c0_i32_2 = arith.constant 0 : i32
    return %arg0, %c0_i32, %c0_i32_0, %c0_i32_1 : i32, i32, i32, i32
  }
  func.func @transform_1(%arg0: i32) -> (i32, i32, i32) {
    %c0_i32 = arith.constant 0 : i32
    %c0_i32_0 = arith.constant 0 : i32
    %c0_i32_1 = arith.constant 0 : i32
    %c0_i32_2 = arith.constant 0 : i32
    return %c0_i32, %c0_i32_0, %c0_i32_1 : i32, i32, i32
  }
  func.func @transform_2(%arg0: i32) -> (i32, i32) {
    %c0_i32 = arith.constant 0 : i32
    %c0_i32_0 = arith.constant 0 : i32
    %c0_i32_1 = arith.constant 0 : i32
    return %c0_i32, %c0_i32_0 : i32, i32
  }
  func.func @transform_3(%arg0: i32) -> (i32, i32) {
    %c0_i32 = arith.constant 0 : i32
    %c0_i32_0 = arith.constant 0 : i32
    %c0_i32_1 = arith.constant 0 : i32
    return %c0_i32, %c0_i32_0 : i32, i32
  }
  func.func @transform_4(%arg0: i32) -> (i32, i32) {
    %c0_i32 = arith.constant 0 : i32
    %c0_i32_0 = arith.constant 0 : i32
    %c0_i32_1 = arith.constant 0 : i32
    return %c0_i32, %c0_i32_0 : i32, i32
  }
  func.func @transform_5(%arg0: i32) -> (i32, i32) {
    %c0_i32 = arith.constant 0 : i32
    %c0_i32_0 = arith.constant 0 : i32
    %c0_i32_1 = arith.constant 0 : i32
    return %c0_i32, %c0_i32_0 : i32, i32
  }
  func.func @transform_6(%arg0: i32) -> (i32, i32) {
    %c0_i32 = arith.constant 0 : i32
    %c0_i32_0 = arith.constant 0 : i32
    %c0_i32_1 = arith.constant 0 : i32
    return %c0_i32, %c0_i32_0 : i32, i32
  }
  func.func @transform_7(%arg0: i32) -> (i32, i32, i32, i32) {
    %c0_i32 = arith.constant 0 : i32
    %c0_i32_0 = arith.constant 0 : i32
    %c0_i32_1 = arith.constant 0 : i32
    %c0_i32_2 = arith.constant 0 : i32
    return %arg0, %c0_i32, %c0_i32_0, %c0_i32_1 : i32, i32, i32, i32
  }
}

</mosaic_0001>

<bundles_post_ra>
// kernel: tpu_custom_call.1
= control target key start
LH: loop header
LB: loop body
LE: loop exit
PB: predicated region body
PF: predicated region fallthrough
CT: control target
= control target key end

     0   :  { %12 = vsyncpa [#allocation3], 0  ;;  %s5169_s0 = inlined_call_operand.vmem [shape: bf16[2,18,18,16], index: 0, kind: input, shape index: {}]   ;;  %s5170_s1 = inlined_call_operand.vmem [shape: bf16[9,16,32], index: 1, kind: input, shape index: {}]   ;;  %s5171_s2 = inlined_call_operand.vmem [shape: f32[1,32], index: 2, kind: input, shape index: {}]   ;;  %s5172_s3 = inlined_call_operand.vmem [shape: f32[16,32], index: 3, kind: input, shape index: {}]   ;;  %s5173_s4 = inlined_call_operand.vmem [shape: f32[1,32], index: 4, kind: input, shape index: {}]   ;;  %s5174_s5 = inlined_call_operand.vmem [shape: f32[32,32], index: 5, kind: input, shape index: {}]   ;;  %s5175_s6 = inlined_call_operand.vmem [shape: f32[1,32], index: 6, kind: input, shape index: {}]   ;;  %s5176_s7 = inlined_call_operand.hbm [shape: f32[2,16,16,16], index: 7, kind: output, shape index: {}]  }
   0x1   :  { %14 = vsyncpa [#allocation3 + $0x1], 0  ;;  %s3566_s24 = smov 0   ;;  %s3568_s25 = smov 0  }
   0x2   :  { %s3570_s26 = smov 0   ;;  %s3572_s27 = smov 0  }
   0x3 LB: > { %s3587_s28 = sadd.s32 4294967295, %s3520_s27   ;;  %s3089_s29 = sadd.s32 4294967294, %s3520_s27   ;;  %s3520_s27 = sphi %s3572_s27, %s5352_s27   ;;  %s3516_s26 = sphi %s3570_s26, %s5351_s26   ;;  %s3512_s25 = sphi %s3568_s25, %s5350_s25   ;;  %s3508_s24 = sphi %s3566_s24, %s5349_s24  }
   0x4   : > { %s3591_s30 = sadd.s32 1, %s3520_s27   ;;  %s179_s8 = sadd.s32 1, %s3516_s26 }
   0x5   : > { %s176_s9 = ssub.s32 %s3520_s27, %s3591_s30  ;;  %p189_p0 = scmp.ne.s32.totalorder %s3516_s26, %s3512_s25 }
   0x6   : > { %p177_p1 = scmp.eq.s32.totalorder %s176_s9, 0  ;;  %p190_p2 = scmp.eq.s32.totalorder %s3587_s28, 1 }
   0x7   : > { %p195_p3 = scmp.ne.s32.totalorder %s3512_s25, %s3508_s24  ;;  %p196_p4 = scmp.eq.s32.totalorder %s3089_s29, 1 }
   0x8   : > { %s3602_s10 = scalar_select %p177_p1, %s3516_s26, %s179_s8  }
   0x9   : > { %p3604_p5 = por %p190_p2, %p189_p0  ;;  %p3608_p6 = por %p196_p4, %p195_p3 }
   0xa   : > { %p3092_p7 = scmp.ge.s32.totalorder %s3520_s27, 1  ;;  %p240_p8 = scmp.lt.s32.totalorder %s3520_s27, 3 }
   0xc   : > { %p241_p9 = pnand %p3092_p7, %p240_p8 }
   0xe   : > { %244 = sbr.rel (%p241_p9) target bundleno = 1818 (0x71a), region = 48 }
  0x13   : > { %v3391_v0 = vld [vmem:[%s5170_s1 + $0x8] sm:$0xff]  ;;  %p272_p10 = scmp.lt.s32.totalorder %s3587_s28, 1  ;;  %v3393_v1 = vld [vmem:[%s5170_s1 + $0x18] sm:$0xff]  ;;  %v3394_v2 = vld [vmem:[%s5170_s1 + $0x20] sm:$0xff]  ;;  %vm350_vm0 = vsmask.f32 3328 }
  0x14   : > { %847 = vmatpush.bf16.msra.mxu0 %v3391_v0  ;;  %3400 = vmatpush.bf16.msra.mxu1 %v3391_v0  ;;  %vm351_vm1 = vsmask.f32 7440  ;;  %vm791_vm2 = vcmask 130048   ;;  %v3390_v42 = vld [vmem:[%s5170_s1] sm:$0xff]  ;;  %vm1168_vm4 = vcmask 1042432   ;;  %vm1169_vm5 = vcmask 1046532  }
  0x15   : > { %s273_s19 = scalar_select %p272_p10, %s3587_s28, 1  ;;  %3402 = vmatpush.bf16.msra.mxu3 %v3391_v0  ;;  %3401 = vmatpush.bf16.msra.mxu2 %v3391_v0  ;;  %vm3662_vm3 = vmor %vm350_vm0, %vm351_vm1  ;;  %v2671_v28 = vld [vmem:[%s5172_s3 + $0x8] sm:$0xff]  ;;  %vm2702_vm7 = vcmask 261120  }
  0x16   : > { %vm3930_vm6 = vmor %vm1168_vm4, %vm1169_vm5  ;;  %s3522_s8 = smov 112   ;;  %s3523_s14 = smov 16  }
  0x17   : > { %s3403_s20 = smul.u32 216, %s273_s19  ;;  %s269_s15 = sand.u32 1, %s3512_s25  }
  0x18   : > { %1684 = vmatpush.bf16.msrb.mxu0 %v3394_v2  ;;  %1070 = vmatpush.bf16.msrb.mxu1 %v3390_v42  ;;  %s3093_s16 = sshll.u32 %s269_s15, 8 }
  0x19   : > { %1527 = vmatpush.bf16.msrb.mxu3 %v3393_v1  ;;  %s3628_s23 = scalar_lea.vmem %s5169_s0, %s3403_s20  ;;  %s5007_s17 = scalar_lea.vmem [#allocation2], %s3093_s16 }
  0x1a   : > { %v3631_v3 = vld [vmem:[%s3628_s23] sm:$0xf]  ;;  %v3634_v4 = vld [vmem:[%s3628_s23 + $0x4] sm:$0xf]  ;;  %v3637_v5 = vld [vmem:[%s3628_s23 + $0x8] sm:$0x1] }
  0x1b   : > { %v354_v6 = vshrl.u32 %v3631_v3, 16  ;;  %v357_v7 = vshll.u32 %v3631_v3, 16  ;;  %v363_v8 = vshll.u32 %v3634_v4, 16  ;;  %v367_v9 = vshrl.u32 %v3634_v4, 16  ;;  %v3644_v10 = vld [vmem:[%s3628_s23 + $0x3c] sm:$0xf] }
  0x1c   : > { %v373_v11 = vshll.u32 %v3637_v5, 16  ;;  %v3648_v12 = vld [vmem:[%s3628_s23 + $0x40] sm:$0xf]  ;;  %v3651_v13 = vld [vmem:[%s3628_s23 + $0x44] sm:$0x1]  ;;  %v474_v20 = vshrl.u32 %v3644_v10, 16 }
  0x1d   : > { %v356_v14 = vrot.slane %v354_v6, 4  ;;  %v359_v15 = vrot.slane %v357_v7, 5  ;;  %v365_v16 = vrot.slane %v363_v8, 5  ;;  %v369_v17 = vrot.slane %v367_v9, 4  ;;  %v311_v18 = vld [vmem:[%s3628_s23 + $0x84] sm:$0xf] }
  0x1e   : > { %v375_v19 = vrot.slane %v373_v11, 5  ;;  %v477_v21 = vshll.u32 %v3644_v10, 16  ;;  %v483_v22 = vshll.u32 %v3648_v12, 16  ;;  %v487_v25 = vshrl.u32 %v3648_v12, 16  ;;  %v312_v27 = vld [vmem:[%s3628_s23 + $0x88] sm:$0xf] }
  0x1f   : > { %v360_v23 = vor.u32 %v359_v15, %v356_v14  ;;  %v370_v24 = vor.u32 %v369_v17, %v365_v16  ;;  %v493_v26 = vshll.u32 %v3651_v13, 16  ;;  %v476_v29 = vrot.slane %v474_v20, 4  ;;  %v313_v38 = vld [vmem:[%s3628_s23 + $0x8c] sm:$0x1]  ;;  %v3680_v59 = vld [vmem:[%s3628_s23 + $0x10] sm:$0xf] }
  0x20   : > { %v479_v30 = vrot.slane %v477_v21, 5  ;;  %v485_v31 = vrot.slane %v483_v22, 5  ;;  %v618_v32 = vshrl.u32 %v311_v18, 16  ;;  %v489_v35 = vrot.slane %v487_v25, 4  ;;  %v3675_v55 = vld [vmem:[%s3628_s23 + $0xc] sm:$0xf] }
  0x21   : > { %v361_v33 = vrot.slane %v360_v23, 4  ;;  %v371_v34 = vrot.slane %v370_v24, 4  ;;  %v495_v36 = vrot.slane %v493_v26, 5  ;;  %v621_v40 = vshll.u32 %v311_v18, 16  ;;  %v3683_v60 = vld [vmem:[%s3628_s23 + $0x14] sm:$0x1] }
  0x22   : > { %v480_v37 = vor.u32 %v479_v30, %v476_v29  ;;  %v620_v39 = vrot.slane %v618_v32, 4  ;;  %v627_v41 = vshll.u32 %v312_v27, 16  ;;  %v490_v45 = vor.u32 %v489_v35, %v485_v31  ;;  %v3694_v15 = vld [vmem:[%s3628_s23 + $0x48] sm:$0xf]  ;;  %v3701_v20 = vld [vmem:[%s3628_s23 + $0x4c] sm:$0xf] }
  0x23   : > { %v366_v43 = vsel %vm3662_vm3, %v361_v33, %v365_v16  ;;  %v376_v44 = vsel %vm3662_vm3, %v371_v34, %v375_v19  ;;  %v631_v46 = vshrl.u32 %v312_v27, 16  ;;  %v623_v50 = vrot.slane %v621_v40, 5  ;;  %v3706_v25 = vld [vmem:[%s3628_s23 + $0x50] sm:$0x1]  ;;  %s3024_s21 = sshll.u32 %s5007_s17, 4  ;;  %s3025_s21 = int_to_ptr.vmem [resolvable:$true] %s3024_s21 }
  0x24   : > { %v737_v47 = vunpack.c.l.b16 %v366_v43  ;;  %v738_v48 = vunpack.c.l.b16 %v376_v44  ;;  %v481_v49 = vrot.slane %v480_v37, 4  ;;  %v491_v51 = vrot.slane %v490_v45, 4  ;;  %v314_v35 = vld [vmem:[%s3628_s23 + $0x90] sm:$0xf]  ;;  %v3719_v44 = vld [vmem:[%s3628_s23 + $0x94] sm:$0xf] }
  0x25   : > { %v629_v52 = vrot.slane %v627_v41, 5  ;;  %v633_v53 = vrot.slane %v631_v46, 4  ;;  %v637_v54 = vshll.u32 %v313_v38, 16  ;;  %v624_v58 = vor.u32 %v623_v50, %v620_v39  ;;  %5240 = vst [vmem:[#allocation7_spill] sm:$0xff] %v3719_v44 }
  0x26   : > { %v769_v56 = vpack.c.b16 %v738_v48, %v737_v47  ;;  %v486_v57 = vsel %vm3662_vm3, %v481_v49, %v485_v31  ;;  %v496_v61 = vsel %vm3662_vm3, %v491_v51, %v495_v36  ;;  %v378_v6 = vshrl.u32 %v3675_v55, 16  ;;  %v3726_v47 = vld [vmem:[%s3628_s23 + $0x98] sm:$0x1] }
  0x27   : > { %v747_v62 = vunpack.c.l.b16 %v486_v57  ;;  %v634_v63 = vor.u32 %v633_v53, %v629_v52  ;;  %v639_v0 = vrot.slane %v637_v54, 5  ;;  %v748_v1 = vunpack.c.l.b16 %v496_v61  ;;  %5241 = vst [vmem:[#allocation8_spill] sm:$0xff] %v3726_v47 }
  0x28   : > { %3099 = vmatmul.msk.bf16.vlgmr.msra.gmra.mxu0 %vm791_vm2, %v769_v56  ;;  %v625_v2 = vrot.slane %v624_v58, 4  ;;  %v381_v7 = vshll.u32 %v3675_v55, 16  ;;  %v387_v9 = vshll.u32 %v3680_v59, 16  ;;  %v391_v11 = vshrl.u32 %v3680_v59, 16 }
  0x29   : > { %v635_v8 = vrot.slane %v634_v63, 4  ;;  %v397_v14 = vshll.u32 %v3683_v60, 16  ;;  %v3696_v16 = vpack.c.b16 %v748_v1, %v747_v62  ;;  %v380_v18 = vrot.slane %v378_v6, 4  ;;  %v3734_v1 = vld [vmem:[%s3628_s23 + $0x6c] sm:$0xf] }
  0x2a   : > { %v630_v17 = vsel %vm3662_vm3, %v625_v2, %v629_v52  ;;  %v383_v19 = vrot.slane %v381_v7, 5  ;;  %v389_v23 = vrot.slane %v387_v9, 5  ;;  %v393_v24 = vrot.slane %v391_v11, 4 }
  0x2b   : > { %5238 = vst [vmem:[#allocation5_spill] sm:$0xff] %v3696_v16  ;;  %v640_v21 = vsel %vm3662_vm3, %v635_v8, %v639_v0  ;;  %v759_v22 = vunpack.c.l.b16 %v630_v17  ;;  %3104 = vmatmul.msk.bf16.vlgmr.msra.gmra.mxu1 %vm791_vm2, %v3696_v16  ;;  %v399_v29 = vrot.slane %v397_v14, 5  ;;  %v498_v30 = vshrl.u32 %v3694_v15, 16  ;;  %v3739_v8 = vld [vmem:[%s3628_s23 + $0x70] sm:$0xf] }
  0x2c   : > { %v760_v26 = vunpack.c.l.b16 %v640_v21  ;;  %v384_v27 = vor.u32 %v383_v19, %v380_v18  ;;  %v394_v31 = vor.u32 %v393_v24, %v389_v23  ;;  %v501_v32 = vshll.u32 %v3694_v15, 16  ;;  %v3746_v18 = vld [vmem:[%s3628_s23 + $0x74] sm:$0x1] }
  0x2d   : > { %v507_v33 = vshll.u32 %v3701_v20, 16  ;;  %v511_v34 = vshrl.u32 %v3701_v20, 16  ;;  %v500_v38 = vrot.slane %v498_v30, 4  ;;  %v517_v39 = vshll.u32 %v3706_v25, 16  ;;  %v3753_v30 = vld [vmem:[%s3628_s23 + $0x18] sm:$0xf] }
  0x2e   : > { %v3715_v36 = vpack.c.b16 %v760_v26, %v759_v22  ;;  %v385_v37 = vrot.slane %v384_v27, 4  ;;  %v395_v40 = vrot.slane %v394_v31, 4  ;;  %v503_v41 = vrot.slane %v501_v32, 5  ;;  %v3392_v31 = vld [vmem:[%s5170_s1 + $0x10] sm:$0xff] }
  0x2f   : > { %v509_v42 = vrot.slane %v507_v33, 5  ;;  %v513_v43 = vrot.slane %v511_v34, 4  ;;  %v519_v46 = vrot.slane %v517_v39, 5  ;;  %v642_v48 = vshrl.u32 %v314_v35, 16  ;;  %1392 = vmatpush.bf16.msrb.mxu2 %v3392_v31 }
  0x30   : > { %5239 = vst [vmem:[#allocation6_spill] sm:$0xff] %v3715_v36  ;;  %3110 = vmatmul.msk.bf16.vlgmr.msra.gmra.mxu3 %vm791_vm2, %v3715_v36  ;;  %v390_v45 = vsel %vm3662_vm3, %v385_v37, %v389_v23  ;;  %v645_v49 = vshll.u32 %v314_v35, 16  ;;  %v400_v50 = vsel %vm3662_vm3, %v395_v40, %v399_v29  ;;  %v504_v52 = vor.u32 %v503_v41, %v500_v38  ;;  %v3766_v37 = vld [vmem:[%s3628_s23 + $0x1c] sm:$0xf] }
  0x31   : > { %v739_v51 = vunpack.c.l.b16 %v390_v45  ;;  %v514_v53 = vor.u32 %v513_v43, %v509_v42  ;;  %v740_v54 = vunpack.c.l.b16 %v400_v50  ;;  %v644_v56 = vrot.slane %v642_v48, 4  ;;  %v3769_v45 = vld [vmem:[%s3628_s23 + $0x20] sm:$0x1] }
  0x32   : > { %v647_v57 = vrot.slane %v645_v49, 5  ;;  %v651_v58 = vshll.u32 %v3719_v44, 16  ;;  %v505_v61 = vrot.slane %v504_v52, 4  ;;  %v655_v63 = vshrl.u32 %v3719_v44, 16 }
  0x33   : > { %v515_v62 = vrot.slane %v514_v53, 4  ;;  %v661_v0 = vshll.u32 %v3726_v47, 16  ;;  %v3736_v2 = vpack.c.b16 %v740_v54, %v739_v51  ;;  %v570_v23 = vshrl.u32 %v3734_v1, 16  ;;  %v3778_v53 = vld [vmem:[%s3628_s23 + $0x54] sm:$0xf] }
  0x34   : > { %v648_v6 = vor.u32 %v647_v57, %v644_v56  ;;  %v653_v7 = vrot.slane %v651_v58, 5  ;;  %v510_v9 = vsel %vm3662_vm3, %v505_v61, %v509_v42  ;;  %v657_v14 = vrot.slane %v655_v63, 4 }
  0x35   : > { %v520_v11 = vsel %vm3662_vm3, %v515_v62, %v519_v46  ;;  %v663_v17 = vrot.slane %v661_v0, 5  ;;  %v749_v19 = vunpack.c.l.b16 %v510_v9  ;;  %v573_v26 = vshll.u32 %v3734_v1, 16 }
  0x36   : > { %v750_v21 = vunpack.c.l.b16 %v520_v11  ;;  %v649_v22 = vrot.slane %v648_v6, 4  ;;  %v658_v24 = vor.u32 %v657_v14, %v653_v7  ;;  %v579_v27 = vshll.u32 %v3739_v8, 16  ;;  %v3786_v11 = vld [vmem:[%s3628_s23 + $0x58] sm:$0xf] }
  0x37   : > { %v583_v29 = vshrl.u32 %v3739_v8, 16  ;;  %v572_v34 = vrot.slane %v570_v23, 4  ;;  %v589_v35 = vshll.u32 %v3746_v18, 16  ;;  %v575_v40 = vrot.slane %v573_v26, 5 }
  0x38   : > { %3100 = vmatmul.msk.bf16.gmra.mxu0 %vm791_vm2, %v3736_v2  ;;  %v3760_v32 = vpack.c.b16 %v750_v21, %v749_v19  ;;  %v654_v33 = vsel %vm3662_vm3, %v649_v22, %v653_v7  ;;  %v659_v38 = vrot.slane %v658_v24, 4  ;;  %v581_v41 = vrot.slane %v579_v27, 5  ;;  %v3792_v22 = vld [vmem:[%s3628_s23 + $0x5c] sm:$0x1] }
  0x39   : > { %v761_v39 = vunpack.c.l.b16 %v654_v33  ;;  %v585_v42 = vrot.slane %v583_v29, 4  ;;  %v591_v43 = vrot.slane %v589_v35, 5  ;;  %v402_v46 = vshrl.u32 %v3753_v30, 16  ;;  %v3796_v24 = vld [vmem:[%s3628_s23 + $0x9c] sm:$0xf] }
  0x3a   : > { %5242 = vst [vmem:[#allocation9_spill] sm:$0xff] %v3760_v32  ;;  %v405_v48 = vshll.u32 %v3753_v30, 16  ;;  %v664_v49 = vsel %vm3662_vm3, %v659_v38, %v663_v17  ;;  %v576_v50 = vor.u32 %v575_v40, %v572_v34  ;;  %v411_v51 = vshll.u32 %v3766_v37, 16 }
  0x3b   : > { %v415_v52 = vshrl.u32 %v3766_v37, 16  ;;  %3105 = vmatmul.msk.bf16.gmra.mxu1 %vm791_vm2, %v3760_v32  ;;  %v762_v54 = vunpack.c.l.b16 %v664_v49  ;;  %v586_v56 = vor.u32 %v585_v42, %v581_v41  ;;  %v404_v57 = vrot.slane %v402_v46, 4  ;;  %5244 = vst [vmem:[#allocation11_spill] sm:$0xff] %v3796_v24  ;;  %v3808_v42 = vld [vmem:[%s3628_s23 + $0xa0] sm:$0xf] }
  0x3c   : > { %v407_v58 = vrot.slane %v405_v48, 5  ;;  %v577_v61 = vrot.slane %v576_v50, 4  ;;  %v413_v62 = vrot.slane %v411_v51, 5  ;;  %v421_v0 = vshll.u32 %v3769_v45, 16  ;;  %5245 = vst [vmem:[#allocation12_spill] sm:$0xff] %v3808_v42 }
  0x3d   : > { %v417_v63 = vrot.slane %v415_v52, 4  ;;  %v3783_v6 = vpack.c.b16 %v762_v54, %v761_v39  ;;  %v587_v7 = vrot.slane %v586_v56, 4  ;;  %v522_v14 = vshrl.u32 %v3778_v53, 16  ;;  %v3816_v51 = vld [vmem:[%s3628_s23 + $0xa4] sm:$0x1] }
  0x3e   : > { %v408_v9 = vor.u32 %v407_v58, %v404_v57  ;;  %v582_v17 = vsel %vm3662_vm3, %v577_v61, %v581_v41  ;;  %v423_v21 = vrot.slane %v421_v0, 5  ;;  %v525_v23 = vshll.u32 %v3778_v53, 16  ;;  %5247 = vst [vmem:[#allocation14_spill] sm:$0xff] %v3816_v51 }
  0x3f   : > { %5243 = vst [vmem:[#allocation10_spill] sm:$0xff] %v3783_v6  ;;  %v418_v19 = vor.u32 %v417_v63, %v413_v62  ;;  %v592_v26 = vsel %vm3662_vm3, %v587_v7, %v591_v43  ;;  %v755_v27 = vunpack.c.l.b16 %v582_v17  ;;  %v524_v31 = vrot.slane %v522_v14, 4  ;;  %v3827_v17 = vld [vmem:[%s3628_s23 + $0x78] sm:$0xf] }
  0x40   : > { %3111 = vmatmul.msk.bf16.gmra.mxu3 %vm791_vm2, %v3783_v6  ;;  %v409_v29 = vrot.slane %v408_v9, 4  ;;  %v756_v33 = vunpack.c.l.b16 %v592_v26  ;;  %v527_v35 = vrot.slane %v525_v23, 5  ;;  %v531_v38 = vshll.u32 %v3786_v11, 16  ;;  %5248 = vst [vmem:[#allocation15_spill] sm:$0xff] %v3827_v17 }
  0x41   : > { %v419_v34 = vrot.slane %v418_v19, 4  ;;  %v535_v40 = vshrl.u32 %v3786_v11, 16  ;;  %v541_v41 = vshll.u32 %v3792_v22, 16  ;;  %v666_v43 = vshrl.u32 %v3796_v24, 16  ;;  %v3830_v19 = vld [vmem:[%s3628_s23 + $0x7c] sm:$0xf] }
  0x42   : > { %v414_v39 = vsel %vm3662_vm3, %v409_v29, %v413_v62  ;;  %v3811_v46 = vpack.c.b16 %v756_v33, %v755_v27  ;;  %v528_v50 = vor.u32 %v527_v35, %v524_v31  ;;  %v533_v54 = vrot.slane %v531_v38, 5  ;;  %v3835_v27 = vld [vmem:[%s3628_s23 + $0x80] sm:$0x1] }
  0x43   : > { %v424_v48 = vsel %vm3662_vm3, %v419_v34, %v423_v21  ;;  %v741_v49 = vunpack.c.l.b16 %v414_v39  ;;  %v537_v56 = vrot.slane %v535_v40, 4  ;;  %v543_v57 = vrot.slane %v541_v41, 5 }
  0x44   : > { %5246 = vst [vmem:[#allocation13_spill] sm:$0xff] %v3811_v46  ;;  %v742_v52 = vunpack.c.l.b16 %v424_v48  ;;  %3108 = vmatmul.msk.bf16.vlgmr.msra.gmra.mxu2 %vm791_vm2, %v3811_v46  ;;  %v529_v58 = vrot.slane %v528_v50, 4  ;;  %v668_v61 = vrot.slane %v666_v43, 4  ;;  %v669_v62 = vshll.u32 %v3796_v24, 16 }
  0x45   : > { %v675_v63 = vshll.u32 %v3808_v42, 16  ;;  %v538_v7 = vor.u32 %v537_v56, %v533_v54  ;;  %v679_v9 = vshrl.u32 %v3808_v42, 16  ;;  %v685_v14 = vshll.u32 %v3816_v51, 16  ;;  %v3903_v42 = vld [vmem:[%s3628_s23 + $0xb0] sm:$0x1] }
  0x46   : > { %v3822_v0 = vpack.c.b16 %v742_v52, %v741_v49  ;;  %v534_v21 = vsel %vm3662_vm3, %v529_v58, %v533_v54  ;;  %v671_v23 = vrot.slane %v669_v62, 5  ;;  %v594_v38 = vshrl.u32 %v3827_v17, 16  ;;  %v3847_v58 = vld [vmem:[%s3628_s23 + $0x24] sm:$0xf]  ;;  %5254 = vst [vmem:[#allocation21_spill] sm:$0xff] %v3903_v42 }
  0x47   : > { %v677_v26 = vrot.slane %v675_v63, 5  ;;  %v539_v29 = vrot.slane %v538_v7, 4  ;;  %v751_v31 = vunpack.c.l.b16 %v534_v21  ;;  %v681_v33 = vrot.slane %v679_v9, 4  ;;  %v3850_v7 = vld [vmem:[%s3628_s23 + $0x28] sm:$0xf] }
  0x48   : > { %3101 = vmatmul.msk.bf16.gmra.mxu0 %vm791_vm2, %v3822_v0  ;;  %v687_v34 = vrot.slane %v685_v14, 5  ;;  %v672_v35 = vor.u32 %v671_v23, %v668_v61  ;;  %v597_v39 = vshll.u32 %v3827_v17, 16  ;;  %v603_v40 = vshll.u32 %v3830_v19, 16  ;;  %v3857_v23 = vld [vmem:[%s3628_s23 + $0x2c] sm:$0x1] }
  0x49   : > { %v544_v41 = vsel %vm3662_vm3, %v539_v29, %v543_v57  ;;  %v682_v43 = vor.u32 %v681_v33, %v677_v26  ;;  %v607_v48 = vshrl.u32 %v3830_v19, 16  ;;  %v613_v49 = vshll.u32 %v3835_v27, 16 }
  0x4a   : > { %v752_v50 = vunpack.c.l.b16 %v544_v41  ;;  %v673_v52 = vrot.slane %v672_v35, 4  ;;  %v596_v54 = vrot.slane %v594_v38, 4  ;;  %v599_v56 = vrot.slane %v597_v39, 5 }
  0x4b   : > { %v683_v61 = vrot.slane %v682_v43, 4  ;;  %v605_v62 = vrot.slane %v603_v40, 5  ;;  %v609_v63 = vrot.slane %v607_v48, 4  ;;  %v615_v21 = vrot.slane %v613_v49, 5  ;;  %v3869_v49 = vld [vmem:[%s3628_s23 + $0x60] sm:$0xf] }
  0x4c   : > { %v3852_v9 = vpack.c.b16 %v752_v50, %v751_v31  ;;  %v678_v57 = vsel %vm3662_vm3, %v673_v52, %v677_v26  ;;  %v600_v14 = vor.u32 %v599_v56, %v596_v54  ;;  %v426_v38 = vshrl.u32 %v3847_v58, 16 }
  0x4d   : > { %v688_v29 = vsel %vm3662_vm3, %v683_v61, %v687_v34  ;;  %v763_v33 = vunpack.c.l.b16 %v678_v57  ;;  %v610_v35 = vor.u32 %v609_v63, %v605_v62  ;;  %v429_v26 = vshll.u32 %v3847_v58, 16  ;;  %v3876_v61 = vld [vmem:[%s3628_s23 + $0x64] sm:$0xf]  ;;  %v3879_v63 = vld [vmem:[%s3628_s23 + $0x68] sm:$0x1] }
  0x4e   : > { %5249 = vst [vmem:[#allocation16_spill] sm:$0xff] %v3852_v9  ;;  %3106 = vmatmul.msk.bf16.gmra.mxu1 %vm791_vm2, %v3852_v9  ;;  %v764_v31 = vunpack.c.l.b16 %v688_v29  ;;  %v601_v39 = vrot.slane %v600_v14, 4  ;;  %v435_v40 = vshll.u32 %v3850_v7, 16  ;;  %v428_v43 = vrot.slane %v426_v38, 4 }
  0x4f   : > { %v611_v41 = vrot.slane %v610_v35, 4  ;;  %v439_v48 = vshrl.u32 %v3850_v7, 16  ;;  %v445_v34 = vshll.u32 %v3857_v23, 16  ;;  %v431_v54 = vrot.slane %v429_v26, 5 }
  0x50   : > { %v3871_v50 = vpack.c.b16 %v764_v31, %v763_v33  ;;  %v606_v52 = vsel %vm3662_vm3, %v601_v39, %v605_v62  ;;  %v437_v56 = vrot.slane %v435_v40, 5  ;;  %v546_v62 = vshrl.u32 %v3869_v49, 16 }
  0x51   : > { %v616_v57 = vsel %vm3662_vm3, %v611_v41, %v615_v21  ;;  %v757_v14 = vunpack.c.l.b16 %v606_v52  ;;  %v441_v29 = vrot.slane %v439_v48, 4  ;;  %v447_v35 = vrot.slane %v445_v34, 5  ;;  %v3891_v41 = vld [vmem:[%s3628_s23 + $0xa8] sm:$0xf] }
  0x52   : > { %5250 = vst [vmem:[#allocation17_spill] sm:$0xff] %v3871_v50  ;;  %3112 = vmatmul.msk.bf16.gmra.mxu3 %vm791_vm2, %v3871_v50  ;;  %v758_v33 = vunpack.c.l.b16 %v616_v57  ;;  %v432_v38 = vor.u32 %v431_v54, %v428_v43  ;;  %v549_v31 = vshll.u32 %v3869_v49, 16  ;;  %v555_v26 = vshll.u32 %v3876_v61, 16  ;;  %v3896_v43 = vld [vmem:[%s3628_s23 + $0xac] sm:$0xf] }
  0x53   : > { %v442_v39 = vor.u32 %v441_v29, %v437_v56  ;;  %v559_v40 = vshrl.u32 %v3876_v61, 16  ;;  %v565_v21 = vshll.u32 %v3879_v63, 16  ;;  %5251 = vst [vmem:[#allocation18_spill] sm:$0xff] %v3891_v41  ;;  %v548_v52 = vrot.slane %v546_v62, 4 }
  0x54   : > { %v3893_v48 = vpack.c.b16 %v758_v33, %v757_v14  ;;  %v433_v34 = vrot.slane %v432_v38, 4  ;;  %v551_v57 = vrot.slane %v549_v31, 5  ;;  %5253 = vst [vmem:[#allocation20_spill] sm:$0xff] %v3896_v43  ;;  %v557_v50 = vrot.slane %v555_v26, 5  ;;  %v3396_v38 = vld [vmem:[%s5170_s1 + $0x30] sm:$0xff] }
  0x55   : > { %v443_v54 = vrot.slane %v442_v39, 4  ;;  %v561_v6 = vrot.slane %v559_v40, 4  ;;  %v567_v29 = vrot.slane %v565_v21, 5  ;;  %v690_v14 = vshrl.u32 %v3891_v41, 16  ;;  %1960 = vmatpush.bf16.msra.mxu2 %v3396_v38 }
  0x56   : > { %5252 = vst [vmem:[#allocation19_spill] sm:$0xff] %v3893_v48  ;;  %3109 = vmatmul.msk.bf16.gmra.mxu2 %vm791_vm2, %v3893_v48  ;;  %v438_v24 = vsel %vm3662_vm3, %v433_v34, %v437_v56  ;;  %v552_v51 = vor.u32 %v551_v57, %v548_v52  ;;  %v693_v33 = vshll.u32 %v3891_v41, 16  ;;  %v699_v26 = vshll.u32 %v3896_v43, 16 }
  0x57   : > { %v448_v62 = vsel %vm3662_vm3, %v443_v54, %v447_v35  ;;  %v743_v31 = vunpack.c.l.b16 %v438_v24  ;;  %v562_v39 = vor.u32 %v561_v6, %v557_v50  ;;  %v692_v21 = vrot.slane %v690_v14, 4  ;;  %v3921_v54 = vld [vmem:[%s3628_s23 + $0x30] sm:$0xf] }
  0x58   : > { %v744_v56 = vunpack.c.l.b16 %v448_v62  ;;  %v553_v40 = vrot.slane %v552_v51, 4  ;;  %v695_v34 = vrot.slane %v693_v33, 5  ;;  %v701_v57 = vrot.slane %v699_v26, 5  ;;  %v3926_v62 = vld [vmem:[%s3628_s23 + $0x34] sm:$0xf] }
  0x59   : > { %v563_v52 = vrot.slane %v562_v39, 4  ;;  %v703_v41 = vshrl.u32 %v3896_v43, 16  ;;  %v709_v36 = vshll.u32 %v3903_v42, 16  ;;  %v1176_v47 = vrot.slane %v3637_v5, 5 }
  0x5a   : > { %v3916_v35 = vpack.c.b16 %v744_v56, %v743_v31  ;;  %v558_v6 = vsel %vm3662_vm3, %v553_v40, %v557_v50  ;;  %v696_v24 = vor.u32 %v695_v34, %v692_v21  ;;  %v5255_v39 = vmov 0  ;;  %v3942_v40 = vld [vmem:[%s3628_s23 + $0x38] sm:$0x1] }
  0x5b   : > { %v568_v51 = vsel %vm3662_vm3, %v563_v52, %v567_v29  ;;  %v753_v14 = vunpack.c.l.b16 %v558_v6  ;;  %v705_v33 = vrot.slane %v703_v41, 4  ;;  %v711_v38 = vrot.slane %v709_v36, 5 }
  0x5c   : > { %3102 = vmatmul.msk.bf16.gmra.mxu0 %vm791_vm2, %v3916_v35  ;;  %v754_v5 = vunpack.c.l.b16 %v568_v51  ;;  %v697_v31 = vrot.slane %v696_v24, 4  ;;  %v5256_v39 = vsel %vm3930_vm6, 4294967295, %v5255_v39  ;;  %v3199_v29 = vrot.slane %v3631_v3, 9  ;;  %v3949_v24 = vld [vmem:[%s3628_s23 + $0xb4] sm:$0xf] }
  0x5d   : > { %v706_v50 = vor.u32 %v705_v33, %v701_v57  ;;  %5257 = vst [vmem:[#allocation22_spill] sm:$0xff] %v5256_v39  ;;  %v1173_v41 = vrot.slane %v3634_v4, 5  ;;  %v450_v36 = vshrl.u32 %v3921_v54, 16  ;;  %v453_v21 = vshll.u32 %v3921_v54, 16 }
  0x5e   : > { %v3937_v26 = vpack.c.b16 %v754_v5, %v753_v14  ;;  %v702_v56 = vsel %vm3662_vm3, %v697_v31, %v701_v57  ;;  %v459_v34 = vshll.u32 %v3926_v62, 16  ;;  %v3954_v5 = vld [vmem:[%s3628_s23 + $0xb8] sm:$0xf]  ;;  %v717_v44 = vshll.u32 %v3949_v24, 16 }
  0x5f   : > { %v707_v52 = vrot.slane %v706_v50, 4  ;;  %v765_v6 = vunpack.c.l.b16 %v702_v56  ;;  %v1174_v3 = vsel %vm3930_vm6, %v3199_v29, %v1173_v41  ;;  %v1175_v4 = vrot.slane %v1173_v41, 4 }
  0x60   : > { %5258 = vst [vmem:[#allocation23_spill] sm:$0xff] %v3937_v26  ;;  %3107 = vmatmul.msk.bf16.gmra.mxu1 %vm791_vm2, %v3937_v26  ;;  %v1283_v51 = vunpack.c.l.b16 %v1174_v3  ;;  %v452_v57 = vrot.slane %v450_v36, 4  ;;  %v455_v14 = vrot.slane %v453_v21, 5  ;;  %v461_v33 = vrot.slane %v459_v34, 5  ;;  %v3964_v34 = vld [vmem:[%s3628_s23 + $0xbc] sm:$0x1] }
  0x61   : > { %v712_v31 = vsel %vm3662_vm3, %v707_v52, %v711_v38  ;;  %v1177_v50 = vsel %vm3930_vm6, %v1175_v4, %v1176_v47  ;;  %v463_v29 = vshrl.u32 %v3926_v62, 16  ;;  %v469_v41 = vshll.u32 %v3942_v40, 16 }
  0x62   : > { %v766_v56 = vunpack.c.l.b16 %v712_v31  ;;  %v1284_v42 = vunpack.c.l.b16 %v1177_v50  ;;  %v456_v43 = vor.u32 %v455_v14, %v452_v57  ;;  %v714_v3 = vshrl.u32 %v3949_v24, 16 }
  0x63   : > { %v465_v36 = vrot.slane %v463_v29, 4  ;;  %v471_v21 = vrot.slane %v469_v41, 5  ;;  %v723_v38 = vshll.u32 %v3954_v5, 16  ;;  %v719_v17 = vrot.slane %v717_v44, 5  ;;  %v3395_v44 = vld [vmem:[%s5170_s1 + $0x28] sm:$0xff] }
  0x64   : > { %v3968_v52 = vpack.c.b16 %v766_v56, %v765_v6  ;;  %v1315_v47 = vpack.c.b16 %v1284_v42, %v1283_v51  ;;  %v457_v4 = vrot.slane %v456_v43, 4  ;;  %v716_v48 = vrot.slane %v714_v3, 4  ;;  %v3397_v42 = vld [vmem:[%s5170_s1 + $0x38] sm:$0xff]  ;;  %v3398_v43 = vld [vmem:[%s5170_s1 + $0x40] sm:$0xff]  ;;  %1825 = vmatpush.bf16.msra.mxu1 %v3395_v44 }
  0x65   : > { %v466_v46 = vor.u32 %v465_v36, %v461_v33  ;;  %v725_v31 = vrot.slane %v723_v38, 5  ;;  %v727_v57 = vshrl.u32 %v3954_v5, 16  ;;  %v733_v50 = vshll.u32 %v3964_v34, 16  ;;  %2117 = vmatpush.bf16.msra.mxu3 %v3397_v42  ;;  %2258 = vmatpush.bf16.msra.mxu0 %v3398_v43  ;;  %v3372_v42 = vld [vmem:[%s3628_s23] sm:$0xff] }
  0x66   : > { %5259 = vst [vmem:[#allocation24_spill] sm:$0xff] %v3968_v52  ;;  %3113 = vmatmul.msk.bf16.gmra.mxu3 %vm791_vm2, %v3968_v52  ;;  %3219 = vmatmul.msk.bf16.vlgmr.msrb.gmra.mxu2 %vm791_vm2, %v1315_v47  ;;  %v462_v14 = vsel %vm3662_vm3, %v457_v4, %v461_v33  ;;  %v3200_v6 = vrot.slane %v3675_v55, 9  ;;  %v720_v41 = vor.u32 %v719_v17, %v716_v48  ;;  %v1180_v3 = vrot.slane %v3680_v59, 5 }
  0x67   : > { %v467_v51 = vrot.slane %v466_v46, 4  ;;  %v745_v29 = vunpack.c.l.b16 %v462_v14  ;;  %v729_v33 = vrot.slane %v727_v57, 4  ;;  %v735_v56 = vrot.slane %v733_v50, 5 }
  0x68   : > { %v1183_v55 = vrot.slane %v3683_v60, 5  ;;  %v3201_v36 = vrot.slane %v3753_v30, 9  ;;  %v721_v47 = vrot.slane %v720_v41, 4  ;;  %v1187_v46 = vrot.slane %v3766_v37, 5 }
  0x69   : > { %v472_v38 = vsel %vm3662_vm3, %v467_v51, %v471_v21  ;;  %v730_v4 = vor.u32 %v729_v33, %v725_v31  ;;  %v1181_v48 = vsel %vm3930_vm6, %v3200_v6, %v1180_v3  ;;  %v1182_v59 = vrot.slane %v1180_v3, 4 }
  0x6a   : > { %v746_v17 = vunpack.c.l.b16 %v472_v38  ;;  %v1190_v60 = vrot.slane %v3769_v45, 5  ;;  %v726_v57 = vsel %vm3662_vm3, %v721_v47, %v725_v31  ;;  %v1285_v30 = vunpack.c.l.b16 %v1181_v48 }
  0x6b   : > { %v731_v14 = vrot.slane %v730_v4, 4  ;;  %v1188_v21 = vsel %vm3930_vm6, %v3201_v36, %v1187_v46  ;;  %v1184_v37 = vsel %vm3930_vm6, %v1182_v59, %v1183_v55  ;;  %v1189_v44 = vrot.slane %v1187_v46, 4 }
  0x6c   : > { %v4000_v50 = vpack.c.b16 %v746_v17, %v745_v29  ;;  %v1286_v45 = vunpack.c.l.b16 %v1184_v37  ;;  %v1287_v43 = vunpack.c.l.b16 %v1188_v21  ;;  %v767_v31 = vunpack.c.l.b16 %v726_v57  ;;  %v4037_v17 = vld [vmem:[%s3628_s23 + $0x18] sm:$0xff]  ;;  %v4057_v21 = vld [vmem:[%s3628_s23 + $0x24] sm:$0xff] }
  0x6d   : > { %v736_v6 = vsel %vm3662_vm3, %v731_v14, %v735_v56  ;;  %v1191_v29 = vsel %vm3930_vm6, %v1189_v44, %v1190_v60  ;;  %v3373_v56 = vld [vmem:[%s3628_s23 + $0xc] sm:$0xff]  ;;  %v1194_v36 = vrot.slane %v3850_v7, 5  ;;  %v3202_v38 = vrot.slane %v3847_v58, 9 }
  0x6e   : > { %3103 = vmatmul.msk.bf16.gmra.mxu0 %vm791_vm2, %v4000_v50  ;;  %v768_v51 = vunpack.c.l.b16 %v736_v6  ;;  %v4011_v41 = vpack.c.b16 %v1286_v45, %v1285_v30  ;;  %v1288_v33 = vunpack.c.l.b16 %v1191_v29  ;;  %v1197_v4 = vrot.slane %v3857_v23, 5 }
  0x6f   : > { %v1196_v47 = vrot.slane %v1194_v36, 4  ;;  %v1195_v46 = vsel %vm3930_vm6, %v3202_v38, %v1194_v36  ;;  %v1201_v23 = vrot.slane %v3926_v62, 5  ;;  %v3203_v59 = vrot.slane %v3921_v54, 9 }
  0x70   : > { %3183 = vmatmul.msk.bf16.vlgmr.msrb.gmra.mxu1 %vm791_vm2, %v3372_v42  ;;  %v4014_v3 = vpack.c.b16 %v1288_v33, %v1287_v43  ;;  %v4016_v55 = vpack.c.b16 %v768_v51, %v767_v31  ;;  %v1289_v7 = vunpack.c.l.b16 %v1195_v46  ;;  %v1204_v57 = vrot.slane %v3942_v40, 5  ;;  %v4081_v51 = vld [vmem:[%s3628_s23 + $0x30] sm:$0xff] }
  0x71   : > { %v1203_v60 = vrot.slane %v1201_v23, 4  ;;  %v1202_v14 = vsel %vm3930_vm6, %v3203_v59, %v1201_v23  ;;  %v1208_v40 = vrot.slane %v3648_v12, 5  ;;  %v3204_v44 = vrot.slane %v3644_v10, 9  ;;  %v4113_v59 = vld [vmem:[%s3628_s23 + $0x3c] sm:$0xff]  ;;  %2690 = vmatpush.msrb.mxu1 %v2671_v28 }
  0x72   : > { %v1291_v62 = vunpack.c.l.b16 %v1202_v14  ;;  %v1211_v45 = vrot.slane %v3651_v13, 5  ;;  %v1215_v38 = vrot.slane %v3701_v20, 5 }
  0x73   : > { %v1205_v30 = vsel %vm3930_vm6, %v1203_v60, %v1204_v57  ;;  %v1210_v6 = vrot.slane %v1208_v40, 4  ;;  %v1209_v31 = vsel %vm3930_vm6, %v3204_v44, %v1208_v40  ;;  %v3206_v44 = vrot.slane %v3778_v53, 9 }
  0x74   : > { %v1292_v42 = vunpack.c.l.b16 %v1205_v30  ;;  %v1293_v33 = vunpack.c.l.b16 %v1209_v31  ;;  %v1217_v46 = vrot.slane %v1215_v38, 4 }
  0x75   : > { %v1212_v12 = vsel %vm3930_vm6, %v1210_v6, %v1211_v45  ;;  %v1225_v45 = vrot.slane %v3792_v22, 5 }
  0x76   : > { %3114 = vmatmul.msk.bf16.gmra.mxu3 %vm791_vm2, %v4016_v55  ;;  %3220 = vmatmul.msk.bf16.gmra.mxu2 %vm791_vm2, %v4011_v41  ;;  %v4063_v54 = vpack.c.b16 %v1292_v42, %v1291_v62  ;;  %v1294_v10 = vunpack.c.l.b16 %v1212_v12  ;;  %v1222_v62 = vrot.slane %v3786_v11, 5 }
  0x78   : > { %v4093_v36 = vpack.c.b16 %v1294_v10, %v1293_v33  ;;  %v1224_v6 = vrot.slane %v1222_v62, 4  ;;  %v1223_v11 = vsel %vm3930_vm6, %v3206_v44, %v1222_v62  ;;  %v4147_v10 = vld [vmem:[%s3628_s23 + $0x48] sm:$0xff]  ;;  %v1232_v62 = vrot.slane %v3879_v63, 5 }
  0x7a   : > { %v1226_v33 = vsel %vm3930_vm6, %v1224_v6, %v1225_v45 }
  0x7b   : > { %v1298_v53 = vunpack.c.l.b16 %v1226_v33 }
  0x7e   : > { %3263 = vmatmul.msk.bf16.vlgmr.msrb.gmra.mxu0 %vm791_vm2, %v3736_v2  ;;  %v1198_v2 = vsel %vm3930_vm6, %v1196_v47, %v1197_v4  ;;  %v3205_v4 = vrot.slane %v3694_v15, 9 }
  0x7f   : > { %v1290_v48 = vunpack.c.l.b16 %v1198_v2  ;;  %v1218_v2 = vrot.slane %v3706_v25, 5 }
  0x80   : > { %3184 = vmatmul.msk.bf16.gmra.mxu1 %vm791_vm2, %v3373_v56  ;;  %v1216_v20 = vsel %vm3930_vm6, %v3205_v4, %v1215_v38  ;;  %v1297_v38 = vunpack.c.l.b16 %v1223_v11  ;;  %v4179_v11 = vld [vmem:[%s3628_s23 + $0x54] sm:$0xff] }
  0x81   : > { %v4043_v58 = vpack.c.b16 %v1290_v48, %v1289_v7  ;;  %v1219_v23 = vsel %vm3930_vm6, %v1217_v46, %v1218_v2  ;;  %v1295_v15 = vunpack.c.l.b16 %v1216_v20  ;;  %v1229_v20 = vrot.slane %v3876_v61, 5  ;;  %5264 = vst [vmem:[#allocation29_spill] sm:$0xff] %v4179_v11 }
  0x82   : > { %v1296_v57 = vunpack.c.l.b16 %v1219_v23  ;;  %v4157_v46 = vpack.c.b16 %v1298_v53, %v1297_v38 }
  0x84   : > { %v4125_v30 = vpack.c.b16 %v1296_v57, %v1295_v15  ;;  %5262 = vst [vmem:[#allocation27_spill] sm:$0xff] %v4157_v46  ;;  %v3207_v15 = vrot.slane %v3869_v49, 9  ;;  %v1231_v57 = vrot.slane %v1229_v20, 4 }
  0x86   : > { %3243 = vmatmul.msk.bf16.vlgmr.msrb.gmra.mxu3 %vm791_vm2, %v3373_v56  ;;  %3221 = vmatmul.msk.bf16.gmra.mxu2 %vm791_vm2, %v4014_v3  ;;  %5260 = vst [vmem:[#allocation25_spill] sm:$0xff] %v4125_v30  ;;  %v1230_v61 = vsel %vm3930_vm6, %v3207_v15, %v1229_v20  ;;  %v1233_v45 = vsel %vm3930_vm6, %v1231_v57, %v1232_v62  ;;  %v1236_v57 = vrot.slane %v3739_v8, 5 }
  0x87   : > { %v1299_v49 = vunpack.c.l.b16 %v1230_v61  ;;  %v1300_v38 = vunpack.c.l.b16 %v1233_v45  ;;  %v3208_v61 = vrot.slane %v3734_v1, 9 }
  0x88   : > { %v1238_v45 = vrot.slane %v1236_v57, 4 }
  0x89   : > { %v4193_v15 = vpack.c.b16 %v1300_v38, %v1299_v49  ;;  %v1237_v8 = vsel %vm3930_vm6, %v3208_v61, %v1236_v57 }
  0x8a   : > { %v1301_v1 = vunpack.c.l.b16 %v1237_v8 }
  0x8b   : > { %5266 = vst [vmem:[#allocation31_spill] sm:$0xff] %v4193_v15 }
  0x8e   : > { %3264 = vmatmul.msk.bf16.gmra.mxu0 %vm791_vm2, %v3822_v0 }
  0x90   : > { %3185 = vmatmul.msk.bf16.gmra.mxu1 %vm791_vm2, %v4037_v17 }
  0x96   : > { %3244 = vmatmul.msk.bf16.gmra.mxu3 %vm791_vm2, %v4037_v17  ;;  %3222 = vmatmul.msk.bf16.gmra.mxu2 %vm791_vm2, %v4043_v58 }
  0x9e   : > { %3265 = vmatmul.msk.bf16.gmra.mxu0 %vm791_vm2, %v3916_v35 }
  0xa0   : > { %3186 = vmatmul.msk.bf16.gmra.mxu1 %vm791_vm2, %v4057_v21 }
  0xa5   : > { %v4066_v37 = vpop.f32.mrf.mxu0 }
  0xa6   : > { %3245 = vmatmul.msk.bf16.gmra.mxu3 %vm791_vm2, %v4057_v21  ;;  %3223 = vmatmul.msk.bf16.gmra.mxu2 %vm791_vm2, %v4063_v54 }
  0xa8   : > { %v4074_v43 = vpop.f32.mrf.mxu1 }
  0xad   : > { %v4083_v29 = vpop.f32.mrf.mxu0 }
  0xae   : > { %3266 = vmatmul.msk.bf16.gmra.mxu0 %vm791_vm2, %v4000_v50 }
  0xb0   : > { %3187 = vmatmul.msk.bf16.gmra.mxu1 %vm791_vm2, %v4081_v51  ;;  %v4089_v13 = vpop.f32.mrf.mxu1 }
  0xb3   : > { %v4091_v56 = vpop.f32.mrf.mxu3 }
  0xb5   : > { %v4096_v47 = vpop.f32.mrf.mxu0 }
  0xb6   : > { %3246 = vmatmul.msk.bf16.gmra.mxu3 %vm791_vm2, %v4081_v51  ;;  %3224 = vmatmul.msk.bf16.gmra.mxu2 %vm791_vm2, %v4093_v36 }
  0xb8   : > { %v4104_v7 = vpop.f32.mrf.mxu1 }
  0xbb   : > { %v4106_v48 = vpop.f32.mrf.mxu3 }
  0xbd   : > { %v4115_v60 = vpop.f32.mrf.mxu0 }
  0xbe   : > { %3267 = vmatmul.msk.bf16.gmra.mxu0 %vm791_vm2, %v3696_v16 }
  0xc0   : > { %3188 = vmatmul.msk.bf16.gmra.mxu1 %vm791_vm2, %v4113_v59  ;;  %v4121_v25 = vpop.f32.mrf.mxu1 }
  0xc3   : > { %v4123_v14 = vpop.f32.mrf.mxu3 }
  0xc5   : > { %v4128_v42 = vpop.f32.mrf.mxu0 }
  0xc6   : > { %3247 = vmatmul.msk.bf16.gmra.mxu3 %vm791_vm2, %v4113_v59  ;;  %3225 = vmatmul.msk.bf16.gmra.mxu2 %vm791_vm2, %v4125_v30 }
  0xc7   : > { %v4134_v40 = vpop.f32.mrf.mxu2 }
  0xcb   : > { %v4138_v31 = vpop.f32.mrf.mxu3  ;;  %v4140_v12 = vpop.f32.mrf.mxu1 }
  0xcc   : > { %5261 = vst [vmem:[#allocation26_spill] sm:$0xff] %v4138_v31 }
  0xcd   : > { %v4151_v4 = vpop.f32.mrf.mxu0 }
  0xce   : > { %3268 = vmatmul.msk.bf16.gmra.mxu0 %vm791_vm2, %v3760_v32  ;;  %v4213_v32 = vld [vmem:[%s3628_s23 + $0x60] sm:$0xff] }
  0xcf   : > { %v4153_v22 = vpop.f32.mrf.mxu2  ;;  %5268 = vst [vmem:[#allocation33_spill] sm:$0xff] %v4213_v32 }
  0xd0   : > { %3189 = vmatmul.msk.bf16.gmra.mxu1 %vm791_vm2, %v4147_v10 }
  0xd3   : > { %v4159_v2 = vpop.f32.mrf.mxu1 }
  0xd5   : > { %v4162_v23 = vpop.f32.mrf.mxu3 }
  0xd6   : > { %5263 = vst [vmem:[#allocation28_spill] sm:$0xff] %v4162_v23  ;;  %3248 = vmatmul.msk.bf16.gmra.mxu3 %vm791_vm2, %v4147_v10  ;;  %3226 = vmatmul.msk.bf16.gmra.mxu2 %vm791_vm2, %v4157_v46 }
  0xd9   : > { %v4170_v44 = vpop.f32.mrf.mxu0  ;;  %v4172_v6 = vpop.f32.mrf.mxu2 }
  0xdd   : > { %v4181_v33 = vpop.f32.mrf.mxu1  ;;  %v4185_v63 = vpop.f32.mrf.mxu3 }
  0xde   : > { %3269 = vmatmul.msk.bf16.gmra.mxu0 %vm791_vm2, %v3852_v9  ;;  %5265 = vst [vmem:[#allocation30_spill] sm:$0xff] %v4185_v63  ;;  %v1239_v9 = vrot.slane %v3746_v18, 5 }
  0xe0   : > { %3190 = vmatmul.msk.bf16.gmra.mxu1 %vm791_vm2, %v4179_v11  ;;  %v1240_v38 = vsel %vm3930_vm6, %v1238_v45, %v1239_v9  ;;  %v1243_v45 = vrot.slane %v3830_v19, 5 }
  0xe1   : > { %v4189_v53 = vpop.f32.mrf.mxu0  ;;  %v4191_v20 = vpop.f32.mrf.mxu2  ;;  %v1302_v18 = vunpack.c.l.b16 %v1240_v38 }
  0xe2   : > { %v1245_v38 = vrot.slane %v1243_v45, 4 }
  0xe3   : > { %v4222_v61 = vpack.c.b16 %v1302_v18, %v1301_v1 }
  0xe5   : > { %v4196_v62 = vpop.f32.mrf.mxu1  ;;  %5270 = vst [vmem:[#allocation35_spill] sm:$0xff] %v4222_v61 }
  0xe6   : > { %3249 = vmatmul.msk.bf16.gmra.mxu3 %vm791_vm2, %v4179_v11  ;;  %3227 = vmatmul.msk.bf16.gmra.mxu2 %vm791_vm2, %v4193_v15 }
  0xe9   : > { %v4204_v46 = vpop.f32.mrf.mxu3  ;;  %v1394_v63 = vpop.f32.mrf.mxu2 }
  0xea   : > { %5267 = vst [vmem:[#allocation32_spill] sm:$0xff] %v4204_v46 }
  0xeb   : > { %v4206_v49 = vpop.f32.mrf.mxu0 }
  0xed   : > { %v1072_v30 = vpop.f32.mrf.mxu1 }
  0xee   : > { %v1073_v15 = vadd.f32 %v1072_v30, %v4066_v37  ;;  %3270 = vmatmul.msk.bf16.gmra.mxu0 %vm791_vm2, %v3937_v26 }
  0xf0   : > { %v1474_v46 = vadd.f32 %v1394_v63, %v1073_v15  ;;  %3191 = vmatmul.msk.bf16.gmra.mxu1 %vm791_vm2, %v4213_v32  ;;  %v1246_v63 = vrot.slane %v3835_v27, 5  ;;  %v5271_v15 = vld [vmem:[#allocation15_spill] sm:$0xff] }
  0xf1   : > { %v4220_v23 = vpop.f32.mrf.mxu3  ;;  %v1396_v57 = vpop.f32.mrf.mxu2  ;;  %v3209_v8 = vrot.slane %v5271_v15, 9 }
  0xf2   : > { %5269 = vst [vmem:[#allocation34_spill] sm:$0xff] %v4220_v23 }
  0xf3   : > { %v4224_v9 = vpop.f32.mrf.mxu0  ;;  %v1244_v23 = vsel %vm3930_vm6, %v3209_v8, %v1243_v45 }
  0xf5   : > { %v1074_v37 = vpop.f32.mrf.mxu1 }
  0xf6   : > { %3250 = vmatmul.msk.bf16.gmra.mxu3 %vm791_vm2, %v4213_v32  ;;  %v1075_v30 = vadd.f32 %v1074_v37, %v4083_v29  ;;  %3228 = vmatmul.msk.bf16.gmra.mxu2 %vm791_vm2, %v4222_v61  ;;  %v1247_v29 = vsel %vm3930_vm6, %v1245_v38, %v1246_v63  ;;  %v4241_v37 = vld [vmem:[%s3628_s23 + $0x6c] sm:$0xff]  ;;  %v5274_v32 = vld [vmem:[#allocation13_spill] sm:$0xff] }
  0xf7   : > { %5273 = vst [vmem:[#allocation36_spill] sm:$0xff] %v4241_v37 }
  0xf8   : > { %v1475_v1 = vadd.f32 %v1396_v57, %v1075_v30  ;;  %v1303_v57 = vunpack.c.l.b16 %v1244_v23  ;;  %v1304_v30 = vunpack.c.l.b16 %v1247_v29  ;;  %v3456_v29 = vld [vmem:[%s3628_s23 + $0x84] sm:$0xf] }
  0xf9   : > { %v4234_v18 = vpop.f32.mrf.mxu3  ;;  %v1399_v26 = vpop.f32.mrf.mxu2 }
  0xfa   : > { %5272 = vst [vmem:[#allocation15_spill] sm:$0xff] %v4234_v18  ;;  %v4250_v63 = vpack.c.b16 %v1304_v30, %v1303_v57  ;;  %v3454_v18 = vld [vmem:[%s3628_s23 + $0x88] sm:$0xf] }
  0xfb   : > { %v1686_v19 = vpop.f32.mrf.mxu0  ;;  %v1250_v11 = vrot.slane %v3454_v18, 5 }
  0xfc   : > { %5276 = vst [vmem:[#allocation38_spill] sm:$0xff] %v4250_v63 }
  0xfd   : > { %v1077_v61 = vpop.f32.mrf.mxu1 }
  0xfe   : > { %v1078_v27 = vadd.f32 %v1077_v61, %v4096_v47  ;;  %3271 = vmatmul.msk.bf16.gmra.mxu0 %vm791_vm2, %v5274_v32  ;;  %v1252_v32 = vrot.slane %v1250_v11, 4 }
 0x100   : > { %v1476_v15 = vadd.f32 %v1399_v26, %v1078_v27  ;;  %3192 = vmatmul.msk.bf16.gmra.mxu1 %vm791_vm2, %v4241_v37  ;;  %v3455_v26 = vld [vmem:[%s3628_s23 + $0x8c] sm:$0x1]  ;;  %v3210_v27 = vrot.slane %v3456_v29, 9  ;;  %v5278_v29 = vld [vmem:[#allocation19_spill] sm:$0xff] }
 0x101   : > { %v4248_v45 = vpop.f32.mrf.mxu3  ;;  %v1401_v8 = vpop.f32.mrf.mxu2  ;;  %v1253_v61 = vrot.slane %v3455_v26, 5 }
 0x102   : > { %5275 = vst [vmem:[#allocation37_spill] sm:$0xff] %v4248_v45  ;;  %v1251_v16 = vsel %vm3930_vm6, %v3210_v27, %v1250_v11 }
 0x103   : > { %v1688_v38 = vpop.f32.mrf.mxu0 }
 0x105   : > { %v1079_v47 = vpop.f32.mrf.mxu1 }
 0x106   : > { %3251 = vmatmul.msk.bf16.gmra.mxu3 %vm791_vm2, %v4241_v37  ;;  %v1080_v23 = vadd.f32 %v1079_v47, %v4115_v60  ;;  %3229 = vmatmul.msk.bf16.gmra.mxu2 %vm791_vm2, %v4250_v63  ;;  %v1254_v37 = vsel %vm3930_vm6, %v1252_v32, %v1253_v61  ;;  %v4265_v60 = vld [vmem:[%s3628_s23 + $0x78] sm:$0xff] }
 0x108   : > { %v1477_v57 = vadd.f32 %v1401_v8, %v1080_v23  ;;  %v1305_v8 = vunpack.c.l.b16 %v1251_v16 }
 0x109   : > { %v1529_v30 = vpop.f32.mrf.mxu3  ;;  %v1404_v45 = vpop.f32.mrf.mxu2 }
 0x10a   : > { %v1609_v31 = vadd.f32 %v1529_v30, %v1474_v46  ;;  %v1306_v46 = vunpack.c.l.b16 %v1254_v37  ;;  %v5282_v37 = vld [vmem:[#allocation8_spill] sm:$0xff] }
 0x10b   : > { %v1691_v18 = vpop.f32.mrf.mxu0 }
 0x10c   : > { %v4267_v47 = vadd.f32 %v1686_v19, %v1609_v31  ;;  %v4274_v61 = vpack.c.b16 %v1306_v46, %v1305_v8  ;;  %v5280_v19 = vld [vmem:[#allocation7_spill] sm:$0xff] }
 0x10d   : > { %v1082_v63 = vpop.f32.mrf.mxu1  ;;  %v1257_v30 = vrot.slane %v5280_v19, 5 }
 0x10e   : > { %5277 = vst [vmem:[#allocation39_spill] sm:$0xff] %v4267_v47  ;;  %v1083_v26 = vadd.f32 %v1082_v63, %v4128_v42  ;;  %3272 = vmatmul.msk.bf16.gmra.mxu0 %vm791_vm2, %v5278_v29 }
 0x10f   : > { %5279 = vst [vmem:[#allocation19_spill] sm:$0xff] %v4274_v61 }
 0x110   : > { %v1478_v23 = vadd.f32 %v1404_v45, %v1083_v26  ;;  %3193 = vmatmul.msk.bf16.gmra.mxu1 %vm791_vm2, %v4265_v60  ;;  %v1260_v45 = vrot.slane %v5282_v37, 5  ;;  %v1259_v26 = vrot.slane %v1257_v30, 4 }
 0x111   : > { %v1531_v11 = vpop.f32.mrf.mxu3  ;;  %v1406_v27 = vpop.f32.mrf.mxu2 }
 0x112   : > { %v1610_v32 = vadd.f32 %v1531_v11, %v1475_v1  ;;  %v3457_v1 = vld [vmem:[%s3628_s23 + $0x90] sm:$0xf] }
 0x113   : > { %v1693_v31 = vpop.f32.mrf.mxu0  ;;  %v3211_v63 = vrot.slane %v3457_v1, 9  ;;  %v5284_v1 = vld [vmem:[#allocation6_spill] sm:$0xff] }
 0x114   : > { %v4277_v47 = vadd.f32 %v1688_v38, %v1610_v32 }
 0x115   : > { %v1084_v42 = vpop.f32.mrf.mxu1  ;;  %v1258_v19 = vsel %vm3930_vm6, %v3211_v63, %v1257_v30 }
 0x116   : > { %5281 = vst [vmem:[#allocation7_spill] sm:$0xff] %v4277_v47  ;;  %3252 = vmatmul.msk.bf16.gmra.mxu3 %vm791_vm2, %v4265_v60  ;;  %v1085_v16 = vadd.f32 %v1084_v42, %v4151_v4  ;;  %3230 = vmatmul.msk.bf16.gmra.mxu2 %vm791_vm2, %v4274_v61  ;;  %v1261_v47 = vsel %vm3930_vm6, %v1259_v26, %v1260_v45  ;;  %v4291_v4 = vld [vmem:[%s3628_s23 + $0x84] sm:$0xff] }
 0x118   : > { %v1479_v8 = vadd.f32 %v1406_v27, %v1085_v16  ;;  %v1307_v27 = vunpack.c.l.b16 %v1258_v19  ;;  %v1308_v16 = vunpack.c.l.b16 %v1261_v47 }
 0x119   : > { %v1534_v46 = vpop.f32.mrf.mxu3  ;;  %v1409_v11 = vpop.f32.mrf.mxu2 }
 0x11a   : > { %v1611_v38 = vadd.f32 %v1534_v46, %v1476_v15  ;;  %v4300_v45 = vpack.c.b16 %v1308_v16, %v1307_v27 }
 0x11b   : > { %v1696_v32 = vpop.f32.mrf.mxu0 }
 0x11c   : > { %v4293_v42 = vadd.f32 %v1691_v18, %v1611_v38  ;;  %5285 = vst [vmem:[#allocation6_spill] sm:$0xff] %v4300_v45  ;;  %v5286_v18 = vld [vmem:[#allocation12_spill] sm:$0xff] }
 0x11d   : > { %v1087_v61 = vpop.f32.mrf.mxu1  ;;  %v1264_v38 = vrot.slane %v5286_v18, 5 }
 0x11e   : > { %5283 = vst [vmem:[#allocation8_spill] sm:$0xff] %v4293_v42  ;;  %v1088_v37 = vadd.f32 %v1087_v61, %v4170_v44  ;;  %3273 = vmatmul.msk.bf16.gmra.mxu0 %vm791_vm2, %v5284_v1  ;;  %v5288_v61 = vld [vmem:[#allocation14_spill] sm:$0xff] }
 0x120   : > { %v1480_v15 = vadd.f32 %v1409_v11, %v1088_v37  ;;  %3194 = vmatmul.msk.bf16.gmra.mxu1 %vm791_vm2, %v4291_v4  ;;  %v1267_v11 = vrot.slane %v5288_v61, 5  ;;  %v1266_v37 = vrot.slane %v1264_v38, 4 }
 0x121   : > { %v1536_v30 = vpop.f32.mrf.mxu3  ;;  %v1411_v63 = vpop.f32.mrf.mxu2 }
 0x122   : > { %v1612_v46 = vadd.f32 %v1536_v30, %v1477_v57  ;;  %v5289_v57 = vld [vmem:[#allocation11_spill] sm:$0xff] }
 0x123   : > { %v1698_v26 = vpop.f32.mrf.mxu0  ;;  %v3212_v19 = vrot.slane %v5289_v57, 9  ;;  %v5291_v57 = vld [vmem:[#allocation10_spill] sm:$0xff] }
 0x124   : > { %v4303_v42 = vadd.f32 %v1693_v31, %v1612_v46 }
 0x125   : > { %v1089_v44 = vpop.f32.mrf.mxu1  ;;  %v1265_v46 = vsel %vm3930_vm6, %v3212_v19, %v1264_v38 }
 0x126   : > { %5287 = vst [vmem:[#allocation12_spill] sm:$0xff] %v4303_v42  ;;  %3253 = vmatmul.msk.bf16.gmra.mxu3 %vm791_vm2, %v4291_v4  ;;  %v1090_v47 = vadd.f32 %v1089_v44, %v4189_v53  ;;  %3231 = vmatmul.msk.bf16.gmra.mxu2 %vm791_vm2, %v4300_v45  ;;  %v1268_v42 = vsel %vm3930_vm6, %v1266_v37, %v1267_v11  ;;  %v4317_v53 = vld [vmem:[%s3628_s23 + $0x90] sm:$0xff] }
 0x128   : > { %v1481_v27 = vadd.f32 %v1411_v63, %v1090_v47  ;;  %v1309_v63 = vunpack.c.l.b16 %v1265_v46  ;;  %v1310_v47 = vunpack.c.l.b16 %v1268_v42 }
 0x129   : > { %v1539_v16 = vpop.f32.mrf.mxu3  ;;  %v1414_v30 = vpop.f32.mrf.mxu2 }
 0x12a   : > { %v1613_v18 = vadd.f32 %v1539_v16, %v1478_v23  ;;  %v4326_v11 = vpack.c.b16 %v1310_v47, %v1309_v63 }
 0x12b   : > { %v1701_v31 = vpop.f32.mrf.mxu0 }
 0x12c   : > { %v4319_v44 = vadd.f32 %v1696_v32, %v1613_v18  ;;  %5292 = vst [vmem:[#allocation11_spill] sm:$0xff] %v4326_v11  ;;  %v5293_v32 = vld [vmem:[#allocation20_spill] sm:$0xff] }
 0x12d   : > { %v1092_v45 = vpop.f32.mrf.mxu1  ;;  %v1271_v18 = vrot.slane %v5293_v32, 5 }
 0x12e   : > { %5290 = vst [vmem:[#allocation14_spill] sm:$0xff] %v4319_v44  ;;  %v1093_v61 = vadd.f32 %v1092_v45, %v4206_v49  ;;  %3274 = vmatmul.msk.bf16.gmra.mxu0 %vm791_vm2, %v5291_v57  ;;  %v5295_v45 = vld [vmem:[#allocation21_spill] sm:$0xff] }
 0x130   : > { %v1482_v23 = vadd.f32 %v1414_v30, %v1093_v61  ;;  %3195 = vmatmul.msk.bf16.gmra.mxu1 %vm791_vm2, %v4317_v53  ;;  %v1274_v30 = vrot.slane %v5295_v45, 5  ;;  %v1273_v61 = vrot.slane %v1271_v18, 4 }
 0x131   : > { %v1541_v38 = vpop.f32.mrf.mxu3  ;;  %v1416_v19 = vpop.f32.mrf.mxu2 }
 0x132   : > { %v1614_v16 = vadd.f32 %v1541_v38, %v1479_v8  ;;  %v5296_v8 = vld [vmem:[#allocation18_spill] sm:$0xff] }
 0x133   : > { %v1703_v37 = vpop.f32.mrf.mxu0  ;;  %v3213_v46 = vrot.slane %v5296_v8, 9  ;;  %v5297_v8 = vld [vmem:[#allocation17_spill] sm:$0xff] }
 0x134   : > { %v4329_v44 = vadd.f32 %v1698_v26, %v1614_v16 }
 0x135   : > { %v1094_v49 = vpop.f32.mrf.mxu1  ;;  %v1272_v16 = vsel %vm3930_vm6, %v3213_v46, %v1271_v18 }
 0x136   : > { %5294 = vst [vmem:[#allocation10_spill] sm:$0xff] %v4329_v44  ;;  %3254 = vmatmul.msk.bf16.gmra.mxu3 %vm791_vm2, %v4317_v53  ;;  %v1095_v42 = vadd.f32 %v1094_v49, %v4224_v9  ;;  %3232 = vmatmul.msk.bf16.gmra.mxu2 %vm791_vm2, %v4326_v11  ;;  %v1275_v44 = vsel %vm3930_vm6, %v1273_v61, %v1274_v30  ;;  %v4343_v9 = vld [vmem:[%s3628_s23 + $0x9c] sm:$0xff] }
 0x138   : > { %v1483_v63 = vadd.f32 %v1416_v19, %v1095_v42  ;;  %v1311_v19 = vunpack.c.l.b16 %v1272_v16  ;;  %v1312_v42 = vunpack.c.l.b16 %v1275_v44 }
 0x139   : > { %v1544_v47 = vpop.f32.mrf.mxu3  ;;  %v1419_v38 = vpop.f32.mrf.mxu2 }
 0x13a   : > { %v1615_v32 = vadd.f32 %v1544_v47, %v1480_v15  ;;  %v4352_v30 = vpack.c.b16 %v1312_v42, %v1311_v19 }
 0x13b   : > { %v1706_v26 = vpop.f32.mrf.mxu0 }
 0x13c   : > { %v4345_v49 = vadd.f32 %v1701_v31, %v1615_v32  ;;  %5298 = vst [vmem:[#allocation20_spill] sm:$0xff] %v4352_v30  ;;  %v1278_v31 = vrot.slane %v3954_v5, 5 }
 0x13d   : > { %v1097_v11 = vpop.f32.mrf.mxu1 }
 0x13e   : > { %v1098_v45 = vadd.f32 %v1097_v11, %v4074_v43  ;;  %3275 = vmatmul.msk.bf16.gmra.mxu0 %vm791_vm2, %v5297_v8  ;;  %v1281_v11 = vrot.slane %v3964_v34, 5 }
 0x140   : > { %v1484_v15 = vadd.f32 %v1419_v38, %v1098_v45  ;;  %3196 = vmatmul.msk.bf16.gmra.mxu1 %vm791_vm2, %v4343_v9  ;;  %v1280_v38 = vrot.slane %v1278_v31, 4 }
 0x141   : > { %v1546_v18 = vpop.f32.mrf.mxu3  ;;  %v1421_v46 = vpop.f32.mrf.mxu2 }
 0x142   : > { %v1616_v47 = vadd.f32 %v1546_v18, %v1481_v27  ;;  %v3214_v27 = vrot.slane %v3949_v24, 9 }
 0x143   : > { %v1708_v61 = vpop.f32.mrf.mxu0 }
 0x144   : > { %v4355_v32 = vadd.f32 %v1703_v37, %v1616_v47  ;;  %v1279_v42 = vsel %vm3930_vm6, %v3214_v27, %v1278_v31  ;;  %v4371_v47 = vld [vmem:[%s3628_s23 + $0xa8] sm:$0xff]  ;;  %v4379_v31 = vld [vmem:[%s3628_s23 + $0xc0] sm:$0xf] }
 0x145   : > { %v1099_v43 = vpop.f32.mrf.mxu1  ;;  %5301 = vst [vmem:[#allocation17_spill] sm:$0xff] %v4379_v31 }
 0x146   : > { %5299 = vst [vmem:[#allocation21_spill] sm:$0xff] %v4355_v32  ;;  %3255 = vmatmul.msk.bf16.gmra.mxu3 %vm791_vm2, %v4343_v9  ;;  %v1100_v44 = vadd.f32 %v1099_v43, %v4089_v13  ;;  %3233 = vmatmul.msk.bf16.gmra.mxu2 %vm791_vm2, %v4352_v30  ;;  %v1282_v13 = vsel %vm3930_vm6, %v1280_v38, %v1281_v11  ;;  %v4402_v32 = vld [vmem:[%s3628_s23 + $0xb4] sm:$0xff] }
 0x147   : > { %v1314_v43 = vunpack.c.l.b16 %v1282_v13 }
 0x148   : > { %v1485_v16 = vadd.f32 %v1421_v46, %v1100_v44  ;;  %v1313_v46 = vunpack.c.l.b16 %v1279_v42  ;;  %v4382_v44 = vld [vmem:[%s3628_s23 + $0xc4] sm:$0xf] }
 0x149   : > { %v1549_v5 = vpop.f32.mrf.mxu3  ;;  %v1424_v37 = vpop.f32.mrf.mxu2  ;;  %5302 = vst [vmem:[#allocation40_spill] sm:$0xff] %v4382_v44  ;;  %v1655_v42 = vshrl.u32 %v4382_v44, 16 }
 0x14a   : > { %v1617_v45 = vadd.f32 %v1549_v5, %v1482_v23  ;;  %v4384_v38 = vpack.c.b16 %v1314_v43, %v1313_v46  ;;  %v1642_v5 = vshrl.u32 %v4379_v31, 16 }
 0x14b   : > { %v1711_v19 = vpop.f32.mrf.mxu0 }
 0x14c   : > { %v4368_v18 = vadd.f32 %v1706_v26, %v1617_v45  ;;  %v1645_v45 = vshll.u32 %v4379_v31, 16  ;;  %v4398_v31 = vld [vmem:[%s3628_s23 + $0xc8] sm:$0x1] }
 0x14d   : > { %v1102_v34 = vpop.f32.mrf.mxu1  ;;  %v1661_v30 = vshll.u32 %v4398_v31, 16 }
 0x14e   : > { %5300 = vst [vmem:[#allocation18_spill] sm:$0xff] %v4368_v18  ;;  %v1103_v24 = vadd.f32 %v1102_v34, %v4104_v7  ;;  %3276 = vmatmul.msk.bf16.gmra.mxu0 %vm791_vm2, %v3968_v52  ;;  %v1647_v46 = vrot.slane %v1645_v45, 5 }
 0x150   : > { %v1486_v23 = vadd.f32 %v1424_v37, %v1103_v24  ;;  %3197 = vmatmul.msk.bf16.gmra.mxu1 %vm791_vm2, %v4371_v47  ;;  %v1651_v37 = vshll.u32 %v4382_v44, 16  ;;  %v1644_v24 = vrot.slane %v1642_v5, 4 }
 0x151   : > { %v1551_v26 = vpop.f32.mrf.mxu3  ;;  %v1426_v11 = vpop.f32.mrf.mxu2 }
 0x152   : > { %v1618_v27 = vadd.f32 %v1551_v26, %v1483_v63  ;;  %v1653_v43 = vrot.slane %v1651_v37, 5  ;;  %v1657_v26 = vrot.slane %v1655_v42, 4  ;;  %v1648_v52 = vor.u32 %v1647_v46, %v1644_v24 }
 0x153   : > { %v1713_v7 = vpop.f32.mrf.mxu0  ;;  %v1663_v37 = vrot.slane %v1661_v30, 5 }
 0x154   : > { %v4390_v13 = vadd.f32 %v1708_v61, %v1618_v27  ;;  %v1658_v18 = vor.u32 %v1657_v26, %v1653_v43 }
 0x155   : > { %v1104_v34 = vpop.f32.mrf.mxu1 }
 0x156   : > { %5303 = vst [vmem:[#allocation41_spill] sm:$0xff] %v4390_v13  ;;  %3256 = vmatmul.msk.bf16.gmra.mxu3 %vm791_vm2, %v4371_v47  ;;  %v1105_v63 = vadd.f32 %v1104_v34, %v4121_v25  ;;  %3234 = vmatmul.msk.bf16.gmra.mxu2 %vm791_vm2, %v4384_v38  ;;  %v1659_v45 = vrot.slane %v1658_v18, 4 }
 0x158   : > { %v1487_v39 = vadd.f32 %v1426_v11, %v1105_v63  ;;  %v1649_v11 = vrot.slane %v1648_v52, 4 }
 0x159   : > { %v1554_v44 = vpop.f32.mrf.mxu3  ;;  %v1429_v61 = vpop.f32.mrf.mxu2 }
 0x15a   : > { %v1619_v27 = vadd.f32 %v1554_v44, %v1484_v15 }
 0x15b   : > { %v1716_v13 = vpop.f32.mrf.mxu0 }
 0x15c   : > { %v4404_v25 = vadd.f32 %v1711_v19, %v1619_v27  ;;  %v1654_v19 = vsel %vm3662_vm3, %v1649_v11, %v1653_v43 }
 0x15d   : > { %v1107_v34 = vpop.f32.mrf.mxu1  ;;  %v1665_v30 = vunpack.c.l.b16 %v1654_v19 }
 0x15e   : > { %v1108_v5 = vadd.f32 %v1107_v34, %v4140_v12  ;;  %3277 = vmatmul.msk.bf16.gmra.mxu0 %vm791_vm2, %v4016_v55  ;;  %v1664_v12 = vsel %vm3662_vm3, %v1659_v45, %v1663_v37 }
 0x160   : > { %v1488_v42 = vadd.f32 %v1429_v61, %v1108_v5  ;;  %3198 = vmatmul.msk.bf16.gmra.mxu1 %vm791_vm2, %v4402_v32 }
 0x161   : > { %v1556_v15 = vpop.f32.mrf.mxu3  ;;  %v1431_v44 = vpop.f32.mrf.mxu2 }
 0x162   : > { %v1620_v63 = vadd.f32 %v1556_v15, %v1485_v16  ;;  %v1666_v16 = vunpack.c.l.b16 %v1664_v12 }
 0x163   : > { %v1718_v24 = vpop.f32.mrf.mxu0 }
 0x164   : > { %v4415_v46 = vadd.f32 %v1713_v7, %v1620_v63  ;;  %v4422_v34 = vpack.c.b16 %v1666_v16, %v1665_v30 }
 0x165   : > { %v1109_v26 = vpop.f32.mrf.mxu1 }
 0x166   : > { %3257 = vmatmul.msk.bf16.gmra.mxu3 %vm791_vm2, %v4402_v32  ;;  %v1110_v52 = vadd.f32 %v1109_v26, %v4159_v2  ;;  %3308 = vmatmul.msk.bf16.vlgmr.msra.gmra.mxu2 %vm791_vm2, %v4037_v17 }
 0x168   : > { %v1489_v18 = vadd.f32 %v1431_v44, %v1110_v52  ;;  %v4432_v44 = vld [vmem:[%s3628_s23 + $0xc0] sm:$0xff] }
 0x169   : > { %v1559_v61 = vpop.f32.mrf.mxu3  ;;  %v1434_v43 = vpop.f32.mrf.mxu2 }
 0x16a   : > { %v1621_v27 = vadd.f32 %v1559_v61, %v1486_v23 }
 0x16b   : > { %v1721_v7 = vpop.f32.mrf.mxu0 }
 0x16c   : > { %v4424_v5 = vadd.f32 %v1716_v13, %v1621_v27 }
 0x16d   : > { %v1112_v11 = vpop.f32.mrf.mxu1 }
 0x16e   : > { %v1113_v45 = vadd.f32 %v1112_v11, %v4181_v33  ;;  %3278 = vmatmul.msk.bf16.gmra.mxu0 %vm791_vm2, %v4422_v34 }
 0x170   : > { %v1490_v2 = vadd.f32 %v1434_v43, %v1113_v45  ;;  %3284 = vmatmul.msk.bf16.vlgmr.msra.gmra.mxu1 %vm791_vm2, %v4011_v41 }
 0x171   : > { %v1561_v17 = vpop.f32.mrf.mxu3  ;;  %v1436_v37 = vpop.f32.mrf.mxu2 }
 0x172   : > { %v1622_v15 = vadd.f32 %v1561_v17, %v1487_v39 }
 0x173   : > { %v1723_v23 = vpop.f32.mrf.mxu0 }
 0x174   : > { %v4434_v63 = vadd.f32 %v1718_v24, %v1622_v15 }
 0x175   : > { %v1114_v13 = vpop.f32.mrf.mxu1 }
 0x176   : > { %3258 = vmatmul.msk.bf16.gmra.mxu3 %vm791_vm2, %v4432_v44  ;;  %v1115_v33 = vadd.f32 %v1114_v13, %v4196_v62  ;;  %3309 = vmatmul.msk.bf16.gmra.mxu2 %vm791_vm2, %v4057_v21 }
 0x178   : > { %v1491_v19 = vadd.f32 %v1436_v37, %v1115_v33 }
 0x179   : > { %v1564_v12 = vpop.f32.mrf.mxu3  ;;  %v1439_v41 = vpop.f32.mrf.mxu2 }
 0x17a   : > { %v1623_v26 = vadd.f32 %v1564_v12, %v1488_v42 }
 0x17b   : > { %v1726_v52 = vpop.f32.mrf.mxu0 }
 0x17c   : > { %v4441_v39 = vadd.f32 %v1721_v7, %v1623_v26 }
 0x17d   : > { %v1117_v30 = vpop.f32.mrf.mxu1 }
 0x17e   : > { %v1118_v24 = vadd.f32 %v1117_v30, %v4134_v40  ;;  %3349 = vmatmul.msk.bf16.vlgmr.msra.gmra.mxu0 %vm791_vm2, %v4014_v3 }
 0x180   : > { %v1492_v16 = vadd.f32 %v1439_v41, %v1118_v24  ;;  %3285 = vmatmul.msk.bf16.gmra.mxu1 %vm791_vm2, %v4014_v3 }
 0x181   : > { %v1566_v62 = vpop.f32.mrf.mxu3  ;;  %v1441_v61 = vpop.f32.mrf.mxu2 }
 0x182   : > { %v1624_v21 = vadd.f32 %v1566_v62, %v1489_v18 }
 0x183   : > { %v1728_v43 = vpop.f32.mrf.mxu0 }
 0x184   : > { %v4448_v27 = vadd.f32 %v1723_v23, %v1624_v21 }
 0x185   : > { %v1119_v42 = vpop.f32.mrf.mxu1 }
 0x186   : > { %3328 = vmatmul.msk.bf16.vlgmr.msra.gmra.mxu3 %vm791_vm2, %v3822_v0  ;;  %v1120_v7 = vadd.f32 %v1119_v42, %v4153_v22  ;;  %3310 = vmatmul.msk.bf16.gmra.mxu2 %vm791_vm2, %v4081_v51 }
 0x188   : > { %v1493_v40 = vadd.f32 %v1441_v61, %v1120_v7 }
 0x189   : > { %v1569_v11 = vpop.f32.mrf.mxu3  ;;  %v1444_v45 = vpop.f32.mrf.mxu2 }
 0x18a   : > { %v1625_v17 = vadd.f32 %v1569_v11, %v1490_v2 }
 0x18b   : > { %v1731_v3 = vpop.f32.mrf.mxu0 }
 0x18c   : > { %v4455_v37 = vadd.f32 %v1726_v52, %v1625_v17 }
 0x18d   : > { %v1122_v18 = vpop.f32.mrf.mxu1 }
 0x18e   : > { %v1123_v15 = vadd.f32 %v1122_v18, %v4172_v6  ;;  %3350 = vmatmul.msk.bf16.gmra.mxu0 %vm791_vm2, %v4043_v58 }
 0x190   : > { %v1494_v23 = vadd.f32 %v1444_v45, %v1123_v15  ;;  %3286 = vmatmul.msk.bf16.gmra.mxu1 %vm791_vm2, %v4043_v58 }
 0x191   : > { %v1571_v0 = vpop.f32.mrf.mxu3  ;;  %v1446_v22 = vpop.f32.mrf.mxu2 }
 0x192   : > { %v1626_v51 = vadd.f32 %v1571_v0, %v1491_v19  ;;  %v5304_v0 = vld [vmem:[#allocation5_spill] sm:$0xff] }
 0x193   : > { %v1733_v13 = vpop.f32.mrf.mxu0 }
 0x194   : > { %v4462_v33 = vadd.f32 %v1728_v43, %v1626_v51 }
 0x195   : > { %v1124_v2 = vpop.f32.mrf.mxu1 }
 0x196   : > { %3329 = vmatmul.msk.bf16.gmra.mxu3 %vm791_vm2, %v3916_v35  ;;  %v1125_v12 = vadd.f32 %v1124_v2, %v4191_v20  ;;  %3311 = vmatmul.msk.bf16.gmra.mxu2 %vm791_vm2, %v4113_v59 }
 0x198   : > { %v1495_v6 = vadd.f32 %v1446_v22, %v1125_v12  ;;  %v5305_v22 = vld [vmem:[#allocation26_spill] sm:$0xff] }
 0x199   : > { %v1574_v41 = vpop.f32.mrf.mxu3  ;;  %v1449_v26 = vpop.f32.mrf.mxu2 }
 0x19a   : > { %v1627_v52 = vadd.f32 %v1574_v41, %v1492_v16 }
 0x19b   : > { %v1736_v58 = vpop.f32.mrf.mxu0 }
 0x19c   : > { %v4469_v30 = vadd.f32 %v1731_v3, %v1627_v52  ;;  %v5307_v52 = vld [vmem:[#allocation28_spill] sm:$0xff] }
 0x19d   : > { %v1127_v19 = vpop.f32.mrf.mxu1 }
 0x19e   : > { %v1128_v24 = vadd.f32 %v1127_v19, %v4091_v56  ;;  %3351 = vmatmul.msk.bf16.gmra.mxu0 %vm791_vm2, %v4063_v54  ;;  %v5308_v19 = vld [vmem:[#allocation25_spill] sm:$0xff] }
 0x1a0   : > { %v1496_v62 = vadd.f32 %v1449_v26, %v1128_v24  ;;  %3287 = vmatmul.msk.bf16.gmra.mxu1 %vm791_vm2, %v4063_v54 }
 0x1a1   : > { %v1576_v35 = vpop.f32.mrf.mxu3  ;;  %v1451_v20 = vpop.f32.mrf.mxu2 }
 0x1a2   : > { %v1628_v59 = vadd.f32 %v1576_v35, %v1493_v40 }
 0x1a3   : > { %v1738_v61 = vpop.f32.mrf.mxu0 }
 0x1a4   : > { %v4476_v21 = vadd.f32 %v1733_v13, %v1628_v59 }
 0x1a5   : > { %v1129_v16 = vpop.f32.mrf.mxu1 }
 0x1a6   : > { %3330 = vmatmul.msk.bf16.gmra.mxu3 %vm791_vm2, %v4000_v50  ;;  %v1130_v43 = vadd.f32 %v1129_v16, %v4106_v48  ;;  %3312 = vmatmul.msk.bf16.gmra.mxu2 %vm791_vm2, %v4147_v10 }
 0x1a8   : > { %v1497_v56 = vadd.f32 %v1451_v20, %v1130_v43  ;;  %v5309_v43 = vld [vmem:[#allocation9_spill] sm:$0xff] }
 0x1a9   : > { %v1579_v42 = vpop.f32.mrf.mxu3  ;;  %v1454_v7 = vpop.f32.mrf.mxu2 }
 0x1aa   : > { %v1629_v11 = vadd.f32 %v1579_v42, %v1494_v23  ;;  %v5310_v42 = vld [vmem:[#allocation30_spill] sm:$0xff] }
 0x1ab   : > { %v1741_v54 = vpop.f32.mrf.mxu0 }
 0x1ac   : > { %v4483_v45 = vadd.f32 %v1736_v58, %v1629_v11  ;;  %v5311_v11 = vld [vmem:[#allocation33_spill] sm:$0xff] }
 0x1ad   : > { %v1132_v40 = vpop.f32.mrf.mxu1 }
 0x1ae   : > { %v1133_v17 = vadd.f32 %v1132_v40, %v4123_v14  ;;  %3352 = vmatmul.msk.bf16.gmra.mxu0 %vm791_vm2, %v4093_v36  ;;  %v5306_v14 = vld [vmem:[#allocation29_spill] sm:$0xff] }
 0x1b0   : > { %v1498_v3 = vadd.f32 %v1454_v7, %v1133_v17  ;;  %3288 = vmatmul.msk.bf16.gmra.mxu1 %vm791_vm2, %v4093_v36 }
 0x1b1   : > { %v1581_v50 = vpop.f32.mrf.mxu3  ;;  %v1456_v48 = vpop.f32.mrf.mxu2 }
 0x1b2   : > { %v1630_v10 = vadd.f32 %v1581_v50, %v1495_v6 }
 0x1b3   : > { %v1743_v18 = vpop.f32.mrf.mxu0 }
 0x1b4   : > { %v4490_v15 = vadd.f32 %v1738_v61, %v1630_v10 }
 0x1b5   : > { %v1134_v23 = vpop.f32.mrf.mxu1 }
 0x1b6   : > { %3331 = vmatmul.msk.bf16.gmra.mxu3 %vm791_vm2, %v5304_v0  ;;  %v1135_v51 = vadd.f32 %v1134_v23, %v5305_v22  ;;  %3313 = vmatmul.msk.bf16.gmra.mxu2 %vm791_vm2, %v5306_v14  ;;  %v5312_v23 = vld [vmem:[#allocation32_spill] sm:$0xff]  ;;  %v5313_v0 = vld [vmem:[#allocation27_spill] sm:$0xff] }
 0x1b8   : > { %v1499_v13 = vadd.f32 %v1456_v48, %v1135_v51 }
 0x1b9   : > { %v1584_v2 = vpop.f32.mrf.mxu3  ;;  %v1459_v12 = vpop.f32.mrf.mxu2 }
 0x1ba   : > { %v1631_v41 = vadd.f32 %v1584_v2, %v1496_v62 }
 0x1bb   : > { %v1746_v36 = vpop.f32.mrf.mxu0 }
 0x1bc   : > { %v4497_v26 = vadd.f32 %v1741_v54, %v1631_v41 }
 0x1bd   : > { %v1137_v6 = vpop.f32.mrf.mxu1 }
 0x1be   : > { %v1138_v58 = vadd.f32 %v1137_v6, %v5307_v52  ;;  %3353 = vmatmul.msk.bf16.gmra.mxu0 %vm791_vm2, %v5308_v19  ;;  %v5314_v6 = vld [vmem:[#allocation16_spill] sm:$0xff] }
 0x1c0   : > { %v1500_v24 = vadd.f32 %v1459_v12, %v1138_v58  ;;  %3289 = vmatmul.msk.bf16.gmra.mxu1 %vm791_vm2, %v5308_v19  ;;  %v5316_v58 = vld [vmem:[#allocation36_spill] sm:$0xff] }
 0x1c1   : > { %v1586_v35 = vpop.f32.mrf.mxu3  ;;  %v1461_v20 = vpop.f32.mrf.mxu2 }
 0x1c2   : > { %v1632_v59 = vadd.f32 %v1586_v35, %v1497_v56 }
 0x1c3   : > { %v1748_v61 = vpop.f32.mrf.mxu0 }
 0x1c4   : > { %v4504_v16 = vadd.f32 %v1743_v18, %v1632_v59 }
 0x1c5   : > { %v1139_v62 = vpop.f32.mrf.mxu1 }
 0x1c6   : > { %3332 = vmatmul.msk.bf16.gmra.mxu3 %vm791_vm2, %v5309_v43  ;;  %v1140_v7 = vadd.f32 %v1139_v62, %v5310_v42  ;;  %3314 = vmatmul.msk.bf16.gmra.mxu2 %vm791_vm2, %v5311_v11  ;;  %v5317_v42 = vld [vmem:[#allocation15_spill] sm:$0xff] }
 0x1c8   : > { %v1501_v54 = vadd.f32 %v1461_v20, %v1140_v7  ;;  %v5318_v7 = vld [vmem:[#allocation31_spill] sm:$0xff] }
 0x1c9   : > { %v1589_v40 = vpop.f32.mrf.mxu3  ;;  %v1464_v17 = vpop.f32.mrf.mxu2 }
 0x1ca   : > { %v1633_v50 = vadd.f32 %v1589_v40, %v1498_v3 }
 0x1cb   : > { %v1751_v48 = vpop.f32.mrf.mxu0 }
 0x1cc   : > { %v4511_v10 = vadd.f32 %v1746_v36, %v1633_v50  ;;  %v5315_v36 = vld [vmem:[#allocation34_spill] sm:$0xff] }
 0x1cd   : > { %v1142_v56 = vpop.f32.mrf.mxu1 }
 0x1ce   : > { %v1143_v18 = vadd.f32 %v1142_v56, %v5312_v23  ;;  %3354 = vmatmul.msk.bf16.gmra.mxu0 %vm791_vm2, %v5313_v0 }
 0x1d0   : > { %v1502_v22 = vadd.f32 %v1464_v17, %v1143_v18  ;;  %3290 = vmatmul.msk.bf16.gmra.mxu1 %vm791_vm2, %v5313_v0  ;;  %v5319_v18 = vld [vmem:[#allocation23_spill] sm:$0xff] }
 0x1d1   : > { %v1591_v51 = vpop.f32.mrf.mxu3  ;;  %v1466_v14 = vpop.f32.mrf.mxu2 }
 0x1d2   : > { %v1634_v2 = vadd.f32 %v1591_v51, %v1499_v13 }
 0x1d3   : > { %v1753_v12 = vpop.f32.mrf.mxu0 }
 0x1d4   : > { %v4518_v41 = vadd.f32 %v1748_v61, %v1634_v2 }
 0x1d5   : > { %v1144_v3 = vpop.f32.mrf.mxu1 }
 0x1d6   : > { %3333 = vmatmul.msk.bf16.gmra.mxu3 %vm791_vm2, %v5314_v6  ;;  %v1145_v52 = vadd.f32 %v1144_v3, %v5315_v36  ;;  %3315 = vmatmul.msk.bf16.gmra.mxu2 %vm791_vm2, %v5316_v58 }
 0x1d8   : > { %v1503_v19 = vadd.f32 %v1466_v14, %v1145_v52  ;;  %v5321_v52 = vld [vmem:[#allocation35_spill] sm:$0xff] }
 0x1d9   : > { %v1594_v35 = vpop.f32.mrf.mxu3  ;;  %v1469_v20 = vpop.f32.mrf.mxu2 }
 0x1da   : > { %v1635_v59 = vadd.f32 %v1594_v35, %v1500_v24 }
 0x1db   : > { %v1756_v62 = vpop.f32.mrf.mxu0 }
 0x1dc   : > { %v4525_v43 = vadd.f32 %v1751_v48, %v1635_v59  ;;  %v5320_v48 = vld [vmem:[#allocation37_spill] sm:$0xff] }
 0x1dd   : > { %v1147_v13 = vpop.f32.mrf.mxu1 }
 0x1de   : > { %v1148_v61 = vadd.f32 %v1147_v13, %v5317_v42  ;;  %3355 = vmatmul.msk.bf16.gmra.mxu0 %vm791_vm2, %v5318_v7  ;;  %v5322_v13 = vld [vmem:[#allocation13_spill] sm:$0xff] }
 0x1e0   : > { %v1504_v11 = vadd.f32 %v1469_v20, %v1148_v61  ;;  %3291 = vmatmul.msk.bf16.gmra.mxu1 %vm791_vm2, %v5318_v7 }
 0x1e1   : > { %v1596_v40 = vpop.f32.mrf.mxu3  ;;  %v1471_v17 = vpop.f32.mrf.mxu2 }
 0x1e2   : > { %v1636_v50 = vadd.f32 %v1596_v40, %v1501_v54 }
 0x1e3   : > { %v1758_v56 = vpop.f32.mrf.mxu0 }
 0x1e4   : > { %v4532_v23 = vadd.f32 %v1753_v12, %v1636_v50 }
 0x1e5   : > { %v1149_v24 = vpop.f32.mrf.mxu1 }
 0x1e6   : > { %3334 = vmatmul.msk.bf16.gmra.mxu3 %vm791_vm2, %v5319_v18  ;;  %v1150_v0 = vadd.f32 %v1149_v24, %v5320_v48  ;;  %3316 = vmatmul.msk.bf16.gmra.mxu2 %vm791_vm2, %v4265_v60  ;;  %v5324_v18 = vld [vmem:[#allocation39_spill] sm:$0xff] }
 0x1e8   : > { %v1505_v51 = vadd.f32 %v1471_v17, %v1150_v0  ;;  %v5323_v17 = vld [vmem:[#allocation38_spill] sm:$0xff] }
 0x1e9   : > { %v1599_v14 = vpop.f32.mrf.mxu3  ;;  %v1962_v2 = vpop.f32.mrf.mxu2 }
 0x1ea   : > { %v1637_v3 = vadd.f32 %v1599_v14, %v1502_v22 }
 0x1eb   : > { %v1761_v6 = vpop.f32.mrf.mxu0 }
 0x1ec   : > { %v4539_v36 = vadd.f32 %v1756_v62, %v1637_v3 }
 0x1ed   : > { %v1827_v54 = vpop.f32.mrf.mxu1 }
 0x1ee   : > { %3356 = vmatmul.msk.bf16.gmra.mxu0 %vm791_vm2, %v5321_v52  ;;  %v1907_v48 = vadd.f32 %v1827_v54, %v5324_v18  ;;  %v5325_v54 = vld [vmem:[#allocation7_spill] sm:$0xff] }
 0x1f0   : > { %3292 = vmatmul.msk.bf16.gmra.mxu1 %vm791_vm2, %v5321_v52 }
 0x1f1   : > { %v1601_v12 = vpop.f32.mrf.mxu3  ;;  %v1964_v58 = vpop.f32.mrf.mxu2 }
 0x1f2   : > { %v1638_v35 = vadd.f32 %v1601_v12, %v1503_v19 }
 0x1f3   : > { %v1763_v20 = vpop.f32.mrf.mxu0 }
 0x1f4   : > { %v4545_v59 = vadd.f32 %v1758_v56, %v1638_v35 }
 0x1f5   : > { %v1829_v60 = vpop.f32.mrf.mxu1 }
 0x1f6   : > { %3335 = vmatmul.msk.bf16.gmra.mxu3 %vm791_vm2, %v5322_v13  ;;  %3317 = vmatmul.msk.bf16.gmra.mxu2 %vm791_vm2, %v4291_v4  ;;  %v1908_v12 = vadd.f32 %v1829_v60, %v5325_v54 }
 0x1f9   : > { %v1604_v22 = vpop.f32.mrf.mxu3  ;;  %v1967_v62 = vpop.f32.mrf.mxu2 }
 0x1fa   : > { %v1639_v42 = vadd.f32 %v1604_v22, %v1504_v11  ;;  %v2042_v11 = vadd.f32 %v1962_v2, %v1907_v48 }
 0x1fb   : > { %v2260_v61 = vpop.f32.mrf.mxu0 }
 0x1fc   : > { %v4551_v7 = vadd.f32 %v1761_v6, %v1639_v42 }
 0x1fd   : > { %v1832_v40 = vpop.f32.mrf.mxu1 }
 0x1fe   : > { %3357 = vmatmul.msk.bf16.gmra.mxu0 %vm791_vm2, %v5323_v17 }
 0x200   : > { %3293 = vmatmul.msk.bf16.gmra.mxu1 %vm791_vm2, %v5323_v17 }
 0x201   : > { %v1606_v19 = vpop.f32.mrf.mxu3  ;;  %v1969_v50 = vpop.f32.mrf.mxu2 }
 0x202   : > { %v1640_v56 = vadd.f32 %v1606_v19, %v1505_v51  ;;  %v4567_v51 = vld [vmem:[%s5171_s2] ss:$0 sm:$0xff] }
 0x203   : > { %v2262_v24 = vpop.f32.mrf.mxu0 }
 0x204   : > { %v4558_v4 = vadd.f32 %v1763_v20, %v1640_v56 }
 0x205   : > { %v1834_v0 = vpop.f32.mrf.mxu1 }
 0x206   : > { %3336 = vmatmul.msk.bf16.gmra.mxu3 %vm791_vm2, %v5278_v29  ;;  %3318 = vmatmul.msk.bf16.gmra.mxu2 %vm791_vm2, %v4317_v53  ;;  %v5326_v29 = vld [vmem:[#allocation19_spill] sm:$0xff]  ;;  %v2043_v53 = vadd.f32 %v1964_v58, %v1908_v12 }
 0x209   : > { %v2119_v14 = vpop.f32.mrf.mxu3  ;;  %v1972_v3 = vpop.f32.mrf.mxu2 }
 0x20a   : > { %v2199_v6 = vadd.f32 %v2119_v14, %v2042_v11 }
 0x20b   : > { %v2265_v52 = vpop.f32.mrf.mxu0 }
 0x20c   : > { %v2340_v35 = vadd.f32 %v2260_v61, %v2199_v6  ;;  %v5327_v61 = vld [vmem:[#allocation8_spill] sm:$0xff] }
 0x20d   : > { %v1837_v20 = vpop.f32.mrf.mxu1  ;;  %v1909_v19 = vadd.f32 %v1832_v40, %v5327_v61 }
 0x20e   : > { %v2376_v13 = vadd.f32 %v4567_v51, %v2340_v35  ;;  %3358 = vmatmul.msk.bf16.gmra.mxu0 %vm791_vm2, %v5326_v29 }
 0x20f   : > { %v2044_v58 = vadd.f32 %v1967_v62, %v1909_v19 }
 0x210   : > { %v4573_v2 = vmax.f32 %v2376_v13, 0.0  ;;  %3294 = vmatmul.msk.bf16.gmra.mxu1 %vm791_vm2, %v5326_v29 }
 0x211   : > { %v2121_v22 = vpop.f32.mrf.mxu3  ;;  %v1974_v42 = vpop.f32.mrf.mxu2 }
 0x212   : > { %v2200_v17 = vadd.f32 %v2121_v22, %v2043_v53  ;;  %2472 = vrot.lane.b32.xlu0 %v4573_v2, %s3522_s8 }
 0x213   : > { %v2267_v60 = vpop.f32.mrf.mxu0 }
 0x214   : > { %v2341_v56 = vadd.f32 %v2262_v24, %v2200_v17  ;;  %v5328_v24 = vld [vmem:[#allocation12_spill] sm:$0xff] }
 0x215   : > { %v1839_v18 = vpop.f32.mrf.mxu1  ;;  %v1910_v12 = vadd.f32 %v1834_v0, %v5328_v24 }
 0x216   : > { %v2377_v48 = vadd.f32 %v4567_v51, %v2341_v56  ;;  %3337 = vmatmul.msk.bf16.gmra.mxu3 %vm791_vm2, %v5284_v1  ;;  %3319 = vmatmul.msk.bf16.gmra.mxu2 %vm791_vm2, %v4343_v9  ;;  %v5329_v1 = vld [vmem:[#allocation6_spill] sm:$0xff] }
 0x217   : > { %v2045_v9 = vadd.f32 %v1969_v50, %v1910_v12 }
 0x218   : > { %v4585_v11 = vmax.f32 %v2377_v48, 0.0 }
 0x219   : > { %v2124_v14 = vpop.f32.mrf.mxu3  ;;  %v1977_v6 = vpop.f32.mrf.mxu2 }
 0x21a   : > { %v2201_v54 = vadd.f32 %v2124_v14, %v2044_v58  ;;  %2474 = vrot.lane.b32.xlu0 %v4585_v11, %s3522_s8 }
 0x21b   : > { %v2270_v40 = vpop.f32.mrf.mxu0 }
 0x21c   : > { %v2342_v35 = vadd.f32 %v2265_v52, %v2201_v54  ;;  %v5330_v52 = vld [vmem:[#allocation14_spill] sm:$0xff] }
 0x21d   : > { %v1842_v13 = vpop.f32.mrf.mxu1  ;;  %v1911_v61 = vadd.f32 %v1837_v20, %v5330_v52 }
 0x21e   : > { %v2378_v29 = vadd.f32 %v4567_v51, %v2342_v35  ;;  %3359 = vmatmul.msk.bf16.gmra.mxu0 %vm791_vm2, %v5329_v1 }
 0x21f   : > { %v2046_v50 = vadd.f32 %v1972_v3, %v1911_v61 }
 0x220   : > { %v4593_v62 = vmax.f32 %v2378_v29, 0.0  ;;  %3295 = vmatmul.msk.bf16.gmra.mxu1 %vm791_vm2, %v5329_v1 }
 0x221   : > { %v2126_v53 = vpop.f32.mrf.mxu3  ;;  %v1979_v22 = vpop.f32.mrf.mxu2 }
 0x222   : > { %v2202_v17 = vadd.f32 %v2126_v53, %v2045_v9  ;;  %2476 = vrot.lane.b32.xlu1 %v4593_v62, %s3522_s8 }
 0x223   : > { %v2272_v0 = vpop.f32.mrf.mxu0 }
 0x224   : > { %v2343_v19 = vadd.f32 %v2267_v60, %v2202_v17  ;;  %v5331_v60 = vld [vmem:[#allocation10_spill] sm:$0xff] }
 0x225   : > { %v1844_v56 = vpop.f32.mrf.mxu1  ;;  %v1912_v12 = vadd.f32 %v1839_v18, %v5331_v60 }
 0x226   : > { %v2379_v48 = vadd.f32 %v4567_v51, %v2343_v19  ;;  %3338 = vmatmul.msk.bf16.gmra.mxu3 %vm791_vm2, %v5291_v57  ;;  %3320 = vmatmul.msk.bf16.gmra.mxu2 %vm791_vm2, %v4371_v47  ;;  %v5332_v57 = vld [vmem:[#allocation11_spill] sm:$0xff] }
 0x227   : > { %v2047_v47 = vadd.f32 %v1974_v42, %v1912_v12 }
 0x228   : > { %v4605_v58 = vmax.f32 %v2379_v48, 0.0 }
 0x229   : > { %v2129_v14 = vpop.f32.mrf.mxu3  ;;  %v1982_v54 = vpop.f32.mrf.mxu2 }
 0x22a   : > { %v2203_v24 = vadd.f32 %v2129_v14, %v2046_v50  ;;  %2478 = vrot.lane.b32.xlu1 %v4605_v58, %s3522_s8 }
 0x22b   : > { %v2275_v20 = vpop.f32.mrf.mxu0 }
 0x22c   : > { %v2344_v35 = vadd.f32 %v2270_v40, %v2203_v24  ;;  %v1913_v40 = vadd.f32 %v1842_v13, %v4345_v49  ;;  %v5333_v13 = vld [vmem:[#allocation21_spill] sm:$0xff] }
 0x22d   : > { %v1847_v29 = vpop.f32.mrf.mxu1 }
 0x22e   : > { %v2380_v1 = vadd.f32 %v4567_v51, %v2344_v35  ;;  %3360 = vmatmul.msk.bf16.gmra.mxu0 %vm791_vm2, %v5332_v57  ;;  %v2048_v42 = vadd.f32 %v1977_v6, %v1913_v40 }
 0x230   : > { %v4613_v3 = vmax.f32 %v2380_v1, 0.0  ;;  %3296 = vmatmul.msk.bf16.gmra.mxu1 %vm791_vm2, %v5332_v57 }
 0x231   : > { %v2131_v9 = vpop.f32.mrf.mxu3  ;;  %v1984_v53 = vpop.f32.mrf.mxu2 }
 0x232   : > { %v2204_v17 = vadd.f32 %v2131_v9, %v2047_v47  ;;  %2480 = vrot.lane.b32.xlu2 %v4613_v3, %s3522_s8 }
 0x233   : > { %v2277_v18 = vpop.f32.mrf.mxu0 }
 0x234   : > { %v2345_v52 = vadd.f32 %v2272_v0, %v2204_v17  ;;  %v1914_v0 = vadd.f32 %v1844_v56, %v5333_v13 }
 0x235   : > { %v1849_v61 = vpop.f32.mrf.mxu1 }
 0x236   : > { %v2381_v19 = vadd.f32 %v4567_v51, %v2345_v52  ;;  %3339 = vmatmul.msk.bf16.gmra.mxu3 %vm791_vm2, %v5297_v8  ;;  %3321 = vmatmul.msk.bf16.gmra.mxu2 %vm791_vm2, %v4402_v32  ;;  %v5334_v8 = vld [vmem:[#allocation20_spill] sm:$0xff]  ;;  %v2049_v32 = vadd.f32 %v1979_v22, %v1914_v0 }
 0x237   : > { %v5337_v22 = vld [vmem:[#allocation24_spill] sm:$0xff] }
 0x238   : > { %v4625_v48 = vmax.f32 %v2381_v19, 0.0 }
 0x239   : > { %v2134_v50 = vpop.f32.mrf.mxu3  ;;  %v1987_v14 = vpop.f32.mrf.mxu2 }
 0x23a   : > { %v2205_v24 = vadd.f32 %v2134_v50, %v2048_v42  ;;  %2482 = vrot.lane.b32.xlu2 %v4625_v48, %s3522_s8 }
 0x23b   : > { %v2280_v49 = vpop.f32.mrf.mxu0 }
 0x23c   : > { %v2346_v60 = vadd.f32 %v2275_v20, %v2205_v24  ;;  %v5336_v20 = vld [vmem:[#allocation18_spill] sm:$0xff] }
 0x23d   : > { %v1852_v12 = vpop.f32.mrf.mxu1  ;;  %v1915_v9 = vadd.f32 %v1847_v29, %v5336_v20  ;;  %v5339_v29 = vld [vmem:[#allocation40_spill] sm:$0xff]  ;;  %v1804_v20 = vrot.slane %v4398_v31, 5 }
 0x23e   : > { %v2382_v35 = vadd.f32 %v4567_v51, %v2346_v60  ;;  %3361 = vmatmul.msk.bf16.gmra.mxu0 %vm791_vm2, %v5334_v8  ;;  %v5340_v60 = vld [vmem:[#allocation41_spill] sm:$0xff] }
 0x23f   : > { %v2050_v19 = vadd.f32 %v1982_v54, %v1915_v9  ;;  %v5341_v54 = vld [vmem:[#allocation17_spill] sm:$0xff] }
 0x240   : > { %v4633_v6 = vmax.f32 %v2382_v35, 0.0  ;;  %3297 = vmatmul.msk.bf16.gmra.mxu1 %vm791_vm2, %v5334_v8  ;;  %v1916_v35 = vadd.f32 %v1849_v61, %v5340_v60 }
 0x241   : > { %v2136_v1 = vpop.f32.mrf.mxu3  ;;  %v4637_v57 = vpop.f32.mrf.mxu2 }
 0x242   : > { %5335 = vst [vmem:[#allocation5_spill] sm:$0xff] %v4633_v6  ;;  %v2206_v47 = vadd.f32 %v2136_v1, %v2049_v32  ;;  %2484 = vrot.lane.b32.xlu0 %v4633_v6, %s3522_s8  ;;  %v3279_v1 = vrot.slane %v5341_v54, 9  ;;  %v2051_v9 = vadd.f32 %v1984_v53, %v1916_v35 }
 0x243   : > { %v2282_v56 = vpop.f32.mrf.mxu0 }
 0x244   : > { %v2347_v17 = vadd.f32 %v2277_v18, %v2206_v47  ;;  %v1801_v18 = vrot.slane %v5339_v29, 5 }
 0x245   : > { %v1854_v40 = vpop.f32.mrf.mxu1 }
 0x246   : > { %v2383_v52 = vadd.f32 %v4567_v51, %v2347_v17  ;;  %3340 = vmatmul.msk.bf16.gmra.mxu3 %vm791_vm2, %v5337_v22  ;;  %3322 = vmatmul.msk.bf16.gmra.mxu2 %vm791_vm2, %v4432_v44  ;;  %v1803_v47 = vrot.slane %v1801_v18, 4  ;;  %v3389_v22 = vld [vmem:[%s3628_s23 + $0xcc] sm:$0xff] }
 0x248   : > { %v4647_v42 = vmax.f32 %v2383_v52, 0.0  ;;  %v1805_v31 = vsel %vm3930_vm6, %v1803_v47, %v1804_v20 }
 0x249   : > { %v2139_v50 = vpop.f32.mrf.mxu3  ;;  %v4649_v24 = vpop.f32.mrf.mxu2  ;;  %v1807_v35 = vunpack.c.l.b16 %v1805_v31 }
 0x24a   : > { %5338 = vst [vmem:[#allocation26_spill] sm:$0xff] %v4647_v42  ;;  %v2207_v13 = vadd.f32 %v2139_v50, %v2050_v19  ;;  %2486 = vrot.lane.b32.xlu1 %v4647_v42, %s3522_s8  ;;  %v1802_v50 = vsel %vm3930_vm6, %v3279_v1, %v1801_v18  ;;  %v330_v18 = vld [vmem:[%s3628_s23 + $0xd0] sm:$0xf] }
 0x24b   : > { %v2285_v0 = vpop.f32.mrf.mxu0  ;;  %v1806_v60 = vunpack.c.l.b16 %v1802_v50  ;;  %v1918_v50 = vadd.f32 %v1854_v40, %v4415_v46 }
 0x24c   : > { %v2348_v8 = vadd.f32 %v2280_v49, %v2207_v13  ;;  %v1917_v13 = vadd.f32 %v1852_v12, %v4404_v25 }
 0x24d   : > { %v4655_v32 = vpop.f32.mrf.mxu1  ;;  %v1808_v12 = vpack.c.b16 %v1807_v35, %v1806_v60  ;;  %v2053_v42 = vadd.f32 %v4637_v57, %v1918_v50 }
 0x24e   : > { %v2384_v44 = vadd.f32 %v4567_v51, %v2348_v8  ;;  %3362 = vmatmul.msk.bf16.gmra.mxu0 %vm791_vm2, %v4384_v38  ;;  %v2052_v54 = vadd.f32 %v1987_v14, %v1917_v13 }
 0x250   : > { %v4662_v17 = vmax.f32 %v2384_v44, 0.0  ;;  %3298 = vmatmul.msk.bf16.gmra.mxu1 %vm791_vm2, %v4384_v38  ;;  %v329_v44 = vld [vmem:[%s3628_s23 + $0xcc] sm:$0xf] }
 0x251   : > { %v2141_v61 = vpop.f32.mrf.mxu3  ;;  %v4666_v49 = vpop.f32.mrf.mxu2  ;;  %v2075_v20 = vshrl.u32 %v329_v44, 16 }
 0x252   : > { %5342 = vst [vmem:[#allocation29_spill] sm:$0xff] %v4662_v17  ;;  %v2208_v52 = vadd.f32 %v2141_v61, %v2051_v9  ;;  %2488 = vrot.lane.b32.xlu2 %v4662_v17, %s3522_s8  ;;  %v2078_v9 = vshll.u32 %v329_v44, 16  ;;  %v2084_v61 = vshll.u32 %v330_v18, 16 }
 0x253   : > { %v2287_v53 = vpop.f32.mrf.mxu0  ;;  %v2077_v60 = vrot.slane %v2075_v20, 4 }
 0x254   : > { %v2349_v38 = vadd.f32 %v2282_v56, %v2208_v52  ;;  %v2088_v52 = vshrl.u32 %v330_v18, 16  ;;  %v2080_v35 = vrot.slane %v2078_v9, 5 }
 0x255   : > { %v4676_v29 = vpop.f32.mrf.mxu1 }
 0x256   : > { %v2385_v8 = vadd.f32 %v4567_v51, %v2349_v38  ;;  %3341 = vmatmul.msk.bf16.gmra.mxu3 %vm791_vm2, %v4016_v55  ;;  %3323 = vmatmul.msk.bf16.gmra.mxu2 %vm791_vm2, %v3389_v22  ;;  %v2234_v22 = vrot.slane %v330_v18, 5  ;;  %v331_v38 = vld [vmem:[%s3628_s23 + $0xd4] sm:$0x1]  ;;  %v2081_v18 = vor.u32 %v2080_v35, %v2077_v60 }
 0x257   : > { %v2237_v17 = vrot.slane %v331_v38, 5  ;;  %v2094_v9 = vshll.u32 %v331_v38, 16 }
 0x258   : > { %v4684_v1 = vmax.f32 %v2385_v8, 0.0  ;;  %v2086_v8 = vrot.slane %v2084_v61, 5  ;;  %v1919_v61 = vadd.f32 %v4655_v32, %v4424_v5 }
 0x259   : > { %v2144_v47 = vpop.f32.mrf.mxu3  ;;  %v4686_v25 = vpop.f32.mrf.mxu2  ;;  %v2096_v60 = vrot.slane %v2094_v9, 5 }
 0x25a   : > { %5344 = vst [vmem:[#allocation28_spill] sm:$0xff] %v4684_v1  ;;  %v2209_v56 = vadd.f32 %v2144_v47, %v2052_v54  ;;  %2490 = vrot.lane.b32.xlu0 %v4684_v1, %s3522_s8  ;;  %v2090_v54 = vrot.slane %v2088_v52, 4  ;;  %v3344_v47 = vrot.slane %v329_v44, 9  ;;  %v2236_v1 = vrot.slane %v2234_v22, 4 }
 0x25b   : > { %v2290_v55 = vpop.f32.mrf.mxu0 }
 0x25c   : > { %v2350_v14 = vadd.f32 %v2285_v0, %v2209_v56  ;;  %v2091_v20 = vor.u32 %v2090_v54, %v2086_v8  ;;  %v2235_v44 = vsel %vm3930_vm6, %v3344_v47, %v2234_v22  ;;  %v2238_v57 = vsel %vm3930_vm6, %v2236_v1, %v2237_v17 }
 0x25d   : > { %v1862_v31 = vpop.f32.mrf.mxu1  ;;  %v2239_v50 = vunpack.c.l.b16 %v2235_v44  ;;  %v2054_v22 = vadd.f32 %v4649_v24, %v1919_v61  ;;  %v1920_v54 = vadd.f32 %v4676_v29, %v4434_v63 }
 0x25e   : > { %v2386_v13 = vadd.f32 %v4567_v51, %v2350_v14  ;;  %3363 = vmatmul.msk.bf16.gmra.mxu0 %vm791_vm2, %v1808_v12  ;;  %v2240_v14 = vunpack.c.l.b16 %v2238_v57  ;;  %v2092_v38 = vrot.slane %v2091_v20, 4  ;;  %v1921_v57 = vadd.f32 %v1862_v31, %v4441_v39 }
 0x25f   : > { %v2055_v20 = vadd.f32 %v4666_v49, %v1920_v54 }
 0x260   : > { %v4695_v6 = vmax.f32 %v2386_v13, 0.0  ;;  %3299 = vmatmul.msk.bf16.gmra.mxu1 %vm791_vm2, %v1808_v12  ;;  %v2082_v13 = vrot.slane %v2081_v18, 4  ;;  %v2241_v5 = vpack.c.b16 %v2240_v14, %v2239_v50 }
 0x261   : > { %v2146_v46 = vpop.f32.mrf.mxu3  ;;  %v1999_v40 = vpop.f32.mrf.mxu2 }
 0x262   : > { %v2210_v0 = vadd.f32 %v2146_v46, %v2053_v42  ;;  %2492 = vrot.lane.b32.xlu1 %v4695_v6, %s3522_s8 }
 0x263   : > { %v2292_v56 = vpop.f32.mrf.mxu0 }
 0x264   : > { %v2351_v12 = vadd.f32 %v2287_v53, %v2210_v0  ;;  %v2097_v53 = vsel %vm3662_vm3, %v2092_v38, %v2096_v60 }
 0x265   : > { %v1864_v52 = vpop.f32.mrf.mxu1  ;;  %v2099_v18 = vunpack.c.l.b16 %v2097_v53 }
 0x266   : > { %v2387_v42 = vadd.f32 %v4567_v51, %v2351_v12  ;;  %3342 = vmatmul.msk.bf16.gmra.mxu3 %vm791_vm2, %v4422_v34  ;;  %v2087_v34 = vsel %vm3662_vm3, %v2082_v13, %v2086_v8 }
 0x267   : > { %v2098_v0 = vunpack.c.l.b16 %v2087_v34 }
 0x268   : > { %v4710_v35 = vmax.f32 %v2387_v42, 0.0  ;;  %v2056_v42 = vadd.f32 %v4686_v25, %v1921_v57 }
 0x269   : > { %v2149_v17 = vpop.f32.mrf.mxu3  ;;  %v2002_v19 = vpop.f32.mrf.mxu2  ;;  %v2100_v29 = vpack.c.b16 %v2099_v18, %v2098_v0 }
 0x26a   : > { %v2211_v1 = vadd.f32 %v2149_v17, %v2054_v22  ;;  %2494 = vrot.lane.b32.xlu2 %v4710_v35, %s3522_s8  ;;  %v1922_v22 = vadd.f32 %v1864_v52, %v4448_v27 }
 0x26b   : > { %v2295_v32 = vpop.f32.mrf.mxu0 }
 0x26c   : > { %v2352_v24 = vadd.f32 %v2290_v55, %v2211_v1  ;;  %v2057_v17 = vadd.f32 %v1999_v40, %v1922_v22 }
 0x26d   : > { %v1867_v47 = vpop.f32.mrf.mxu1 }
 0x26e   : > { %v2388_v46 = vadd.f32 %v4567_v51, %v2352_v24  ;;  %3364 = vmatmul.msk.bf16.gmra.mxu0 %vm791_vm2, %v2241_v5  ;;  %v1923_v53 = vadd.f32 %v1867_v47, %v4455_v37 }
 0x270   : > { %v4723_v9 = vmax.f32 %v2388_v46, 0.0  ;;  %v2058_v52 = vadd.f32 %v2002_v19, %v1923_v53 }
 0x271   : > { %v2151_v8 = vpop.f32.mrf.mxu3  ;;  %v2004_v44 = vpop.f32.mrf.mxu2 }
 0x272   : > { %v2212_v63 = vadd.f32 %v2151_v8, %v2055_v20  ;;  %2496 = vrot.lane.b32.xlu0 %v4723_v9, %s3522_s8 }
 0x273   : > { %v2297_v55 = vpop.f32.mrf.mxu0 }
 0x274   : > { %v2353_v61 = vadd.f32 %v2292_v56, %v2212_v63 }
 0x275   : > { %v1869_v12 = vpop.f32.mrf.mxu1 }
 0x276   : > { %v2389_v49 = vadd.f32 %v4567_v51, %v2353_v61  ;;  %3343 = vmatmul.msk.bf16.gmra.mxu3 %vm791_vm2, %v2100_v29  ;;  %v1924_v20 = vadd.f32 %v1869_v12, %v4462_v33 }
 0x278   : > { %v4734_v50 = vmax.f32 %v2389_v49, 0.0  ;;  %v2059_v63 = vadd.f32 %v2004_v44, %v1924_v20 }
 0x279   : > { %v2154_v14 = vpop.f32.mrf.mxu3  ;;  %v2007_v60 = vpop.f32.mrf.mxu2 }
 0x27a   : > { %v2213_v13 = vadd.f32 %v2154_v14, %v2056_v42  ;;  %2498 = vrot.lane.b32.xlu1 %v4734_v50, %s3522_s8 }
 0x27b   : > { %v2300_v38 = vpop.f32.mrf.mxu0 }
 0x27c   : > { %v2354_v39 = vadd.f32 %v2295_v32, %v2213_v13 }
 0x27d   : > { %v1872_v31 = vpop.f32.mrf.mxu1 }
 0x27e   : > { %v2390_v56 = vadd.f32 %v4567_v51, %v2354_v39  ;;  %v1925_v61 = vadd.f32 %v1872_v31, %v4469_v30 }
 0x280   : > { %v4740_v1 = vmax.f32 %v2390_v56, 0.0  ;;  %v2060_v12 = vadd.f32 %v2007_v60, %v1925_v61 }
 0x281   : > { %v2156_v5 = vpop.f32.mrf.mxu3  ;;  %v2009_v46 = vpop.f32.mrf.mxu2 }
 0x282   : > { %v2214_v25 = vadd.f32 %v2156_v5, %v2057_v17  ;;  %2500 = vrot.lane.b32.xlu2 %v4740_v1, %s3522_s8 }
 0x283   : > { %v2302_v34 = vpop.f32.mrf.mxu0 }
 0x284   : > { %v2355_v54 = vadd.f32 %v2297_v55, %v2214_v25 }
 0x285   : > { %v1874_v24 = vpop.f32.mrf.mxu1 }
 0x286   : > { %v2391_v27 = vadd.f32 %v4567_v51, %v2355_v54  ;;  %v1926_v39 = vadd.f32 %v1874_v24, %v4476_v21 }
 0x288   : > { %v4746_v32 = vmax.f32 %v2391_v27, 0.0  ;;  %v2061_v31 = vadd.f32 %v2009_v46, %v1926_v39 }
 0x289   : > { %v2159_v0 = vpop.f32.mrf.mxu3  ;;  %v2012_v47 = vpop.f32.mrf.mxu2 }
 0x28a   : > { %v2215_v40 = vadd.f32 %v2159_v0, %v2058_v52  ;;  %2502 = vrot.lane.b32.xlu0 %v4746_v32, %s3522_s8 }
 0x28b   : > { %v2305_v18 = vpop.f32.mrf.mxu0 }
 0x28c   : > { %v2356_v28 = vadd.f32 %v2300_v38, %v2215_v40 }
 0x28d   : > { %v1877_v8 = vpop.f32.mrf.mxu1 }
 0x28e   : > { %v2392_v37 = vadd.f32 %v4567_v51, %v2356_v28  ;;  %v1927_v54 = vadd.f32 %v1877_v8, %v4483_v45 }
 0x290   : > { %v4752_v29 = vmax.f32 %v2392_v37, 0.0  ;;  %v2062_v21 = vadd.f32 %v2012_v47, %v1927_v54 }
 0x291   : > { %v2161_v55 = vpop.f32.mrf.mxu3  ;;  %v2014_v38 = vpop.f32.mrf.mxu2 }
 0x292   : > { %v2216_v19 = vadd.f32 %v2161_v55, %v2059_v63  ;;  %2504 = vrot.lane.b32.xlu1 %v4752_v29, %s3522_s8 }
 0x293   : > { %v2307_v57 = vpop.f32.mrf.mxu0 }
 0x294   : > { %v2357_v49 = vadd.f32 %v2302_v34, %v2216_v19 }
 0x295   : > { %v1879_v42 = vpop.f32.mrf.mxu1 }
 0x296   : > { %v2393_v33 = vadd.f32 %v4567_v51, %v2357_v49  ;;  %v1928_v20 = vadd.f32 %v1879_v42, %v4490_v15 }
 0x298   : > { %v4758_v14 = vmax.f32 %v2393_v33, 0.0  ;;  %v2063_v45 = vadd.f32 %v2014_v38, %v1928_v20 }
 0x299   : > { %v2164_v13 = vpop.f32.mrf.mxu3  ;;  %v2017_v34 = vpop.f32.mrf.mxu2 }
 0x29a   : > { %v2217_v44 = vadd.f32 %v2164_v13, %v2060_v12  ;;  %2506 = vrot.lane.b32.xlu2 %v4758_v14, %s3522_s8 }
 0x29b   : > { %v2310_v22 = vpop.f32.mrf.mxu0 }
 0x29c   : > { %v2358_v56 = vadd.f32 %v2305_v18, %v2217_v44 }
 0x29d   : > { %v1882_v30 = vpop.f32.mrf.mxu1 }
 0x29e   : > { %v2394_v17 = vadd.f32 %v4567_v51, %v2358_v56  ;;  %v1929_v61 = vadd.f32 %v1882_v30, %v4497_v26 }
 0x2a0   : > { %v4764_v5 = vmax.f32 %v2394_v17, 0.0  ;;  %v2064_v42 = vadd.f32 %v2017_v34, %v1929_v61 }
 0x2a1   : > { %v2166_v25 = vpop.f32.mrf.mxu3  ;;  %v2019_v37 = vpop.f32.mrf.mxu2 }
 0x2a2   : > { %v2218_v60 = vadd.f32 %v2166_v25, %v2061_v31  ;;  %2508 = vrot.lane.b32.xlu0 %v4764_v5, %s3522_s8 }
 0x2a3   : > { %v2312_v53 = vpop.f32.mrf.mxu0 }
 0x2a4   : > { %v2359_v27 = vadd.f32 %v2307_v57, %v2218_v60 }
 0x2a5   : > { %v1884_v0 = vpop.f32.mrf.mxu1 }
 0x2a6   : > { %v2395_v52 = vadd.f32 %v4567_v51, %v2359_v27  ;;  %v1930_v44 = vadd.f32 %v1884_v0, %v4504_v16 }
 0x2a8   : > { %v4770_v24 = vmax.f32 %v2395_v52, 0.0  ;;  %v2065_v26 = vadd.f32 %v2019_v37, %v1930_v44 }
 0x2a9   : > { %v2169_v40 = vpop.f32.mrf.mxu3  ;;  %v2022_v15 = vpop.f32.mrf.mxu2 }
 0x2aa   : > { %v2219_v46 = vadd.f32 %v2169_v40, %v2062_v21  ;;  %2510 = vrot.lane.b32.xlu1 %v4770_v24, %s3522_s8 }
 0x2ab   : > { %v2315_v18 = vpop.f32.mrf.mxu0 }
 0x2ac   : > { %v2360_v28 = vadd.f32 %v2310_v22, %v2219_v46 }
 0x2ad   : > { %v1887_v19 = vpop.f32.mrf.mxu1 }
 0x2ae   : > { %v2396_v63 = vadd.f32 %v4567_v51, %v2360_v28  ;;  %v1931_v34 = vadd.f32 %v1887_v19, %v4511_v10 }
 0x2b0   : > { %v4776_v8 = vmax.f32 %v2396_v63, 0.0  ;;  %v2066_v52 = vadd.f32 %v2022_v15, %v1931_v34 }
 0x2b1   : > { %v2171_v55 = vpop.f32.mrf.mxu3  ;;  %v2024_v31 = vpop.f32.mrf.mxu2 }
 0x2b2   : > { %v2220_v47 = vadd.f32 %v2171_v55, %v2063_v45  ;;  %2512 = vrot.lane.b32.xlu2 %v4776_v8, %s3522_s8 }
 0x2b3   : > { %v2317_v57 = vpop.f32.mrf.mxu0 }
 0x2b4   : > { %v2361_v49 = vadd.f32 %v2312_v53, %v2220_v47 }
 0x2b5   : > { %v1889_v39 = vpop.f32.mrf.mxu1 }
 0x2b6   : > { %v2397_v33 = vadd.f32 %v4567_v51, %v2361_v49 }
 0x2b8   : > { %v4782_v12 = vmax.f32 %v2397_v33, 0.0 }
 0x2b9   : > { %v2174_v13 = vpop.f32.mrf.mxu3  ;;  %v2027_v46 = vpop.f32.mrf.mxu2 }
 0x2ba   : > { %v2221_v38 = vadd.f32 %v2174_v13, %v2064_v42  ;;  %2514 = vrot.lane.b32.xlu0 %v4782_v12, %s3522_s8 }
 0x2bb   : > { %v2320_v56 = vpop.f32.mrf.mxu0 }
 0x2bc   : > { %v2362_v22 = vadd.f32 %v2315_v18, %v2221_v38  ;;  %v1932_v18 = vadd.f32 %v1889_v39, %v4518_v41 }
 0x2bd   : > { %v1892_v16 = vpop.f32.mrf.mxu1 }
 0x2be   : > { %v2398_v17 = vadd.f32 %v4567_v51, %v2362_v22  ;;  %v2067_v10 = vadd.f32 %v2024_v31, %v1932_v18  ;;  %v1933_v19 = vadd.f32 %v1892_v16, %v4525_v43 }
 0x2c0   : > { %v4788_v30 = vmax.f32 %v2398_v17, 0.0  ;;  %v2068_v41 = vadd.f32 %v2027_v46, %v1933_v19 }
 0x2c1   : > { %v2176_v25 = vpop.f32.mrf.mxu3  ;;  %v2029_v61 = vpop.f32.mrf.mxu2 }
 0x2c2   : > { %v2222_v60 = vadd.f32 %v2176_v25, %v2065_v26  ;;  %2516 = vrot.lane.b32.xlu1 %v4788_v30, %s3522_s8 }
 0x2c3   : > { %v2322_v27 = vpop.f32.mrf.mxu0 }
 0x2c4   : > { %v2363_v53 = vadd.f32 %v2317_v57, %v2222_v60 }
 0x2c5   : > { %v1894_v63 = vpop.f32.mrf.mxu1 }
 0x2c6   : > { %v2399_v54 = vadd.f32 %v4567_v51, %v2363_v53  ;;  %v1934_v44 = vadd.f32 %v1894_v63, %v4532_v23 }
 0x2c8   : > { %v4794_v21 = vmax.f32 %v2399_v54, 0.0 }
 0x2c9   : > { %v2179_v0 = vpop.f32.mrf.mxu3  ;;  %v2032_v43 = vpop.f32.mrf.mxu2 }
 0x2ca   : > { %v2223_v40 = vadd.f32 %v2179_v0, %v2066_v52  ;;  %2518 = vrot.lane.b32.xlu2 %v4794_v21, %s3522_s8 }
 0x2cb   : > { %v2325_v55 = vpop.f32.mrf.mxu0 }
 0x2cc   : > { %v2364_v20 = vadd.f32 %v2320_v56, %v2223_v40  ;;  %v2069_v56 = vadd.f32 %v2029_v61, %v1934_v44 }
 0x2cd   : > { %v1897_v42 = vpop.f32.mrf.mxu1 }
 0x2ce   : > { %v2400_v28 = vadd.f32 %v4567_v51, %v2364_v20  ;;  %v1935_v25 = vadd.f32 %v1897_v42, %v4539_v36 }
 0x2d0   : > { %v4800_v37 = vmax.f32 %v2400_v28, 0.0  ;;  %v2070_v23 = vadd.f32 %v2032_v43, %v1935_v25  ;;  %v2670_v28 = vld [vmem:[%s5172_s3] sm:$0xff] }
 0x2d1   : > { %v2181_v45 = vpop.f32.mrf.mxu3  ;;  %2691 = vmatpush.msrb.mxu1 %v2670_v28 }
 0x2d2   : > { %v2224_v47 = vadd.f32 %v2181_v45, %v2067_v10  ;;  %2520 = vrot.lane.b32.xlu0 %v4800_v37, %s3522_s8  ;;  %v2700_v10 = vld [vmem:[%s5174_s5 + $0x18] sm:$0xff] }
 0x2d3   : > { %v2327_v38 = vpop.f32.mrf.mxu0  ;;  %2718 = vmatpush.msrb.mxu2 %v2700_v10  ;;  %v2699_v10 = vld [vmem:[%s5174_s5 + $0x10] sm:$0xff] }
 0x2d4   : > { %v2365_v57 = vadd.f32 %v2322_v27, %v2224_v47  ;;  %v2034_v27 = vpop.f32.mrf.mxu2 }
 0x2d5   : > { %v1899_v60 = vpop.f32.mrf.mxu1  ;;  %2719 = vmatpush.msrb.mxu2 %v2699_v10 }
 0x2d6   : > { %v2401_v49 = vadd.f32 %v4567_v51, %v2365_v57  ;;  %v1936_v40 = vadd.f32 %v1899_v60, %v4545_v59 }
 0x2d8   : > { %v4806_v33 = vmax.f32 %v2401_v49, 0.0  ;;  %v2071_v63 = vadd.f32 %v2034_v27, %v1936_v40 }
 0x2d9   : > { %v2184_v15 = vpop.f32.mrf.mxu3 }
 0x2da   : > { %v2225_v13 = vadd.f32 %v2184_v15, %v2068_v41  ;;  %2522 = vrot.lane.b32.xlu1 %v4806_v33, %s3522_s8 }
 0x2db   : > { %v2330_v53 = vpop.f32.mrf.mxu0 }
 0x2dc   : > { %v2366_v22 = vadd.f32 %v2325_v55, %v2225_v13  ;;  %v2037_v47 = vpop.f32.mrf.mxu2 }
 0x2dd   : > { %v1902_v18 = vpop.f32.mrf.mxu1 }
 0x2de   : > { %v2402_v39 = vadd.f32 %v4567_v51, %v2366_v22  ;;  %v1937_v19 = vadd.f32 %v1902_v18, %v4551_v7 }
 0x2e0   : > { %v4812_v17 = vmax.f32 %v2402_v39, 0.0  ;;  %v2072_v49 = vadd.f32 %v2037_v47, %v1937_v19 }
 0x2e1   : > { %v2186_v26 = vpop.f32.mrf.mxu3 }
 0x2e2   : > { %v2226_v31 = vadd.f32 %v2186_v26, %v2069_v56  ;;  %2524 = vrot.lane.b32.xlu2 %v4812_v17, %s3522_s8 }
 0x2e3   : > { %v2332_v20 = vpop.f32.mrf.mxu0 }
 0x2e4   : > { %v2367_v34 = vadd.f32 %v2327_v38, %v2226_v31  ;;  %v2039_v39 = vpop.f32.mrf.mxu2 }
 0x2e5   : > { %v1904_v41 = vpop.f32.mrf.mxu1 }
 0x2e6   : > { %v2403_v54 = vadd.f32 %v4567_v51, %v2367_v34  ;;  %v1938_v44 = vadd.f32 %v1904_v41, %v4558_v4  ;;  %v2473_v4 = vpop.permute.xlu0 %2472 }
 0x2e7   : > { %v2568_v40 = vadd.f32 %v2473_v4, %v4573_v2  ;;  %v5347_v4 = vld [vmem:[#allocation29_spill] sm:$0xff] }
 0x2e8   : > { %v4818_v16 = vmax.f32 %v2403_v54, 0.0  ;;  %v2073_v7 = vadd.f32 %v2039_v39, %v1938_v44  ;;  %v2477_v54 = vpop.permute.xlu1 %2476  ;;  %v5346_v44 = vld [vmem:[#allocation26_spill] sm:$0xff] }
 0x2e9   : > { %v2189_v52 = vpop.f32.mrf.mxu3 }
 0x2ea   : > { %v2227_v0 = vadd.f32 %v2189_v52, %v2070_v23  ;;  %2526 = vrot.lane.b32.xlu0 %v4818_v16, %s3522_s8  ;;  %v2481_v52 = vpop.permute.xlu2 %2480 }
 0x2eb   : > { %v2335_v42 = vpop.f32.mrf.mxu0 }
 0x2ec   : > { %v2368_v46 = vadd.f32 %v2330_v53, %v2227_v0 }
 0x2ee   : > { %v2404_v36 = vadd.f32 %v4567_v51, %v2368_v46  ;;  %v2475_v23 = vpop.permute.xlu0 %2474  ;;  %v2570_v46 = vadd.f32 %v2477_v54, %v4593_v62 }
 0x2ef   : > { %v2569_v27 = vadd.f32 %v2475_v23, %v4585_v11  ;;  %v5348_v23 = vld [vmem:[#allocation28_spill] sm:$0xff] }
 0x2f0   : > { %v4830_v45 = vmax.f32 %v2404_v36, 0.0  ;;  %v2479_v0 = vpop.permute.xlu1 %2478  ;;  %v2600_v36 = vsel %vm791_vm2, %v2568_v40, 0.0 }
 0x2f1   : > { %v2191_v55 = vpop.f32.mrf.mxu3  ;;  %v2601_v18 = vsel %vm791_vm2, %v2569_v27, 0.0 }
 0x2f2   : > { %v2228_v59 = vadd.f32 %v2191_v55, %v2071_v63  ;;  %2528 = vrot.lane.b32.xlu1 %v4830_v45, %s3522_s8  ;;  %v2602_v28 = vadd.f32 %v2601_v18, %v2600_v36  ;;  %v2483_v47 = vpop.permute.xlu2 %2482 }
 0x2f3   : > { %v2337_v25 = vpop.f32.mrf.mxu0  ;;  %v2573_v41 = vadd.f32 %v2483_v47, %v4625_v48 }
 0x2f4   : > { %v2369_v57 = vadd.f32 %v2332_v20, %v2228_v59  ;;  %v2603_v20 = vsel %vm791_vm2, %v2570_v46, 0.0  ;;  %v2572_v59 = vadd.f32 %v2481_v52, %v4613_v3 }
 0x2f5   : > { %v2604_v55 = vadd.f32 %v2603_v20, %v2602_v28  ;;  %v2609_v39 = vsel %vm791_vm2, %v2573_v41, 0.0 }
 0x2f6   : > { %v2405_v61 = vadd.f32 %v4567_v51, %v2369_v57  ;;  %v2485_v57 = vpop.permute.xlu0 %2484 }
 0x2f8   : > { %v4836_v15 = vmax.f32 %v2405_v61, 0.0  ;;  %v2487_v61 = vpop.permute.xlu1 %2486 }
 0x2f9   : > { %v2194_v13 = vpop.f32.mrf.mxu3 }
 0x2fa   : > { %v2229_v38 = vadd.f32 %v2194_v13, %v2072_v49  ;;  %2530 = vrot.lane.b32.xlu2 %v4836_v15, %s3522_s8  ;;  %v2607_v49 = vsel %vm791_vm2, %v2572_v59, 0.0 }
 0x2fc   : > { %v2370_v22 = vadd.f32 %v2335_v42, %v2229_v38  ;;  %v5345_v42 = vld [vmem:[#allocation5_spill] sm:$0xff] }
 0x2fd   : > { %v2574_v13 = vadd.f32 %v2485_v57, %v5345_v42 }
 0x2fe   : > { %v2406_v43 = vadd.f32 %v4567_v51, %v2370_v22  ;;  %v2575_v22 = vadd.f32 %v2487_v61, %v5346_v44 }
 0x300   : > { %v4842_v56 = vmax.f32 %v2406_v43, 0.0  ;;  %v2611_v43 = vsel %vm791_vm2, %v2574_v13, 0.0 }
 0x301   : > { %v2196_v26 = vpop.f32.mrf.mxu3 }
 0x302   : > { %v2230_v31 = vadd.f32 %v2196_v26, %v2073_v7  ;;  %2532 = vrot.lane.b32.xlu0 %v4842_v56, %s3522_s8  ;;  %v2489_v7 = vpop.permute.xlu2 %2488 }
 0x303   : > { %v2576_v54 = vadd.f32 %v2489_v7, %v5347_v4 }
 0x304   : > { %v2371_v60 = vadd.f32 %v2337_v25, %v2230_v31  ;;  %v2491_v31 = vpop.permute.xlu0 %2490  ;;  %v2613_v25 = vsel %vm791_vm2, %v2575_v22, 0.0 }
 0x305   : > { %v2577_v27 = vadd.f32 %v2491_v31, %v5348_v23  ;;  %v2615_v40 = vsel %vm791_vm2, %v2576_v54, 0.0 }
 0x306   : > { %v2407_v34 = vadd.f32 %v4567_v51, %v2371_v60  ;;  %v2571_v51 = vadd.f32 %v2479_v0, %v4605_v58 }
 0x307   : > { %v2617_v46 = vsel %vm791_vm2, %v2577_v27, 0.0 }
 0x308   : > { %v4847_v53 = vmax.f32 %v2407_v34, 0.0  ;;  %v2605_v63 = vsel %vm791_vm2, %v2571_v51, 0.0  ;;  %v2493_v34 = vpop.permute.xlu1 %2492 }
 0x309   : > { %v2606_v19 = vadd.f32 %v2605_v63, %v2604_v55  ;;  %v2578_v0 = vadd.f32 %v2493_v34, %v4695_v6 }
 0x30a   : > { %2534 = vrot.lane.b32.xlu1 %v4847_v53, %s3522_s8  ;;  %v2495_v18 = vpop.permute.xlu2 %2494 }
 0x30b   : > { %v2608_v38 = vadd.f32 %v2607_v49, %v2606_v19  ;;  %v2619_v20 = vsel %vm791_vm2, %v2578_v0, 0.0  ;;  %v2579_v63 = vadd.f32 %v2495_v18, %v4710_v35 }
 0x30c   : > { %v2497_v36 = vpop.permute.xlu0 %2496 }
 0x30d   : > { %v2610_v26 = vadd.f32 %v2609_v39, %v2608_v38  ;;  %v2580_v55 = vadd.f32 %v2497_v36, %v4723_v9  ;;  %v2621_v19 = vsel %vm791_vm2, %v2579_v63, 0.0 }
 0x30f   : > { %v2612_v60 = vadd.f32 %v2611_v43, %v2610_v26  ;;  %v2623_v57 = vsel %vm791_vm2, %v2580_v55, 0.0 }
 0x310   : > { %v2499_v10 = vpop.permute.xlu1 %2498 }
 0x311   : > { %v2614_v52 = vadd.f32 %v2613_v25, %v2612_v60  ;;  %v2581_v47 = vadd.f32 %v2499_v10, %v4734_v50 }
 0x312   : > { %v2501_v61 = vpop.permute.xlu2 %2500 }
 0x313   : > { %v2616_v51 = vadd.f32 %v2615_v40, %v2614_v52  ;;  %v2625_v13 = vsel %vm791_vm2, %v2581_v47, 0.0  ;;  %v2582_v39 = vadd.f32 %v2501_v61, %v4740_v1 }
 0x314   : > { %v2503_v41 = vpop.permute.xlu0 %2502 }
 0x315   : > { %v2618_v28 = vadd.f32 %v2617_v46, %v2616_v51  ;;  %v2583_v43 = vadd.f32 %v2503_v41, %v4746_v32  ;;  %v2627_v31 = vsel %vm791_vm2, %v2582_v39, 0.0 }
 0x317   : > { %v2620_v59 = vadd.f32 %v2619_v20, %v2618_v28  ;;  %v2629_v25 = vsel %vm791_vm2, %v2583_v43, 0.0 }
 0x318   : > { %v2505_v22 = vpop.permute.xlu1 %2504 }
 0x319   : > { %v2622_v49 = vadd.f32 %v2621_v19, %v2620_v59  ;;  %v2584_v26 = vadd.f32 %v2505_v22, %v4752_v29 }
 0x31a   : > { %v2507_v60 = vpop.permute.xlu2 %2506 }
 0x31b   : > { %v2624_v38 = vadd.f32 %v2623_v57, %v2622_v49  ;;  %v2631_v27 = vsel %vm791_vm2, %v2584_v26, 0.0  ;;  %v2585_v40 = vadd.f32 %v2507_v60, %v4758_v14 }
 0x31c   : > { %v2509_v54 = vpop.permute.xlu0 %2508 }
 0x31d   : > { %v2626_v7 = vadd.f32 %v2625_v13, %v2624_v38  ;;  %v2586_v46 = vadd.f32 %v2509_v54, %v4764_v5  ;;  %v2633_v36 = vsel %vm791_vm2, %v2585_v40, 0.0 }
 0x31f   : > { %v2628_v34 = vadd.f32 %v2627_v31, %v2626_v7  ;;  %v2635_v20 = vsel %vm791_vm2, %v2586_v46, 0.0 }
 0x320   : > { %v2511_v0 = vpop.permute.xlu1 %2510 }
 0x321   : > { %v2630_v52 = vadd.f32 %v2629_v25, %v2628_v34  ;;  %v2587_v51 = vadd.f32 %v2511_v0, %v4770_v24 }
 0x322   : > { %v2513_v28 = vpop.permute.xlu2 %2512 }
 0x323   : > { %v2632_v18 = vadd.f32 %v2631_v27, %v2630_v52  ;;  %v2637_v55 = vsel %vm791_vm2, %v2587_v51, 0.0  ;;  %v2588_v19 = vadd.f32 %v2513_v28, %v4776_v8 }
 0x325   : > { %v2634_v10 = vadd.f32 %v2633_v36, %v2632_v18  ;;  %v2639_v41 = vsel %vm791_vm2, %v2588_v19, 0.0 }
 0x327   : > { %v2636_v59 = vadd.f32 %v2635_v20, %v2634_v10  ;;  %v2698_v10 = vld [vmem:[%s5174_s5 + $0x8] sm:$0xff] }
 0x328   : > { %2720 = vmatpush.msrb.mxu2 %v2698_v10  ;;  %v2701_v10 = vld [vmem:[%s5175_s6] sm:$0x1] }
 0x329   : > { %v2638_v61 = vadd.f32 %v2637_v55, %v2636_v59 }
 0x32a   : > { %v2519_v38 = vpop.permute.xlu2 %2518 }
 0x32b   : > { %v2640_v22 = vadd.f32 %v2639_v41, %v2638_v61  ;;  %v2591_v31 = vadd.f32 %v2519_v38, %v4794_v21 }
 0x32c   : > { %v2515_v63 = vpop.permute.xlu0 %2514 }
 0x32d   : > { %v2589_v57 = vadd.f32 %v2515_v63, %v4782_v12  ;;  %v2645_v54 = vsel %vm791_vm2, %v2591_v31, 0.0  ;;  %v2697_v63 = vld [vmem:[%s5174_s5] sm:$0xff] }
 0x32e   : > { %2721 = vmatpush.msrb.mxu2 %v2697_v63 }
 0x32f   : > { %v2641_v13 = vsel %vm791_vm2, %v2589_v57, 0.0 }
 0x330   : > { %v2642_v7 = vadd.f32 %v2641_v13, %v2640_v22 }
 0x334   : > { %v2517_v47 = vpop.permute.xlu1 %2516 }
 0x335   : > { %v2590_v49 = vadd.f32 %v2517_v47, %v4788_v30 }
 0x337   : > { %v2643_v43 = vsel %vm791_vm2, %v2590_v49, 0.0 }
 0x338   : > { %v2644_v60 = vadd.f32 %v2643_v43, %v2642_v7 }
 0x33a   : > { %v2646_v0 = vadd.f32 %v2645_v54, %v2644_v60 }
 0x33c   : > { %v2525_v52 = vpop.permute.xlu2 %2524 }
 0x33d   : > { %v2594_v36 = vadd.f32 %v2525_v52, %v4812_v17 }
 0x33f   : > { %v2651_v59 = vsel %vm791_vm2, %v2594_v36, 0.0 }
 0x344   : > { %v2521_v39 = vpop.permute.xlu0 %2520 }
 0x345   : > { %v2592_v25 = vadd.f32 %v2521_v39, %v4800_v37 }
 0x347   : > { %v2647_v27 = vsel %vm791_vm2, %v2592_v25, 0.0 }
 0x348   : > { %v2648_v18 = vadd.f32 %v2647_v27, %v2646_v0 }
 0x34c   : > { %v2523_v26 = vpop.permute.xlu1 %2522 }
 0x34d   : > { %v2593_v34 = vadd.f32 %v2523_v26, %v4806_v33 }
 0x34f   : > { %v2649_v46 = vsel %vm791_vm2, %v2593_v34, 0.0 }
 0x350   : > { %v2650_v28 = vadd.f32 %v2649_v46, %v2648_v18 }
 0x352   : > { %v2652_v57 = vadd.f32 %v2651_v59, %v2650_v28 }
 0x354   : > { %v2531_v19 = vpop.permute.xlu2 %2530 }
 0x355   : > { %v2597_v13 = vadd.f32 %v2531_v19, %v4836_v15 }
 0x357   : > { %v2657_v39 = vsel %vm791_vm2, %v2597_v13, 0.0 }
 0x35c   : > { %v2527_v40 = vpop.permute.xlu0 %2526 }
 0x35d   : > { %v2595_v20 = vadd.f32 %v2527_v40, %v4818_v16 }
 0x35f   : > { %v2653_v47 = vsel %vm791_vm2, %v2595_v20, 0.0 }
 0x360   : > { %v2654_v41 = vadd.f32 %v2653_v47, %v2652_v57 }
 0x364   : > { %v2529_v51 = vpop.permute.xlu1 %2528 }
 0x365   : > { %v2596_v55 = vadd.f32 %v2529_v51, %v4830_v45  ;;  %v2672_v51 = vld [vmem:[%s5173_s4] sm:$0x1] }
 0x367   : > { %v2655_v49 = vsel %vm791_vm2, %v2596_v55, 0.0 }
 0x368   : > { %v2656_v22 = vadd.f32 %v2655_v49, %v2654_v41 }
 0x36a   : > { %v2658_v7 = vadd.f32 %v2657_v39, %v2656_v22 }
 0x374   : > { %v2533_v61 = vpop.permute.xlu0 %2532 }
 0x375   : > { %v2598_v38 = vadd.f32 %v2533_v61, %v4842_v56 }
 0x377   : > { %v2659_v43 = vsel %vm791_vm2, %v2598_v38, 0.0 }
 0x378   : > { %v2660_v25 = vadd.f32 %v2659_v43, %v2658_v7 }
 0x37c   : > { %v2535_v26 = vpop.permute.xlu1 %2534 }
 0x37d   : > { %v2599_v31 = vadd.f32 %v2535_v26, %v4847_v53 }
 0x37f   : > { %v2661_v60 = vsel %vm791_vm2, %v2599_v31, 0.0 }
 0x380   : > { %v2662_v34 = vadd.f32 %v2661_v60, %v2660_v25 }
 0x382   : > { %v2663_v54 = vrot.slane %v2662_v34, 4 }
 0x384   : > { %v2664_v27 = vadd.f32 %v2663_v54, %v2662_v34 }
 0x386   : > { %v2665_v52 = vrot.slane %v2664_v27, 2 }
 0x388   : > { %v2666_v0 = vadd.f32 %v2665_v52, %v2664_v27 }
 0x38a   : > { %v2667_v40 = vrot.slane %v2666_v0, 1 }
 0x38c   : > { %v2668_v46 = vadd.f32 %v2667_v40, %v2666_v0 }
 0x38e   : > { %v2669_v18 = vmul.f32 0.00390625, %v2668_v46 }
 0x390   : > { %3365 = vmatmul.msk.f32.vlgmr.msrb.gmra.mxu1 %vm791_vm2, %v2669_v18 }
 0x40d   : > { %v2693_v36 = vpop.f32.mrf.mxu1 }
 0x40e   : > { %v2694_v20 = vadd.f32 %v2693_v36, %v2672_v51 }
 0x410   : > { %v2696_v28 = vmax.f32 %v2694_v20, 0.0 }
 0x412   : > { %3366 = vmatmul.msk.f32.vlgmr.msrb.gmra.mxu2 %vm2702_vm7, %v2696_v28 }
 0x495   : > { %v2723_v63 = vpop.f32.mrf.mxu2 }
 0x496   : > { %v2724_v55 = vadd.f32 %v2723_v63, %v2701_v10 }
 0x498   : > { %2727 = vrot.lane.b32.xlu2 %v2724_v55, %s3522_s8 }
 0x4f2   : > { %v2728_v59 = vpop.permute.xlu2 %2727 }
 0x4f3   : > { %v2730_v47 = vmax.f32 %v2724_v55, %v2728_v59 }
 0x4f5   : > { %2735 = vrot.lane.b32.xlu0 %v2730_v47, %s3523_s14  ;;  %v2731_v41 = vsub.f32 %v2724_v55, %v2730_v47 }
 0x4f7   : > { %v2732_v13 = vmul.f32 1.442695, %v2731_v41 }
 0x567   : > { %v2736_v19 = vpop.permute.xlu0 %2735 }
 0x568   : > { %v2738_v57 = vsub.f32 %v2724_v55, %v2736_v19 }
 0x56a   : > { %v2739_v61 = vmul.f32 1.442695, %v2738_v57 }
 0x56c   : > { %3448 = vpow2.f32 %v2739_v61 }
 0x56d   : > { %3450 = vpow2.f32 %v2732_v13 }
 0x572   : > { %v3449_v49 = vpop.eup %3448 }
 0x573   : > { %2742 = vrot.lane.b32.xlu1 %v3449_v49, %s3522_s8  ;;  %v3451_v38 = vpop.eup %3450 }
 0x5e5   : > { %v2743_v22 = vpop.permute.xlu1 %2742 }
 0x5e6   : > { %v2745_v39 = vadd.f32 %v3451_v38, %v2743_v22 }
 0x5e8   : > { %3452 = vrcp.f32 %v2745_v39 }
 0x5ee   : > { %v3453_v43 = vpop.eup %3452 }
 0x5ef   : > { %v4933_v7 = vmul.f32 %v3453_v43, %v3451_v38  ;;  %2749 = vrot.lane.b32.xlu2 %v3453_v43, %s3523_s14  ;;  %s3478_s14 = scalar_lea.hbm %s5176_s7, 512 }
 0x649   : > { %v2750_v26 = vpop.permute.xlu2 %2749 }
 0x64a   : > { %v2752_v31 = vmul.f32 %v3449_v49, %v2750_v26 }
 0x64c   : > { %v2786_v25 = vperm.slane %v2752_v31, 0 }
 0x64e   : > { %v2789_v60 = vmul.f32 %v2786_v25, %v4593_v62  ;;  %v2788_v34 = vmul.f32 %v2786_v25, %v4585_v11  ;;  %v2787_v54 = vmul.f32 %v2786_v25, %v4573_v2  ;;  %v2792_v27 = vmul.f32 %v2786_v25, %v4625_v48 }
 0x64f   : > { %v2791_v52 = vmul.f32 %v2786_v25, %v4613_v3  ;;  %v2790_v0 = vmul.f32 %v2786_v25, %v4605_v58  ;;  %v2795_v40 = vmul.f32 %v2786_v25, %v5347_v4  ;;  %v2794_v46 = vmul.f32 %v2786_v25, %v5346_v44 }
 0x650   : > { %2855 = vrot.lane.b32.xlu2 %v2789_v60, %s3522_s8  ;;  %2853 = vrot.lane.b32.xlu1 %v2788_v34, %s3522_s8  ;;  %v2793_v18 = vmul.f32 %v2786_v25, %v5345_v42  ;;  %v2798_v51 = vmul.f32 %v2786_v25, %v4710_v35  ;;  %v2797_v36 = vmul.f32 %v2786_v25, %v4695_v6 }
 0x651   : > { %2851 = vrot.lane.b32.xlu0 %v2787_v54, %s3522_s8  ;;  %v2796_v20 = vmul.f32 %v2786_v25, %v5348_v23  ;;  %v2801_v28 = vmul.f32 %v2786_v25, %v4740_v1  ;;  %v2800_v10 = vmul.f32 %v2786_v25, %v4734_v50  ;;  %v2799_v63 = vmul.f32 %v2786_v25, %v4723_v9 }
 0x652   : > { %v2804_v55 = vmul.f32 %v2786_v25, %v4758_v14  ;;  %v2803_v59 = vmul.f32 %v2786_v25, %v4752_v29  ;;  %v2802_v47 = vmul.f32 %v2786_v25, %v4746_v32  ;;  %v2807_v19 = vmul.f32 %v2786_v25, %v4776_v8 }
 0x653   : > { %v2806_v57 = vmul.f32 %v2786_v25, %v4770_v24  ;;  %v2805_v61 = vmul.f32 %v2786_v25, %v4764_v5  ;;  %v2810_v49 = vmul.f32 %v2786_v25, %v4794_v21  ;;  %v2809_v41 = vmul.f32 %v2786_v25, %v4788_v30 }
 0x654   : > { %v2808_v13 = vmul.f32 %v2786_v25, %v4782_v12  ;;  %v2813_v38 = vmul.f32 %v2786_v25, %v4812_v17  ;;  %v2812_v22 = vmul.f32 %v2786_v25, %v4806_v33  ;;  %v2811_v39 = vmul.f32 %v2786_v25, %v4800_v37 }
 0x655   : > { %v2816_v43 = vmul.f32 %v2786_v25, %v4836_v15  ;;  %v2815_v26 = vmul.f32 %v2786_v25, %v4830_v45  ;;  %v2814_v31 = vmul.f32 %v2786_v25, %v4818_v16  ;;  %v2818_v60 = vmul.f32 %v2786_v25, %v4847_v53 }
 0x656   : > { %v2817_v34 = vmul.f32 %v2786_v25, %v4842_v56  ;;  %v5001_v54 = vperm.slane %v4933_v7, 0 }
 0x658   : > { %2861 = vrot.lane.b32.xlu2 %v2792_v27, %s3522_s8  ;;  %2859 = vrot.lane.b32.xlu1 %v2791_v52, %s3522_s8  ;;  %v2756_v27 = vmul.f32 %v5001_v54, %v4593_v62  ;;  %v2759_v25 = vmul.f32 %v5001_v54, %v4625_v48  ;;  %v2762_v62 = vmul.f32 %v5001_v54, %v5347_v4 }
 0x659   : > { %2857 = vrot.lane.b32.xlu0 %v2790_v0, %s3522_s8  ;;  %v2755_v48 = vmul.f32 %v5001_v54, %v4585_v11  ;;  %v2768_v11 = vmul.f32 %v5001_v54, %v4740_v1  ;;  %v2761_v1 = vmul.f32 %v5001_v54, %v5346_v44  ;;  %v2764_v44 = vmul.f32 %v5001_v54, %v4695_v6 }
 0x65a   : > { %v2777_v6 = vmul.f32 %v5001_v54, %v4794_v21  ;;  %v2770_v21 = vmul.f32 %v5001_v54, %v4752_v29  ;;  %v2783_v29 = vmul.f32 %v5001_v54, %v4836_v15 }
 0x660   : > { %2867 = vrot.lane.b32.xlu2 %v2795_v40, %s3522_s8  ;;  %2865 = vrot.lane.b32.xlu1 %v2794_v46, %s3522_s8 }
 0x661   : > { %2863 = vrot.lane.b32.xlu0 %v2793_v18, %s3522_s8 }
 0x668   : > { %2873 = vrot.lane.b32.xlu2 %v2798_v51, %s3522_s8  ;;  %2871 = vrot.lane.b32.xlu1 %v2797_v36, %s3522_s8  ;;  %v2765_v51 = vmul.f32 %v5001_v54, %v4710_v35  ;;  %v2758_v35 = vmul.f32 %v5001_v54, %v4613_v3  ;;  %v2771_v3 = vmul.f32 %v5001_v54, %v4758_v14 }
 0x669   : > { %2869 = vrot.lane.b32.xlu0 %v2796_v20, %s3522_s8  ;;  %v2774_v14 = vmul.f32 %v5001_v54, %v4776_v8  ;;  %v2767_v8 = vmul.f32 %v5001_v54, %v4734_v50  ;;  %v2780_v50 = vmul.f32 %v5001_v54, %v4812_v17  ;;  %v2773_v17 = vmul.f32 %v5001_v54, %v4770_v24 }
 0x66a   : > { %v2776_v24 = vmul.f32 %v5001_v54, %v4788_v30  ;;  %v2778_v30 = vmul.f32 %v5001_v54, %v4800_v37 }
 0x670   : > { %2879 = vrot.lane.b32.xlu2 %v2801_v28, %s3522_s8  ;;  %2877 = vrot.lane.b32.xlu1 %v2800_v10, %s3522_s8  ;;  %v2754_v28 = vmul.f32 %v5001_v54, %v4573_v2 }
 0x671   : > { %2875 = vrot.lane.b32.xlu0 %v2799_v63, %s3522_s8 }
 0x678   : > { %2885 = vrot.lane.b32.xlu2 %v2804_v55, %s3522_s8  ;;  %2883 = vrot.lane.b32.xlu1 %v2803_v59, %s3522_s8 }
 0x679   : > { %2881 = vrot.lane.b32.xlu0 %v2802_v47, %s3522_s8  ;;  %v2757_v47 = vmul.f32 %v5001_v54, %v4605_v58 }
 0x680   : > { %2891 = vrot.lane.b32.xlu2 %v2807_v19, %s3522_s8  ;;  %2889 = vrot.lane.b32.xlu1 %v2806_v57, %s3522_s8 }
 0x681   : > { %2887 = vrot.lane.b32.xlu0 %v2805_v61, %s3522_s8 }
 0x688   : > { %2897 = vrot.lane.b32.xlu2 %v2810_v49, %s3522_s8  ;;  %2895 = vrot.lane.b32.xlu1 %v2809_v41, %s3522_s8 }
 0x689   : > { %2893 = vrot.lane.b32.xlu0 %v2808_v13, %s3522_s8  ;;  %v2760_v13 = vmul.f32 %v5001_v54, %v5345_v42 }
 0x690   : > { %2903 = vrot.lane.b32.xlu2 %v2813_v38, %s3522_s8  ;;  %2901 = vrot.lane.b32.xlu1 %v2812_v22, %s3522_s8 }
 0x691   : > { %2899 = vrot.lane.b32.xlu0 %v2811_v39, %s3522_s8 }
 0x698   : > { %2909 = vrot.lane.b32.xlu2 %v2816_v43, %s3522_s8  ;;  %2907 = vrot.lane.b32.xlu1 %v2815_v26, %s3522_s8 }
 0x699   : > { %2905 = vrot.lane.b32.xlu0 %v2814_v31, %s3522_s8  ;;  %v2763_v31 = vmul.f32 %v5001_v54, %v5348_v23 }
 0x6a0   : > { %2913 = vrot.lane.b32.xlu1 %v2818_v60, %s3522_s8 }
 0x6a1   : > { %2911 = vrot.lane.b32.xlu0 %v2817_v34, %s3522_s8  ;;  %s3399_s8 = sshll.u32 %s3587_s28, 8  ;;  %s3012_s28 = scalar_lea.sflag [#allocation3], %s269_s15 }
 0x6a2   : > { %s3023_s20 = scalar_lea.hbm %s5176_s7, %s3399_s8 }
 0x6a3   : > { %s3026_s22 = sshll.u32 %s3023_s20, 4  ;;  %s3027_s22 = int_to_ptr.hbm [resolvable:$true] %s3026_s22 }
 0x6a4   : > { %s3472_s29 = sshra.s32 %s3027_s22, 4  ;;  %s3473_s29 = int_to_ptr.hbm [resolvable:$true] %s3472_s29 }
 0x6a5   : > { %s3474_s23 = scalar_lea.hbm %s3473_s29, 256  ;;  %p3479_p0 = scmp.lt.s32.totalorder %s3473_s29, %s5176_s7 }
 0x6a6   : > { %p3475_p11 = scmp.ne.s32.totalorder %s3473_s29, %s3474_s23  ;;  %p3480_p1 = scmp.lt.s32.totalorder %s3478_s14, %s3474_s23 }
 0x6a8   : > { %p3476_p12 = pnand %p3475_p11, %p3604_p5  ;;  %p3481_p2 = por %p3480_p1, %p3479_p0 }
 0x6aa   : > { %v2856_v52 = vpop.permute.xlu2 %2855  ;;  %p3477_p13 = pneg %p3476_p12 }
 0x6ab   : > { %v2949_v0 = vadd.f32 %v2856_v52, %v2756_v27 }
 0x6ac   : > { %p3482_p3 = pnand %p3481_p2, %p3477_p13 }
 0x6ad   : > { %2981 = vst.msk [vmem:[%s5007_s17 + $0x10] sm:$0xff] %vm791_vm2, %v2949_v0 }
 0x6b2   : > { %v2862_v40 = vpop.permute.xlu2 %2861 }
 0x6b3   : > { %v2952_v7 = vadd.f32 %v2862_v40, %v2759_v25  ;;  %v2766_v25 = vmul.f32 %v5001_v54, %v4723_v9 }
 0x6b5   : > { %2984 = vst.msk [vmem:[%s5007_s17 + $0x28] sm:$0xff] %vm791_vm2, %v2952_v7 }
 0x6ba   : > { %v2868_v46 = vpop.permute.xlu2 %2867 }
 0x6bb   : > { %v2955_v18 = vadd.f32 %v2868_v46, %v2762_v62 }
 0x6bd   : > { %2987 = vst.msk [vmem:[%s5007_s17 + $0x40] sm:$0xff] %vm791_vm2, %v2955_v18 }
 0x6c2   : > { %v2874_v36 = vpop.permute.xlu2 %2873  ;;  %v2854_v20 = vpop.permute.xlu1 %2853 }
 0x6c3   : > { %v2958_v10 = vadd.f32 %v2874_v36, %v2765_v51  ;;  %v2948_v63 = vadd.f32 %v2854_v20, %v2755_v48  ;;  %v2852_v4 = vpop.permute.xlu0 %2851  ;;  %v2769_v51 = vmul.f32 %v5001_v54, %v4746_v32 }
 0x6c4   : > { %v2947_v55 = vadd.f32 %v2852_v4, %v2754_v28 }
 0x6c5   : > { %2990 = vst.msk [vmem:[%s5007_s17 + $0x58] sm:$0xff] %vm791_vm2, %v2958_v10 }
 0x6c6   : > { %2980 = vst.msk [vmem:[%s5007_s17 + $0x8] sm:$0xff] %vm791_vm2, %v2948_v63  ;;  %v2772_v63 = vmul.f32 %v5001_v54, %v4764_v5 }
 0x6c7   : > { %2979 = vst.msk [vmem:[%s5007_s17] sm:$0xff] %vm791_vm2, %v2947_v55 }
 0x6ca   : > { %v2880_v2 = vpop.permute.xlu2 %2879  ;;  %v2860_v59 = vpop.permute.xlu1 %2859 }
 0x6cb   : > { %v2961_v19 = vadd.f32 %v2880_v2, %v2768_v11  ;;  %v2951_v57 = vadd.f32 %v2860_v59, %v2758_v35  ;;  %v2858_v61 = vpop.permute.xlu0 %2857  ;;  %v2775_v2 = vmul.f32 %v5001_v54, %v4782_v12 }
 0x6cc   : > { %v2950_v49 = vadd.f32 %v2858_v61, %v2757_v47 }
 0x6cd   : > { %2993 = vst.msk [vmem:[%s5007_s17 + $0x70] sm:$0xff] %vm791_vm2, %v2961_v19  ;;  %v2779_v19 = vmul.f32 %v5001_v54, %v4806_v33  ;;  %v2781_v33 = vmul.f32 %v5001_v54, %v4818_v16  ;;  %v2785_v16 = vmul.f32 %v5001_v54, %v4847_v53 }
 0x6ce   : > { %2983 = vst.msk [vmem:[%s5007_s17 + $0x20] sm:$0xff] %vm791_vm2, %v2951_v57 }
 0x6cf   : > { %2982 = vst.msk [vmem:[%s5007_s17 + $0x18] sm:$0xff] %vm791_vm2, %v2950_v49 }
 0x6d2   : > { %v2886_v58 = vpop.permute.xlu2 %2885  ;;  %v2866_v41 = vpop.permute.xlu1 %2865 }
 0x6d3   : > { %v2964_v38 = vadd.f32 %v2886_v58, %v2771_v3  ;;  %v2954_v22 = vadd.f32 %v2866_v41, %v2761_v1  ;;  %v2864_v39 = vpop.permute.xlu0 %2863  ;;  %v2782_v3 = vmul.f32 %v5001_v54, %v4830_v45 }
 0x6d4   : > { %v2953_v43 = vadd.f32 %v2864_v39, %v2760_v13  ;;  %v2784_v13 = vmul.f32 %v5001_v54, %v4842_v56 }
 0x6d5   : > { %2996 = vst.msk [vmem:[%s5007_s17 + $0x88] sm:$0xff] %vm791_vm2, %v2964_v38 }
 0x6d6   : > { %2986 = vst.msk [vmem:[%s5007_s17 + $0x38] sm:$0xff] %vm791_vm2, %v2954_v22 }
 0x6d7   : > { %2985 = vst.msk [vmem:[%s5007_s17 + $0x30] sm:$0xff] %vm791_vm2, %v2953_v43 }
 0x6da   : > { %v2892_v42 = vpop.permute.xlu2 %2891  ;;  %v2872_v26 = vpop.permute.xlu1 %2871 }
 0x6db   : > { %v2967_v60 = vadd.f32 %v2892_v42, %v2774_v14  ;;  %v2957_v34 = vadd.f32 %v2872_v26, %v2764_v44  ;;  %v2870_v27 = vpop.permute.xlu0 %2869 }
 0x6dc   : > { %v2956_v52 = vadd.f32 %v2870_v27, %v2763_v31 }
 0x6dd   : > { %2999 = vst.msk [vmem:[%s5007_s17 + $0xa0] sm:$0xff] %vm791_vm2, %v2967_v60 }
 0x6de   : > { %2989 = vst.msk [vmem:[%s5007_s17 + $0x50] sm:$0xff] %vm791_vm2, %v2957_v34 }
 0x6df   : > { %2988 = vst.msk [vmem:[%s5007_s17 + $0x48] sm:$0xff] %vm791_vm2, %v2956_v52 }
 0x6e2   : > { %v2898_v23 = vpop.permute.xlu2 %2897  ;;  %v2878_v0 = vpop.permute.xlu1 %2877 }
 0x6e3   : > { %v2970_v40 = vadd.f32 %v2898_v23, %v2777_v6  ;;  %v2960_v7 = vadd.f32 %v2878_v0, %v2767_v8  ;;  %v2876_v62 = vpop.permute.xlu0 %2875 }
 0x6e4   : > { %v2959_v46 = vadd.f32 %v2876_v62, %v2766_v25 }
 0x6e5   : > { %3002 = vst.msk [vmem:[%s5007_s17 + $0xb8] sm:$0xff] %vm791_vm2, %v2970_v40 }
 0x6e6   : > { %2992 = vst.msk [vmem:[%s5007_s17 + $0x68] sm:$0xff] %vm791_vm2, %v2960_v7 }
 0x6e7   : > { %2991 = vst.msk [vmem:[%s5007_s17 + $0x60] sm:$0xff] %vm791_vm2, %v2959_v46 }
 0x6ea   : > { %v2904_v9 = vpop.permute.xlu2 %2903  ;;  %v2884_v18 = vpop.permute.xlu1 %2883 }
 0x6eb   : > { %v2973_v48 = vadd.f32 %v2904_v9, %v2780_v50  ;;  %v2963_v36 = vadd.f32 %v2884_v18, %v2770_v21  ;;  %v2882_v20 = vpop.permute.xlu0 %2881 }
 0x6ec   : > { %v2962_v28 = vadd.f32 %v2882_v20, %v2769_v51 }
 0x6ed   : > { %3005 = vst.msk [vmem:[%s5007_s17 + $0xd0] sm:$0xff] %vm791_vm2, %v2973_v48 }
 0x6ee   : > { %2995 = vst.msk [vmem:[%s5007_s17 + $0x80] sm:$0xff] %vm791_vm2, %v2963_v36 }
 0x6ef   : > { %2994 = vst.msk [vmem:[%s5007_s17 + $0x78] sm:$0xff] %vm791_vm2, %v2962_v28 }
 0x6f2   : > { %v2910_v32 = vpop.permute.xlu2 %2909  ;;  %v2890_v10 = vpop.permute.xlu1 %2889 }
 0x6f3   : > { %v2976_v4 = vadd.f32 %v2910_v32, %v2783_v29  ;;  %v2966_v55 = vadd.f32 %v2890_v10, %v2773_v17  ;;  %v2888_v11 = vpop.permute.xlu0 %2887 }
 0x6f4   : > { %v2965_v35 = vadd.f32 %v2888_v11, %v2772_v63 }
 0x6f5   : > { %3008 = vst.msk [vmem:[%s5007_s17 + $0xe8] sm:$0xff] %vm791_vm2, %v2976_v4 }
 0x6f6   : > { %2998 = vst.msk [vmem:[%s5007_s17 + $0x98] sm:$0xff] %vm791_vm2, %v2966_v55 }
 0x6f7   : > { %2997 = vst.msk [vmem:[%s5007_s17 + $0x90] sm:$0xff] %vm791_vm2, %v2965_v35 }
 0x6fa   : > { %v2896_v15 = vpop.permute.xlu1 %2895 }
 0x6fb   : > { %v2969_v5 = vadd.f32 %v2896_v15, %v2776_v24  ;;  %v2894_v59 = vpop.permute.xlu0 %2893 }
 0x6fc   : > { %v2968_v47 = vadd.f32 %v2894_v59, %v2775_v2 }
 0x6fd   : > { %3001 = vst.msk [vmem:[%s5007_s17 + $0xb0] sm:$0xff] %vm791_vm2, %v2969_v5 }
 0x6fe   : > { %3000 = vst.msk [vmem:[%s5007_s17 + $0xa8] sm:$0xff] %vm791_vm2, %v2968_v47 }
 0x702   : > { %v2902_v57 = vpop.permute.xlu1 %2901 }
 0x703   : > { %v2972_v61 = vadd.f32 %v2902_v57, %v2779_v19  ;;  %v2900_v12 = vpop.permute.xlu0 %2899 }
 0x704   : > { %v2971_v49 = vadd.f32 %v2900_v12, %v2778_v30 }
 0x705   : > { %3004 = vst.msk [vmem:[%s5007_s17 + $0xc8] sm:$0xff] %vm791_vm2, %v2972_v61 }
 0x706   : > { %3003 = vst.msk [vmem:[%s5007_s17 + $0xc0] sm:$0xff] %vm791_vm2, %v2971_v49 }
 0x70a   : > { %v2908_v1 = vpop.permute.xlu1 %2907 }
 0x70b   : > { %v2975_v58 = vadd.f32 %v2908_v1, %v2782_v3  ;;  %v2906_v41 = vpop.permute.xlu0 %2905 }
 0x70c   : > { %v2974_v37 = vadd.f32 %v2906_v41, %v2781_v33 }
 0x70d   : > { %3007 = vst.msk [vmem:[%s5007_s17 + $0xe0] sm:$0xff] %vm791_vm2, %v2975_v58 }
 0x70e   : > { %3006 = vst.msk [vmem:[%s5007_s17 + $0xd8] sm:$0xff] %vm791_vm2, %v2974_v37 }
 0x712   : > { %v2914_v45 = vpop.permute.xlu1 %2913 }
 0x713   : > { %v2978_v38 = vadd.f32 %v2914_v45, %v2785_v16  ;;  %v2912_v22 = vpop.permute.xlu0 %2911 }
 0x714   : > { %v2977_v39 = vadd.f32 %v2912_v22, %v2784_v13 }
 0x715   : > { %3010 = vst.msk [vmem:[%s5007_s17 + $0xf8] sm:$0xff] %vm791_vm2, %v2978_v38 }
 0x716   : > { %3009 = vst.msk [vmem:[%s5007_s17 + $0xf0] sm:$0xff] %vm791_vm2, %v2977_v39 }
 0x717   : > { %3485 = shalt.err (!%p3482_p3)
}
 0x718   : > { %s3524_s15 = smov 128   ;;  %s3525_s17 = smov 8  }
 0x719   : > { %3404 = dma.vmem_to_hbm [thread:$0]  (%p3604_p5), %s3025_s21, 4096, %s3027_s22, %s3012_s28, %s3524_s15, %s3524_s15, %s3525_s17  }
 0x71a PF: > { %p3410_p4 = scmp.ge.s32.totalorder %s3520_s27, 2  ;;  %s3041_s18 = sand.u32 1, %s3508_s24  }
 0x71b   : > { %s3042_s19 = scalar_lea.sflag [#allocation3], %s3041_s18 }
 0x71c   : > { %p3407_p7 = pnand %p3410_p4, %p3608_p6 }
 0x71e   : > { %p3408_p8 = pneg %p3407_p7 }
 0x720   : > { %3503 = dma.done.wait (%p3408_p8), %s3042_s19, 4096  }
 0x721   : > { %3505 = vsyncadd (%p3408_p8), %s3042_s19, 4294963200  ;;  %p17_p9 = scmp.ge.s32.totalorder %s3591_s30, 4   ;;  %s5349_s24 = smov %s3512_s25 }
 0x722   : > { %s5350_s25 = smov %s3516_s26  ;;  %s5351_s26 = smov %s3602_s10 }
 0x723   : > { %s5352_s27 = smov %s3591_s30  ;;  %19 = sbr.rel (!%p17_p9) target bundleno = 3 (0x3), region = 83 }
 0x728   :  { %3048 = vsyncpa [#allocation3], 1 }
 0x729   :  { %3050 = vsyncpa [#allocation3 + $0x1], 1 }

</bundles_post_ra>
